<compile_context>
chip_gen: v7x
topology: tpu7x:2x2x1
jax: 0.10.0
libtpu: 0.0.40
codegen_flags: <defaults>
</compile_context>

<pallas_src>
import functools

import jax
import jax.numpy as jnp
from jax.experimental import pallas as pl
from jax.experimental.pallas import tpu as pltpu

# Module hyper-parameters (match the PyTorch module instantiation).
N_CONV = 4                           # n_conv_layer
KSIZE = 5                            # kernel_size
N_HIDDEN = 32                        # n_hidden_layer
IMG = 28                             # MNIST spatial size implied by the Linear
OUT_SP = IMG - KSIZE + 1             # 24 (valid conv, stride 1)
FLAT = N_CONV * OUT_SP * OUT_SP      # 4 * 24 * 24 = 2304  (= 18 * 128)
N_IN = IMG * IMG                     # 784
N_IN_PAD = 896                       # 7 * 128 (lane-dense K for the conv matmul)
N_OUT = 10
HID_PAD = 128                        # hidden dim zero-padded to full lane width
OUT_PAD = 128                        # lane-dense padded output width
FLAT_CHUNK = 256                     # FLAT chunk per inner step (full 256-lane MXU pass)
N_CHUNKS = FLAT // FLAT_CHUNK        # 9


def _round_up(x, m):
    return (x + m - 1) // m * m


# ---------------------------------------------------------------------------
# Fused kernel: conv-as-matmul -> (+bias) -> ReLU -> Linear -> ReLU -> Linear
#   x_ref  : [TB, 896]   bf16     wc_ref : [896, 2304] bf16   bc_ref : [1, 2304] f32
#   w1_ref : [2304, 128] bf16     b1_ref : [1, 128] f32
#   w2_ref : [128, 128]  bf16     b2_ref : [1, 128] f32
#   o_ref  : [TB, 128]   f32   (cols 10..127 are exactly zero; sliced off outside)
# ---------------------------------------------------------------------------
def fused_kernel(x_ref, wc_ref, bc_ref, w1_ref, b1_ref, w2_ref, b2_ref, o_ref):
    xb = x_ref[...]                                          # bf16, already cast host-side
    acc = jnp.zeros((x_ref.shape[0], HID_PAD), jnp.float32)  # hidden-layer accumulator

    # FLAT-chunked conv + ReLU + hidden accumulation: only one [TB, FLAT_CHUNK]
    # f32 chunk is ever live, instead of the full [TB, 2304] activation.
    for c in range(N_CHUNKS):                                # 9 static iterations
        lo = c * FLAT_CHUNK
        feat = jnp.dot(xb, wc_ref[:, lo:lo + FLAT_CHUNK],
                       preferred_element_type=jnp.float32)
        feat = jnp.maximum(feat + bc_ref[:, lo:lo + FLAT_CHUNK], 0.0)   # ReLU (f32, VPU)
        acc = acc + jnp.dot(feat.astype(jnp.bfloat16),
                            w1_ref[lo:lo + FLAT_CHUNK, :],
                            preferred_element_type=jnp.float32)

    h = jnp.maximum(acc + b1_ref[...], 0.0)                   # ReLU (f32, VPU)

    # Output layer (lane-padded to 128 columns).
    o_ref[...] = jnp.dot(h.astype(jnp.bfloat16), w2_ref[...],
                         preferred_element_type=jnp.float32) + b2_ref[...]


# ---------------------------------------------------------------------------
# Host-side, once-per-model weight folding (NOT in the per-call path).
# ---------------------------------------------------------------------------
def prepare_params(params, matmul_dtype=jnp.bfloat16):
    conv_w, conv_b, w1, b1, w2, b2 = params

    # Fold the 1-channel 5x5 conv into a dense (784, 2304) Toeplitz matrix by
    # pushing the 784 one-hot images through the (bias-free) conv: exact by
    # linearity.  Then zero-pad the K axis 784 -> 896 for a lane-dense layout.
    eye = jnp.eye(N_IN, dtype=jnp.float32).reshape(N_IN, 1, IMG, IMG)
    wc = jax.lax.conv_general_dilated(
        eye, conv_w, window_strides=(1, 1), padding="VALID",
        dimension_numbers=("NCHW", "OIHW", "NCHW")).reshape(N_IN, FLAT)
    wc = jnp.pad(wc, ((0, N_IN_PAD - N_IN), (0, 0)))                      # [896, 2304]

    bc = jnp.repeat(conv_b, OUT_SP * OUT_SP)[None, :]                     # [1, 2304]

    # Hidden layer zero-padded 32 -> 128 lanes; output layer 10 -> 128 lanes.
    w1p = jnp.zeros((FLAT, HID_PAD), jnp.float32).at[:, :N_HIDDEN].set(w1.T)
    b1p = jnp.zeros((1, HID_PAD), jnp.float32).at[:, :N_HIDDEN].set(b1)
    w2p = jnp.zeros((HID_PAD, OUT_PAD), jnp.float32).at[:N_HIDDEN, :N_OUT].set(w2.T)
    b2p = jnp.zeros((1, OUT_PAD), jnp.float32).at[:, :N_OUT].set(b2)

    return (wc.astype(matmul_dtype), bc.astype(jnp.float32),
            w1p.astype(matmul_dtype), b1p.astype(jnp.float32),
            w2p.astype(matmul_dtype), b2p.astype(jnp.float32))


# ---------------------------------------------------------------------------
# Forward pass wrapper.
# ---------------------------------------------------------------------------
def net_forward(x, prepared, *, batch_tile=512):
    """x: [B, 1, 28, 28] float32 (NCHW, like PyTorch).  Returns [B, 10] f32."""
    wc, bc, w1p, b1p, w2p, b2p = prepared
    B = x.shape[0]

    # Batch tile: multiple of 16 (bf16 sublane packing); clamp for small B so the
    # demo batch does not pay for a full 512-row tile.  Pad B up to a multiple of
    # the tile so every block and every output store is a full, unmasked tile.
    B16 = _round_up(B, 16)
    tb = min(batch_tile, B16)
    B_pad = _round_up(B16, tb)

    # Flatten (same row-major order as torch.flatten), cast to bf16 host-side
    # (halves the x DMA bytes), pad rows to B_pad and columns 784 -> 896.
    x_flat = x.reshape(B, N_IN).astype(jnp.bfloat16)
    x_flat = jnp.pad(x_flat, ((0, B_pad - B), (0, N_IN_PAD - N_IN)))

    grid = (B_pad // tb,)

    out_pad = pl.pallas_call(
        fused_kernel,
        out_shape=jax.ShapeDtypeStruct((B_pad, OUT_PAD), jnp.float32),
        grid_spec=pltpu.PrefetchScalarGridSpec(
            num_scalar_prefetch=0,
            grid=grid,
            in_specs=[
                pl.BlockSpec((tb, N_IN_PAD), lambda b: (b, 0)),           # x tile (bf16)
                pl.BlockSpec((N_IN_PAD, FLAT), lambda b: (0, 0)),         # conv Toeplitz
                pl.BlockSpec((1, FLAT), lambda b: (0, 0)),                # conv bias
                pl.BlockSpec((FLAT, HID_PAD), lambda b: (0, 0)),          # W1^T (padded)
                pl.BlockSpec((1, HID_PAD), lambda b: (0, 0)),             # b1 (padded)
                pl.BlockSpec((HID_PAD, OUT_PAD), lambda b: (0, 0)),       # W2^T (padded)
                pl.BlockSpec((1, OUT_PAD), lambda b: (0, 0)),             # b2 (padded)
            ],
            out_specs=pl.BlockSpec((tb, OUT_PAD), lambda b: (b, 0)),
        ),
        compiler_params=pltpu.CompilerParams(
            dimension_semantics=("parallel",),
            vmem_limit_bytes=48 * 1024 * 1024,   # safe on v5e/v6e (128 MiB) and v7x (64 MiB/TC)
        ),
    )(x_flat, wc, bc, w1p, b1p, w2p, b2p)

    return out_pad[:B, :N_OUT]


# ---------------------------------------------------------------------------
# Pure-JAX reference of the PyTorch forward pass (f32 everywhere).
# ---------------------------------------------------------------------------
def net_reference(x, params):
    conv_w, conv_b, w1, b1, w2, b2 = params
    conv = jax.lax.conv_general_dilated(
        x, conv_w, window_strides=(1, 1), padding="VALID",
        dimension_numbers=("NCHW", "OIHW", "NCHW"))
    conv = conv + conv_b[None, :, None, None]
    f = jnp.maximum(conv.reshape(x.shape[0], -1), 0.0)
    h = jnp.maximum(f @ w1.T + b1, 0.0)
    return h @ w2.T + b2


def init_params(key):
    """Deterministic, PyTorch-like uniform(-1/sqrt(fan_in), 1/sqrt(fan_in)) init."""
    ks = jax.random.split(key, 6)

    def u(k, shape, fan_in):
        bound = 1.0 / jnp.sqrt(jnp.float32(fan_in))
        return jax.random.uniform(k, shape, jnp.float32, -bound, bound)

    conv_w = u(ks[0], (N_CONV, 1, KSIZE, KSIZE), KSIZE * KSIZE)
    conv_b = u(ks[1], (N_CONV,), KSIZE * KSIZE)
    w1 = u(ks[2], (N_HIDDEN, FLAT), FLAT)
    b1 = u(ks[3], (N_HIDDEN,), FLAT)
    w2 = u(ks[4], (N_OUT, N_HIDDEN), N_HIDDEN)
    b2 = u(ks[5], (N_OUT,), N_HIDDEN)
    return conv_w, conv_b, w1, b1, w2, b2


if __name__ == "__main__":
    key = jax.random.PRNGKey(0)
    kp, kx = jax.random.split(key)
    params = init_params(kp)

    # Weight folding / padding happens once, outside the per-call path.
    prepared = prepare_params(params)

    x = jax.random.normal(kx, (2, 1, IMG, IMG), dtype=jnp.float32)

    fwd = jax.jit(functools.partial(net_forward, batch_tile=512))
    out = jax.block_until_ready(fwd(x, prepared))

    ref = net_reference(x, params)
    assert out.shape == (2, N_OUT), out.shape
    # bf16 matmul operands (f32 accumulation) => loosened tolerance vs f32 ref.
    assert jnp.allclose(out, ref, atol=2e-2, rtol=2e-2), (out, ref)
    print("KERNEL_OK")
</pallas_src>

<mosaic_0001>
module attributes {stable_mosaic.version = 11 : i64} {
  func.func @fused_kernel(%arg0: i32, %arg1: memref<16x896xbf16, #tpu.memory_space<vmem>>, %arg2: memref<896x2304xbf16, #tpu.memory_space<vmem>>, %arg3: memref<1x2304xf32, #tpu.memory_space<vmem>>, %arg4: memref<2304x128xbf16, #tpu.memory_space<vmem>>, %arg5: memref<1x128xf32, #tpu.memory_space<vmem>>, %arg6: memref<128x128xbf16, #tpu.memory_space<vmem>>, %arg7: memref<1x128xf32, #tpu.memory_space<vmem>>, %arg8: memref<16x128xf32, #tpu.memory_space<vmem>>) attributes {dimension_semantics = [#tpu.dimension_semantics<parallel>], iteration_bounds = array<i64: 1>, scalar_prefetch = 0 : i64, scratch_operands = 0 : i64, tpu.core_type = #tpu.core_type<tc>, window_params = [{transform_indices = @transform_0, window_bounds = array<i64: 16, 896>}, {pipeline_mode = #tpu.pipeline_mode<synchronous>, transform_indices = @transform_1, window_bounds = array<i64: 896, 2304>}, {pipeline_mode = #tpu.pipeline_mode<synchronous>, transform_indices = @transform_2, window_bounds = array<i64: 1, 2304>}, {pipeline_mode = #tpu.pipeline_mode<synchronous>, transform_indices = @transform_3, window_bounds = array<i64: 2304, 128>}, {pipeline_mode = #tpu.pipeline_mode<synchronous>, transform_indices = @transform_4, window_bounds = array<i64: 1, 128>}, {pipeline_mode = #tpu.pipeline_mode<synchronous>, transform_indices = @transform_5, window_bounds = array<i64: 128, 128>}, {pipeline_mode = #tpu.pipeline_mode<synchronous>, transform_indices = @transform_6, window_bounds = array<i64: 1, 128>}, {transform_indices = @transform_7, window_bounds = array<i64: 16, 128>}]} {
    %c0 = arith.constant 0 : index
    %c0_0 = arith.constant 0 : index
    %0 = vector.load %arg1[%c0, %c0_0] : memref<16x896xbf16, #tpu.memory_space<vmem>>, vector<16x896xbf16>
    %cst = arith.constant 0.000000e+00 : f32
    %1 = vector.broadcast %cst : f32 to vector<16x128xf32>
    %c0_1 = arith.constant 0 : index
    %c0_2 = arith.constant 0 : index
    %2 = vector.load %arg2[%c0_1, %c0_2] : memref<896x2304xbf16, #tpu.memory_space<vmem>>, vector<896x256xbf16>
    %cst_3 = arith.constant dense<0.000000e+00> : vector<16x256xf32>
    %3 = tpu.matmul %0, %2, %cst_3 {dimension_numbers = #tpu.dot_dimension_numbers<[1], [0], [0], [1], [0, 0, 1, 1], [], []>} : vector<16x896xbf16>, vector<896x256xbf16>, vector<16x256xf32> -> vector<16x256xf32>
    %c0_4 = arith.constant 0 : index
    %c0_5 = arith.constant 0 : index
    %4 = vector.load %arg3[%c0_4, %c0_5] : memref<1x2304xf32, #tpu.memory_space<vmem>>, vector<1x256xf32>
    %5 = vector.broadcast %4 : vector<1x256xf32> to vector<16x256xf32>
    %6 = arith.addf %3, %5 : vector<16x256xf32>
    %cst_6 = arith.constant 0.000000e+00 : f32
    %7 = vector.broadcast %cst_6 : f32 to vector<16x256xf32>
    %8 = arith.maximumf %6, %7 : vector<16x256xf32>
    %9 = arith.truncf %8 : vector<16x256xf32> to vector<16x256xbf16>
    %c0_7 = arith.constant 0 : index
    %c0_8 = arith.constant 0 : index
    %10 = vector.load %arg4[%c0_7, %c0_8] : memref<2304x128xbf16, #tpu.memory_space<vmem>>, vector<256x128xbf16>
    %cst_9 = arith.constant dense<0.000000e+00> : vector<16x128xf32>
    %11 = tpu.matmul %9, %10, %cst_9 {dimension_numbers = #tpu.dot_dimension_numbers<[1], [0], [0], [1], [0, 0, 1, 1], [], []>} : vector<16x256xbf16>, vector<256x128xbf16>, vector<16x128xf32> -> vector<16x128xf32>
    %12 = arith.addf %1, %11 : vector<16x128xf32>
    %c0_10 = arith.constant 0 : index
    %c256 = arith.constant 256 : index
    %13 = vector.load %arg2[%c0_10, %c256] : memref<896x2304xbf16, #tpu.memory_space<vmem>>, vector<896x256xbf16>
    %cst_11 = arith.constant dense<0.000000e+00> : vector<16x256xf32>
    %14 = tpu.matmul %0, %13, %cst_11 {dimension_numbers = #tpu.dot_dimension_numbers<[1], [0], [0], [1], [0, 0, 1, 1], [], []>} : vector<16x896xbf16>, vector<896x256xbf16>, vector<16x256xf32> -> vector<16x256xf32>
    %c0_12 = arith.constant 0 : index
    %c256_13 = arith.constant 256 : index
    %15 = vector.load %arg3[%c0_12, %c256_13] : memref<1x2304xf32, #tpu.memory_space<vmem>>, vector<1x256xf32>
    %16 = vector.broadcast %15 : vector<1x256xf32> to vector<16x256xf32>
    %17 = arith.addf %14, %16 : vector<16x256xf32>
    %cst_14 = arith.constant 0.000000e+00 : f32
    %18 = vector.broadcast %cst_14 : f32 to vector<16x256xf32>
    %19 = arith.maximumf %17, %18 : vector<16x256xf32>
    %20 = arith.truncf %19 : vector<16x256xf32> to vector<16x256xbf16>
    %c256_15 = arith.constant 256 : index
    %c0_16 = arith.constant 0 : index
    %21 = vector.load %arg4[%c256_15, %c0_16] : memref<2304x128xbf16, #tpu.memory_space<vmem>>, vector<256x128xbf16>
    %cst_17 = arith.constant dense<0.000000e+00> : vector<16x128xf32>
    %22 = tpu.matmul %20, %21, %cst_17 {dimension_numbers = #tpu.dot_dimension_numbers<[1], [0], [0], [1], [0, 0, 1, 1], [], []>} : vector<16x256xbf16>, vector<256x128xbf16>, vector<16x128xf32> -> vector<16x128xf32>
    %23 = arith.addf %12, %22 : vector<16x128xf32>
    %c0_18 = arith.constant 0 : index
    %c512 = arith.constant 512 : index
    %24 = vector.load %arg2[%c0_18, %c512] : memref<896x2304xbf16, #tpu.memory_space<vmem>>, vector<896x256xbf16>
    %cst_19 = arith.constant dense<0.000000e+00> : vector<16x256xf32>
    %25 = tpu.matmul %0, %24, %cst_19 {dimension_numbers = #tpu.dot_dimension_numbers<[1], [0], [0], [1], [0, 0, 1, 1], [], []>} : vector<16x896xbf16>, vector<896x256xbf16>, vector<16x256xf32> -> vector<16x256xf32>
    %c0_20 = arith.constant 0 : index
    %c512_21 = arith.constant 512 : index
    %26 = vector.load %arg3[%c0_20, %c512_21] : memref<1x2304xf32, #tpu.memory_space<vmem>>, vector<1x256xf32>
    %27 = vector.broadcast %26 : vector<1x256xf32> to vector<16x256xf32>
    %28 = arith.addf %25, %27 : vector<16x256xf32>
    %cst_22 = arith.constant 0.000000e+00 : f32
    %29 = vector.broadcast %cst_22 : f32 to vector<16x256xf32>
    %30 = arith.maximumf %28, %29 : vector<16x256xf32>
    %31 = arith.truncf %30 : vector<16x256xf32> to vector<16x256xbf16>
    %c512_23 = arith.constant 512 : index
    %c0_24 = arith.constant 0 : index
    %32 = vector.load %arg4[%c512_23, %c0_24] : memref<2304x128xbf16, #tpu.memory_space<vmem>>, vector<256x128xbf16>
    %cst_25 = arith.constant dense<0.000000e+00> : vector<16x128xf32>
    %33 = tpu.matmul %31, %32, %cst_25 {dimension_numbers = #tpu.dot_dimension_numbers<[1], [0], [0], [1], [0, 0, 1, 1], [], []>} : vector<16x256xbf16>, vector<256x128xbf16>, vector<16x128xf32> -> vector<16x128xf32>
    %34 = arith.addf %23, %33 : vector<16x128xf32>
    %c0_26 = arith.constant 0 : index
    %c768 = arith.constant 768 : index
    %35 = vector.load %arg2[%c0_26, %c768] : memref<896x2304xbf16, #tpu.memory_space<vmem>>, vector<896x256xbf16>
    %cst_27 = arith.constant dense<0.000000e+00> : vector<16x256xf32>
    %36 = tpu.matmul %0, %35, %cst_27 {dimension_numbers = #tpu.dot_dimension_numbers<[1], [0], [0], [1], [0, 0, 1, 1], [], []>} : vector<16x896xbf16>, vector<896x256xbf16>, vector<16x256xf32> -> vector<16x256xf32>
    %c0_28 = arith.constant 0 : index
    %c768_29 = arith.constant 768 : index
    %37 = vector.load %arg3[%c0_28, %c768_29] : memref<1x2304xf32, #tpu.memory_space<vmem>>, vector<1x256xf32>
    %38 = vector.broadcast %37 : vector<1x256xf32> to vector<16x256xf32>
    %39 = arith.addf %36, %38 : vector<16x256xf32>
    %cst_30 = arith.constant 0.000000e+00 : f32
    %40 = vector.broadcast %cst_30 : f32 to vector<16x256xf32>
    %41 = arith.maximumf %39, %40 : vector<16x256xf32>
    %42 = arith.truncf %41 : vector<16x256xf32> to vector<16x256xbf16>
    %c768_31 = arith.constant 768 : index
    %c0_32 = arith.constant 0 : index
    %43 = vector.load %arg4[%c768_31, %c0_32] : memref<2304x128xbf16, #tpu.memory_space<vmem>>, vector<256x128xbf16>
    %cst_33 = arith.constant dense<0.000000e+00> : vector<16x128xf32>
    %44 = tpu.matmul %42, %43, %cst_33 {dimension_numbers = #tpu.dot_dimension_numbers<[1], [0], [0], [1], [0, 0, 1, 1], [], []>} : vector<16x256xbf16>, vector<256x128xbf16>, vector<16x128xf32> -> vector<16x128xf32>
    %45 = arith.addf %34, %44 : vector<16x128xf32>
    %c0_34 = arith.constant 0 : index
    %c1024 = arith.constant 1024 : index
    %46 = vector.load %arg2[%c0_34, %c1024] : memref<896x2304xbf16, #tpu.memory_space<vmem>>, vector<896x256xbf16>
    %cst_35 = arith.constant dense<0.000000e+00> : vector<16x256xf32>
    %47 = tpu.matmul %0, %46, %cst_35 {dimension_numbers = #tpu.dot_dimension_numbers<[1], [0], [0], [1], [0, 0, 1, 1], [], []>} : vector<16x896xbf16>, vector<896x256xbf16>, vector<16x256xf32> -> vector<16x256xf32>
    %c0_36 = arith.constant 0 : index
    %c1024_37 = arith.constant 1024 : index
    %48 = vector.load %arg3[%c0_36, %c1024_37] : memref<1x2304xf32, #tpu.memory_space<vmem>>, vector<1x256xf32>
    %49 = vector.broadcast %48 : vector<1x256xf32> to vector<16x256xf32>
    %50 = arith.addf %47, %49 : vector<16x256xf32>
    %cst_38 = arith.constant 0.000000e+00 : f32
    %51 = vector.broadcast %cst_38 : f32 to vector<16x256xf32>
    %52 = arith.maximumf %50, %51 : vector<16x256xf32>
    %53 = arith.truncf %52 : vector<16x256xf32> to vector<16x256xbf16>
    %c1024_39 = arith.constant 1024 : index
    %c0_40 = arith.constant 0 : index
    %54 = vector.load %arg4[%c1024_39, %c0_40] : memref<2304x128xbf16, #tpu.memory_space<vmem>>, vector<256x128xbf16>
    %cst_41 = arith.constant dense<0.000000e+00> : vector<16x128xf32>
    %55 = tpu.matmul %53, %54, %cst_41 {dimension_numbers = #tpu.dot_dimension_numbers<[1], [0], [0], [1], [0, 0, 1, 1], [], []>} : vector<16x256xbf16>, vector<256x128xbf16>, vector<16x128xf32> -> vector<16x128xf32>
    %56 = arith.addf %45, %55 : vector<16x128xf32>
    %c0_42 = arith.constant 0 : index
    %c1280 = arith.constant 1280 : index
    %57 = vector.load %arg2[%c0_42, %c1280] : memref<896x2304xbf16, #tpu.memory_space<vmem>>, vector<896x256xbf16>
    %cst_43 = arith.constant dense<0.000000e+00> : vector<16x256xf32>
    %58 = tpu.matmul %0, %57, %cst_43 {dimension_numbers = #tpu.dot_dimension_numbers<[1], [0], [0], [1], [0, 0, 1, 1], [], []>} : vector<16x896xbf16>, vector<896x256xbf16>, vector<16x256xf32> -> vector<16x256xf32>
    %c0_44 = arith.constant 0 : index
    %c1280_45 = arith.constant 1280 : index
    %59 = vector.load %arg3[%c0_44, %c1280_45] : memref<1x2304xf32, #tpu.memory_space<vmem>>, vector<1x256xf32>
    %60 = vector.broadcast %59 : vector<1x256xf32> to vector<16x256xf32>
    %61 = arith.addf %58, %60 : vector<16x256xf32>
    %cst_46 = arith.constant 0.000000e+00 : f32
    %62 = vector.broadcast %cst_46 : f32 to vector<16x256xf32>
    %63 = arith.maximumf %61, %62 : vector<16x256xf32>
    %64 = arith.truncf %63 : vector<16x256xf32> to vector<16x256xbf16>
    %c1280_47 = arith.constant 1280 : index
    %c0_48 = arith.constant 0 : index
    %65 = vector.load %arg4[%c1280_47, %c0_48] : memref<2304x128xbf16, #tpu.memory_space<vmem>>, vector<256x128xbf16>
    %cst_49 = arith.constant dense<0.000000e+00> : vector<16x128xf32>
    %66 = tpu.matmul %64, %65, %cst_49 {dimension_numbers = #tpu.dot_dimension_numbers<[1], [0], [0], [1], [0, 0, 1, 1], [], []>} : vector<16x256xbf16>, vector<256x128xbf16>, vector<16x128xf32> -> vector<16x128xf32>
    %67 = arith.addf %56, %66 : vector<16x128xf32>
    %c0_50 = arith.constant 0 : index
    %c1536 = arith.constant 1536 : index
    %68 = vector.load %arg2[%c0_50, %c1536] : memref<896x2304xbf16, #tpu.memory_space<vmem>>, vector<896x256xbf16>
    %cst_51 = arith.constant dense<0.000000e+00> : vector<16x256xf32>
    %69 = tpu.matmul %0, %68, %cst_51 {dimension_numbers = #tpu.dot_dimension_numbers<[1], [0], [0], [1], [0, 0, 1, 1], [], []>} : vector<16x896xbf16>, vector<896x256xbf16>, vector<16x256xf32> -> vector<16x256xf32>
    %c0_52 = arith.constant 0 : index
    %c1536_53 = arith.constant 1536 : index
    %70 = vector.load %arg3[%c0_52, %c1536_53] : memref<1x2304xf32, #tpu.memory_space<vmem>>, vector<1x256xf32>
    %71 = vector.broadcast %70 : vector<1x256xf32> to vector<16x256xf32>
    %72 = arith.addf %69, %71 : vector<16x256xf32>
    %cst_54 = arith.constant 0.000000e+00 : f32
    %73 = vector.broadcast %cst_54 : f32 to vector<16x256xf32>
    %74 = arith.maximumf %72, %73 : vector<16x256xf32>
    %75 = arith.truncf %74 : vector<16x256xf32> to vector<16x256xbf16>
    %c1536_55 = arith.constant 1536 : index
    %c0_56 = arith.constant 0 : index
    %76 = vector.load %arg4[%c1536_55, %c0_56] : memref<2304x128xbf16, #tpu.memory_space<vmem>>, vector<256x128xbf16>
    %cst_57 = arith.constant dense<0.000000e+00> : vector<16x128xf32>
    %77 = tpu.matmul %75, %76, %cst_57 {dimension_numbers = #tpu.dot_dimension_numbers<[1], [0], [0], [1], [0, 0, 1, 1], [], []>} : vector<16x256xbf16>, vector<256x128xbf16>, vector<16x128xf32> -> vector<16x128xf32>
    %78 = arith.addf %67, %77 : vector<16x128xf32>
    %c0_58 = arith.constant 0 : index
    %c1792 = arith.constant 1792 : index
    %79 = vector.load %arg2[%c0_58, %c1792] : memref<896x2304xbf16, #tpu.memory_space<vmem>>, vector<896x256xbf16>
    %cst_59 = arith.constant dense<0.000000e+00> : vector<16x256xf32>
    %80 = tpu.matmul %0, %79, %cst_59 {dimension_numbers = #tpu.dot_dimension_numbers<[1], [0], [0], [1], [0, 0, 1, 1], [], []>} : vector<16x896xbf16>, vector<896x256xbf16>, vector<16x256xf32> -> vector<16x256xf32>
    %c0_60 = arith.constant 0 : index
    %c1792_61 = arith.constant 1792 : index
    %81 = vector.load %arg3[%c0_60, %c1792_61] : memref<1x2304xf32, #tpu.memory_space<vmem>>, vector<1x256xf32>
    %82 = vector.broadcast %81 : vector<1x256xf32> to vector<16x256xf32>
    %83 = arith.addf %80, %82 : vector<16x256xf32>
    %cst_62 = arith.constant 0.000000e+00 : f32
    %84 = vector.broadcast %cst_62 : f32 to vector<16x256xf32>
    %85 = arith.maximumf %83, %84 : vector<16x256xf32>
    %86 = arith.truncf %85 : vector<16x256xf32> to vector<16x256xbf16>
    %c1792_63 = arith.constant 1792 : index
    %c0_64 = arith.constant 0 : index
    %87 = vector.load %arg4[%c1792_63, %c0_64] : memref<2304x128xbf16, #tpu.memory_space<vmem>>, vector<256x128xbf16>
    %cst_65 = arith.constant dense<0.000000e+00> : vector<16x128xf32>
    %88 = tpu.matmul %86, %87, %cst_65 {dimension_numbers = #tpu.dot_dimension_numbers<[1], [0], [0], [1], [0, 0, 1, 1], [], []>} : vector<16x256xbf16>, vector<256x128xbf16>, vector<16x128xf32> -> vector<16x128xf32>
    %89 = arith.addf %78, %88 : vector<16x128xf32>
    %c0_66 = arith.constant 0 : index
    %c2048 = arith.constant 2048 : index
    %90 = vector.load %arg2[%c0_66, %c2048] : memref<896x2304xbf16, #tpu.memory_space<vmem>>, vector<896x256xbf16>
    %cst_67 = arith.constant dense<0.000000e+00> : vector<16x256xf32>
    %91 = tpu.matmul %0, %90, %cst_67 {dimension_numbers = #tpu.dot_dimension_numbers<[1], [0], [0], [1], [0, 0, 1, 1], [], []>} : vector<16x896xbf16>, vector<896x256xbf16>, vector<16x256xf32> -> vector<16x256xf32>
    %c0_68 = arith.constant 0 : index
    %c2048_69 = arith.constant 2048 : index
    %92 = vector.load %arg3[%c0_68, %c2048_69] : memref<1x2304xf32, #tpu.memory_space<vmem>>, vector<1x256xf32>
    %93 = vector.broadcast %92 : vector<1x256xf32> to vector<16x256xf32>
    %94 = arith.addf %91, %93 : vector<16x256xf32>
    %cst_70 = arith.constant 0.000000e+00 : f32
    %95 = vector.broadcast %cst_70 : f32 to vector<16x256xf32>
    %96 = arith.maximumf %94, %95 : vector<16x256xf32>
    %97 = arith.truncf %96 : vector<16x256xf32> to vector<16x256xbf16>
    %c2048_71 = arith.constant 2048 : index
    %c0_72 = arith.constant 0 : index
    %98 = vector.load %arg4[%c2048_71, %c0_72] : memref<2304x128xbf16, #tpu.memory_space<vmem>>, vector<256x128xbf16>
    %cst_73 = arith.constant dense<0.000000e+00> : vector<16x128xf32>
    %99 = tpu.matmul %97, %98, %cst_73 {dimension_numbers = #tpu.dot_dimension_numbers<[1], [0], [0], [1], [0, 0, 1, 1], [], []>} : vector<16x256xbf16>, vector<256x128xbf16>, vector<16x128xf32> -> vector<16x128xf32>
    %100 = arith.addf %89, %99 : vector<16x128xf32>
    %c0_74 = arith.constant 0 : index
    %c0_75 = arith.constant 0 : index
    %101 = vector.load %arg5[%c0_74, %c0_75] : memref<1x128xf32, #tpu.memory_space<vmem>>, vector<1x128xf32>
    %102 = vector.broadcast %101 : vector<1x128xf32> to vector<16x128xf32>
    %103 = arith.addf %100, %102 : vector<16x128xf32>
    %cst_76 = arith.constant 0.000000e+00 : f32
    %104 = vector.broadcast %cst_76 : f32 to vector<16x128xf32>
    %105 = arith.maximumf %103, %104 : vector<16x128xf32>
    %106 = arith.truncf %105 : vector<16x128xf32> to vector<16x128xbf16>
    %c0_77 = arith.constant 0 : index
    %c0_78 = arith.constant 0 : index
    %107 = vector.load %arg6[%c0_77, %c0_78] : memref<128x128xbf16, #tpu.memory_space<vmem>>, vector<128x128xbf16>
    %cst_79 = arith.constant dense<0.000000e+00> : vector<16x128xf32>
    %108 = tpu.matmul %106, %107, %cst_79 {dimension_numbers = #tpu.dot_dimension_numbers<[1], [0], [0], [1], [0, 0, 1, 1], [], []>} : vector<16x128xbf16>, vector<128x128xbf16>, vector<16x128xf32> -> vector<16x128xf32>
    %c0_80 = arith.constant 0 : index
    %c0_81 = arith.constant 0 : index
    %109 = vector.load %arg7[%c0_80, %c0_81] : memref<1x128xf32, #tpu.memory_space<vmem>>, vector<1x128xf32>
    %110 = vector.broadcast %109 : vector<1x128xf32> to vector<16x128xf32>
    %111 = arith.addf %108, %110 : vector<16x128xf32>
    %c0_82 = arith.constant 0 : index
    %c0_83 = arith.constant 0 : index
    %112 = vector.load %arg8[%c0_82, %c0_83] : memref<16x128xf32, #tpu.memory_space<vmem>>, vector<16x128xf32>
    tpu.vector_store %arg8[%c0_82, %c0_83], %111 {strides = array<i32>} : memref<16x128xf32, #tpu.memory_space<vmem>>, vector<16x128xf32>,
    return
  }
  func.func @transform_0(%arg0: i32) -> (i32, i32) {
    %c0_i32 = arith.constant 0 : i32
    %c0_i32_0 = arith.constant 0 : i32
    return %arg0, %c0_i32 : i32, i32
  }
  func.func @transform_1(%arg0: i32) -> (i32, i32) {
    %c0_i32 = arith.constant 0 : i32
    %c0_i32_0 = arith.constant 0 : i32
    %c0_i32_1 = arith.constant 0 : i32
    return %c0_i32, %c0_i32_0 : i32, i32
  }
  func.func @transform_2(%arg0: i32) -> (i32, i32) {
    %c0_i32 = arith.constant 0 : i32
    %c0_i32_0 = arith.constant 0 : i32
    %c0_i32_1 = arith.constant 0 : i32
    return %c0_i32, %c0_i32_0 : i32, i32
  }
  func.func @transform_3(%arg0: i32) -> (i32, i32) {
    %c0_i32 = arith.constant 0 : i32
    %c0_i32_0 = arith.constant 0 : i32
    %c0_i32_1 = arith.constant 0 : i32
    return %c0_i32, %c0_i32_0 : i32, i32
  }
  func.func @transform_4(%arg0: i32) -> (i32, i32) {
    %c0_i32 = arith.constant 0 : i32
    %c0_i32_0 = arith.constant 0 : i32
    %c0_i32_1 = arith.constant 0 : i32
    return %c0_i32, %c0_i32_0 : i32, i32
  }
  func.func @transform_5(%arg0: i32) -> (i32, i32) {
    %c0_i32 = arith.constant 0 : i32
    %c0_i32_0 = arith.constant 0 : i32
    %c0_i32_1 = arith.constant 0 : i32
    return %c0_i32, %c0_i32_0 : i32, i32
  }
  func.func @transform_6(%arg0: i32) -> (i32, i32) {
    %c0_i32 = arith.constant 0 : i32
    %c0_i32_0 = arith.constant 0 : i32
    %c0_i32_1 = arith.constant 0 : i32
    return %c0_i32, %c0_i32_0 : i32, i32
  }
  func.func @transform_7(%arg0: i32) -> (i32, i32) {
    %c0_i32 = arith.constant 0 : i32
    %c0_i32_0 = arith.constant 0 : i32
    return %arg0, %c0_i32 : i32, i32
  }
}

</mosaic_0001>

<bundles_post_ra>
// kernel: net_forward.1
= control target key start
LH: loop header
LB: loop body
LE: loop exit
PB: predicated region body
PF: predicated region fallthrough
CT: control target
= control target key end

     0   :  { %12 = vsyncpa [#allocation3], 0  ;;  %s13392_s0 = inlined_call_operand.vmem [shape: bf16[16,896], index: 0, kind: input, shape index: {}]   ;;  %s13393_s1 = inlined_call_operand.hbm [shape: bf16[896,2304], index: 1, kind: input, shape index: {}]   ;;  %s13394_s2 = inlined_call_operand.hbm [shape: f32[1,2304], index: 2, kind: input, shape index: {}]   ;;  %s13395_s3 = inlined_call_operand.hbm [shape: bf16[2304,128], index: 3, kind: input, shape index: {}]   ;;  %s13396_s4 = inlined_call_operand.hbm [shape: f32[1,128], index: 4, kind: input, shape index: {}]   ;;  %s13397_s5 = inlined_call_operand.hbm [shape: bf16[128,128], index: 5, kind: input, shape index: {}]   ;;  %s13398_s6 = inlined_call_operand.hbm [shape: f32[1,128], index: 6, kind: input, shape index: {}]   ;;  %s13399_s7 = inlined_call_operand.vmem [shape: f32[16,128], index: 7, kind: output, shape index: {}]  }
   0x1   :  { %13 = vsyncpa [#allocation5], 0 }
   0x2   :  { %14 = vsyncpa [#allocation8], 0 }
   0x3   :  { %15 = vsyncpa [#allocation11], 0  ;;  %s12970_s24 = smov [#allocation4]   ;;  %s12971_s26 = smov [#allocation7]  }
   0x4   :  { %s36_s25 = sshll.u32 %s12970_s24, 4  ;;  %s58_s27 = sshll.u32 %s12971_s26, 4  ;;  %s37_s25 = int_to_ptr.vmem [resolvable:$true] %s36_s25  ;;  %s59_s27 = int_to_ptr.vmem [resolvable:$true] %s58_s27 }
   0x5   :  { %s12830_s30 = scalar_lea.hbm %s13394_s2, 288 }
   0x6   :  { %p12831_p0 = scmp.ne.s32.totalorder %s13394_s2, %s12830_s30  ;;  %p12834_p1 = scmp.lt.u32.totalorder %s12830_s30, %s13394_s2 }
   0x8   :  { %p12836_p2 = pnand %p12834_p1, %p12831_p0 }
   0xa   :  { %12839 = shalt.err (!%p12836_p2)
}
   0xb   :  { %s12840_s12 = scalar_lea.vmem %s37_s25, 288  ;;  %p12845_p4 = scmp.lt.s32.totalorder %s37_s25, %s37_s25 }
   0xc   :  { %p12841_p3 = scmp.ne.s32.totalorder %s37_s25, %s12840_s12  ;;  %p12846_p5 = scmp.lt.s32.totalorder %s12840_s12, %s12840_s12 }
   0xe   :  { %p12847_p6 = por %p12846_p5, %p12845_p4 }
  0x10   :  { %p12848_p7 = pnand %p12847_p6, %p12841_p3 }
  0x12   :  { %12851 = shalt.err (!%p12848_p7)
}
  0x13   :  { %39 = dma.hbm_to_vmem [thread:$0]  %s13394_s2, 288, %s37_s25, [#allocation5]  }
  0x14   :  { %s12852_s17 = scalar_lea.hbm %s13396_s4, 16 }
  0x15   :  { %p12853_p8 = scmp.ne.s32.totalorder %s13396_s4, %s12852_s17  ;;  %p12856_p9 = scmp.lt.u32.totalorder %s12852_s17, %s13396_s4 }
  0x17   :  { %p12858_p10 = pnand %p12856_p9, %p12853_p8 }
  0x19   :  { %12861 = shalt.err (!%p12858_p10)
}
  0x1a   :  { %s12862_s22 = scalar_lea.vmem %s59_s27, 16  ;;  %s12866_s23 = scalar_lea.vmem %s59_s27, 32 }
  0x1b   :  { %p12863_p11 = scmp.ne.s32.totalorder %s59_s27, %s12862_s22  ;;  %p12867_p12 = scmp.lt.s32.totalorder %s59_s27, %s59_s27 }
  0x1c   :  { %p12868_p13 = scmp.lt.s32.totalorder %s12866_s23, %s12862_s22 }
  0x1e   :  { %p12869_p0 = por %p12868_p13, %p12867_p12 }
  0x20   :  { %p12870_p1 = pnand %p12869_p0, %p12863_p11 }
  0x22   :  { %12873 = shalt.err (!%p12870_p1)
}
  0x23   :  { %61 = dma.hbm_to_vmem [thread:$0]  %s13396_s4, 16, %s59_s27, [#allocation8]  }
  0x24   :  { %s12972_s25 = smov [#allocation2]   ;;  %s12874_s30 = scalar_lea.hbm %s13393_s1, 129024 }
  0x25   :  { %s23_s26 = sshll.u32 %s12972_s25, 4  ;;  %p12875_p2 = scmp.ne.s32.totalorder %s13393_s1, %s12874_s30  ;;  %s24_s26 = int_to_ptr.vmem [resolvable:$true] %s23_s26 }
  0x26   :  { %p12878_p3 = scmp.lt.u32.totalorder %s12874_s30, %s13393_s1 }
  0x28   :  { %p12880_p4 = pnand %p12878_p3, %p12875_p2 }
  0x2a   :  { %12883 = shalt.err (!%p12880_p4)
}
  0x2b   :  { %s12884_s12 = scalar_lea.vmem %s24_s26, 129024  ;;  %p12889_p6 = scmp.lt.s32.totalorder %s24_s26, %s24_s26 }
  0x2c   :  { %p12885_p5 = scmp.ne.s32.totalorder %s24_s26, %s12884_s12  ;;  %p12890_p7 = scmp.lt.s32.totalorder %s12884_s12, %s12884_s12 }
  0x2e   :  { %p12891_p8 = por %p12890_p7, %p12889_p6 }
  0x30   :  { %p12892_p9 = pnand %p12891_p8, %p12885_p5 }
  0x32   :  { %12895 = shalt.err (!%p12892_p9)
}
  0x33   :  { %s12973_s4 = smov 1152   ;;  %s12974_s27 = smov 72  }
  0x34   :  { %29 = dma.hbm_to_vmem [thread:$0]  %s13393_s1, 129024, %s24_s26, [#allocation3], %s12973_s4, %s12973_s4, %s12974_s27  }
  0x35   :  { %s12975_s15 = smov [#allocation6]   ;;  %s12896_s19 = scalar_lea.hbm %s13395_s3, 18432 }
  0x36   :  { %s45_s16 = sshll.u32 %s12975_s15, 4  ;;  %p12897_p10 = scmp.ne.s32.totalorder %s13395_s3, %s12896_s19  ;;  %s46_s16 = int_to_ptr.vmem [resolvable:$true] %s45_s16 }
  0x37   :  { %p12900_p11 = scmp.lt.u32.totalorder %s12896_s19, %s13395_s3 }
  0x39   :  { %p12902_p12 = pnand %p12900_p11, %p12897_p10 }
  0x3b   :  { %12905 = shalt.err (!%p12902_p12)
}
  0x3c   :  { %s12906_s2 = scalar_lea.vmem %s46_s16, 18432  ;;  %p12911_p0 = scmp.lt.s32.totalorder %s46_s16, %s46_s16 }
  0x3d   :  { %p12907_p13 = scmp.ne.s32.totalorder %s46_s16, %s12906_s2  ;;  %p12912_p1 = scmp.lt.s32.totalorder %s12906_s2, %s12906_s2 }
  0x3f   :  { %p12913_p2 = por %p12912_p1, %p12911_p0 }
  0x41   :  { %p12914_p3 = pnand %p12913_p2, %p12907_p13 }
  0x43   :  { %12917 = shalt.err (!%p12914_p3)
}
  0x44   :  { %s12976_s1 = smov 64   ;;  %s12977_s24 = smov 4  }
  0x45   :  { %51 = dma.hbm_to_vmem [thread:$0]  %s13395_s3, 18432, %s46_s16, [#allocation5], %s12976_s1, %s12976_s1, %s12977_s24  }
  0x46   :  { %s12978_s28 = smov [#allocation9]   ;;  %s12979_s30 = smov [#allocation10]  }
  0x47   :  { %s67_s29 = sshll.u32 %s12978_s28, 4  ;;  %s80_s8 = sshll.u32 %s12979_s30, 4  ;;  %s68_s29 = int_to_ptr.vmem [resolvable:$true] %s67_s29  ;;  %s81_s8 = int_to_ptr.vmem [resolvable:$true] %s80_s8 }
  0x48   :  { %s12918_s11 = scalar_lea.hbm %s13397_s5, 1024 }
  0x49   :  { %p12919_p4 = scmp.ne.s32.totalorder %s13397_s5, %s12918_s11  ;;  %p12922_p5 = scmp.lt.u32.totalorder %s12918_s11, %s13397_s5 }
  0x4b   :  { %p12924_p6 = pnand %p12922_p5, %p12919_p4 }
  0x4d   :  { %12927 = shalt.err (!%p12924_p6)
}
  0x4e   :  { %s12928_s3 = scalar_lea.vmem %s68_s29, 1024  ;;  %p12933_p8 = scmp.lt.s32.totalorder %s68_s29, %s68_s29 }
  0x4f   :  { %p12929_p7 = scmp.ne.s32.totalorder %s68_s29, %s12928_s3  ;;  %p12934_p9 = scmp.lt.s32.totalorder %s12928_s3, %s12928_s3 }
  0x51   :  { %p12935_p10 = por %p12934_p9, %p12933_p8 }
  0x53   :  { %p12936_p11 = pnand %p12935_p10, %p12929_p7 }
  0x55   :  { %12939 = shalt.err (!%p12936_p11)
}
  0x56   :  { %73 = dma.hbm_to_vmem [thread:$0]  %s13397_s5, 1024, %s68_s29, [#allocation8], %s12976_s1, %s12976_s1, %s12977_s24  }
  0x57   :  { %s12940_s18 = scalar_lea.hbm %s13398_s6, 16 }
  0x58   :  { %p12941_p12 = scmp.ne.s32.totalorder %s13398_s6, %s12940_s18  ;;  %p12944_p13 = scmp.lt.u32.totalorder %s12940_s18, %s13398_s6 }
  0x5a   :  { %p12946_p0 = pnand %p12944_p13, %p12941_p12 }
  0x5c   :  { %12949 = shalt.err (!%p12946_p0)
}
  0x5d   :  { %s12950_s23 = scalar_lea.vmem %s81_s8, 16  ;;  %s12954_s2 = scalar_lea.vmem %s81_s8, 32 }
  0x5e   :  { %p12951_p1 = scmp.ne.s32.totalorder %s81_s8, %s12950_s23  ;;  %p12955_p2 = scmp.lt.s32.totalorder %s81_s8, %s81_s8 }
  0x5f   :  { %p12956_p3 = scmp.lt.s32.totalorder %s12954_s2, %s12950_s23 }
  0x61   :  { %p12957_p4 = por %p12956_p3, %p12955_p2 }
  0x63   :  { %p12958_p5 = pnand %p12957_p4, %p12951_p1 }
  0x65   :  { %12961 = shalt.err (!%p12958_p5)
}
  0x66   :  { %83 = dma.hbm_to_vmem [thread:$0]  %s13398_s6, 16, %s81_s8, [#allocation11]  }
  0x67   :  { %12962 = dma.done.wait [#allocation3], 129024  }
  0x68   :  { %12963 = vsyncadd [#allocation3], 4294838272 }
  0x69   :  { %12964 = dma.done.wait [#allocation5], 18720  }
  0x6a   :  { %12965 = vsyncadd [#allocation5], 4294948576 }
  0x6b   :  { %12966 = dma.done.wait [#allocation8], 1040  }
  0x6c   :  { %12967 = vsyncadd [#allocation8], 4294966256 }
  0x6d   :  { %12968 = dma.done.wait [#allocation11], 16  }
  0x6e   :  { %12969 = vsyncadd [#allocation11], 4294967280  ;;  %v11127_v0 = vld [vmem:[#allocation2 + $0x4] ss:$72 sps:$4 sm:$0xff]   ;;  %v11131_v2 = vld [vmem:[#allocation2] ss:$72 sps:$4 sm:$0xff]  }
  0x6f   :  { %v11129_v1 = vld [vmem:[#allocation2 + $0x904] ss:$72 sps:$4 sm:$0xff]   ;;  %831 = vmatprep.subr.bf16.mxu1 %v11127_v0  ;;  %v11132_v3 = vld [vmem:[#allocation2 + $0x900] ss:$72 sps:$4 sm:$0xff]   ;;  %v11133_v4 = vld [vmem:[#allocation2 + $0x94] ss:$72 sps:$4 sm:$0xff]  }
  0x70   :  { %874 = vmatprep.subr.bf16.mxu0 %v11129_v1  ;;  %832 = vmatpush1.bf16.msra.mxu1 %v11131_v2  ;;  %v11135_v5 = vld [vmem:[#allocation2 + $0x994] ss:$72 sps:$4 sm:$0xff]   ;;  %v11137_v6 = vld [vmem:[#allocation2 + $0x90] ss:$72 sps:$4 sm:$0xff]   ;;  %v11139_v8 = vld [vmem:[#allocation2 + $0x124] ss:$72 sps:$4 sm:$0xff]  }
  0x71   :  { %875 = vmatpush1.bf16.msra.mxu0 %v11132_v3  ;;  %833 = vmatprep.subr.bf16.mxu1 %v11133_v4  ;;  %v11138_v7 = vld [vmem:[#allocation2 + $0x990] ss:$72 sps:$4 sm:$0xff]   ;;  %v11141_v9 = vld [vmem:[#allocation2 + $0xa24] ss:$72 sps:$4 sm:$0xff]   ;;  %v11143_v10 = vld [vmem:[#allocation2 + $0x120] ss:$72 sps:$4 sm:$0xff]  }
  0x72   :  { %876 = vmatprep.subr.bf16.mxu0 %v11135_v5  ;;  %v11144_v11 = vld [vmem:[#allocation2 + $0xa20] ss:$72 sps:$4 sm:$0xff]   ;;  %v11145_v12 = vld [vmem:[#allocation2 + $0x1b4] ss:$72 sps:$4 sm:$0xff]   ;;  %v11149_v14 = vld [vmem:[#allocation2 + $0x1b0] ss:$72 sps:$4 sm:$0xff]  }
  0x73   :  { %v11147_v13 = vld [vmem:[#allocation2 + $0xab4] ss:$72 sps:$4 sm:$0xff]   ;;  %v11150_v15 = vld [vmem:[#allocation2 + $0xab0] ss:$72 sps:$4 sm:$0xff]   ;;  %v11151_v16 = vld [vmem:[#allocation2 + $0x244] ss:$72 sps:$4 sm:$0xff]  }
  0x74   :  { %834 = vmatpush1.bf16.msra.mxu1 %v11137_v6  ;;  %v11153_v17 = vld [vmem:[#allocation2 + $0xb44] ss:$72 sps:$4 sm:$0xff]   ;;  %v11155_v18 = vld [vmem:[#allocation2 + $0x240] ss:$72 sps:$4 sm:$0xff]   ;;  %v11157_v20 = vld [vmem:[#allocation2 + $0x2d4] ss:$72 sps:$4 sm:$0xff]  }
  0x75   :  { %877 = vmatpush1.bf16.msra.mxu0 %v11138_v7  ;;  %835 = vmatprep.subr.bf16.mxu1 %v11139_v8  ;;  %v11156_v19 = vld [vmem:[#allocation2 + $0xb40] ss:$72 sps:$4 sm:$0xff]   ;;  %v11159_v21 = vld [vmem:[#allocation2 + $0xbd4] ss:$72 sps:$4 sm:$0xff]   ;;  %v11161_v22 = vld [vmem:[#allocation2 + $0x2d0] ss:$72 sps:$4 sm:$0xff]  }
  0x76   :  { %878 = vmatprep.subr.bf16.mxu0 %v11141_v9  ;;  %v11162_v23 = vld [vmem:[#allocation2 + $0xbd0] ss:$72 sps:$4 sm:$0xff]   ;;  %v11163_v24 = vld [vmem:[#allocation2 + $0x364] ss:$72 sps:$4 sm:$0xff]   ;;  %v11167_v26 = vld [vmem:[#allocation2 + $0x360] ss:$72 sps:$4 sm:$0xff]  }
  0x77   :  { %v11165_v25 = vld [vmem:[#allocation2 + $0xc64] ss:$72 sps:$4 sm:$0xff]   ;;  %v11168_v27 = vld [vmem:[#allocation2 + $0xc60] ss:$72 sps:$4 sm:$0xff]   ;;  %v11169_v28 = vld [vmem:[#allocation2 + $0x3f4] ss:$72 sps:$4 sm:$0xff]  }
  0x78   :  { %836 = vmatpush1.bf16.msra.mxu1 %v11143_v10  ;;  %v11171_v29 = vld [vmem:[#allocation2 + $0xcf4] ss:$72 sps:$4 sm:$0xff]   ;;  %v11173_v30 = vld [vmem:[#allocation2 + $0x3f0] ss:$72 sps:$4 sm:$0xff]   ;;  %v11175_v32 = vld [vmem:[#allocation2 + $0x484] ss:$72 sps:$4 sm:$0xff]  }
  0x79   :  { %879 = vmatpush1.bf16.msra.mxu0 %v11144_v11  ;;  %837 = vmatprep.subr.bf16.mxu1 %v11145_v12  ;;  %v11174_v31 = vld [vmem:[#allocation2 + $0xcf0] ss:$72 sps:$4 sm:$0xff]   ;;  %v11177_v33 = vld [vmem:[#allocation2 + $0xd84] ss:$72 sps:$4 sm:$0xff]   ;;  %v11179_v34 = vld [vmem:[#allocation2 + $0x480] ss:$72 sps:$4 sm:$0xff]  }
  0x7a   :  { %880 = vmatprep.subr.bf16.mxu0 %v11147_v13  ;;  %v11180_v35 = vld [vmem:[#allocation2 + $0xd80] ss:$72 sps:$4 sm:$0xff]   ;;  %v11181_v36 = vld [vmem:[#allocation2 + $0x514] ss:$72 sps:$4 sm:$0xff]   ;;  %v11185_v38 = vld [vmem:[#allocation2 + $0x510] ss:$72 sps:$4 sm:$0xff]  }
  0x7b   :  { %v11183_v37 = vld [vmem:[#allocation2 + $0xe14] ss:$72 sps:$4 sm:$0xff]   ;;  %v11186_v39 = vld [vmem:[#allocation2 + $0xe10] ss:$72 sps:$4 sm:$0xff]   ;;  %v11187_v40 = vld [vmem:[#allocation2 + $0x5a4] ss:$72 sps:$4 sm:$0xff]  }
  0x7c   :  { %838 = vmatpush1.bf16.msra.mxu1 %v11149_v14  ;;  %v11189_v41 = vld [vmem:[#allocation2 + $0xea4] ss:$72 sps:$4 sm:$0xff]   ;;  %v11191_v42 = vld [vmem:[#allocation2 + $0x5a0] ss:$72 sps:$4 sm:$0xff]   ;;  %v11193_v44 = vld [vmem:[#allocation2 + $0x634] ss:$72 sps:$4 sm:$0xff]  }
  0x7d   :  { %881 = vmatpush1.bf16.msra.mxu0 %v11150_v15  ;;  %839 = vmatprep.subr.bf16.mxu1 %v11151_v16  ;;  %v11192_v43 = vld [vmem:[#allocation2 + $0xea0] ss:$72 sps:$4 sm:$0xff]   ;;  %v11195_v45 = vld [vmem:[#allocation2 + $0xf34] ss:$72 sps:$4 sm:$0xff]   ;;  %v11197_v46 = vld [vmem:[#allocation2 + $0x630] ss:$72 sps:$4 sm:$0xff]  }
  0x7e   :  { %882 = vmatprep.subr.bf16.mxu0 %v11153_v17  ;;  %v11198_v47 = vld [vmem:[#allocation2 + $0xf30] ss:$72 sps:$4 sm:$0xff]   ;;  %v11199_v48 = vld [vmem:[#allocation2 + $0x6c4] ss:$72 sps:$4 sm:$0xff]   ;;  %v11203_v52 = vld [vmem:[#allocation2 + $0x6c0] ss:$72 sps:$4 sm:$0xff]  }
  0x7f   :  { %v11223_v49 = vld [vmem:[%s13392_s0 + $0x4] ss:$28 sps:$4 sm:$0xff]   ;;  %v13101_v50 = vld [vmem:[%s13392_s0 + $0xc] ss:$28 sps:$4 sm:$0xff]   ;;  %v11205_v54 = vld [vmem:[#allocation2 + $0x754] ss:$72 sps:$4 sm:$0xff]  }
  0x80   :  { %840 = vmatpush1.bf16.msra.mxu1 %v11155_v18  ;;  %v11201_v51 = vld [vmem:[#allocation2 + $0xfc4] ss:$72 sps:$4 sm:$0xff]   ;;  %863 = vmatprep.mubr.bf16.mxu1 %v11223_v49  ;;  %v11204_v53 = vld [vmem:[#allocation2 + $0xfc0] ss:$72 sps:$4 sm:$0xff]   ;;  %v11207_v55 = vld [vmem:[#allocation2 + $0x1054] ss:$72 sps:$4 sm:$0xff]  }
  0x81   :  { %883 = vmatpush1.bf16.msra.mxu0 %v11156_v19  ;;  %841 = vmatprep.subr.bf16.mxu1 %v11157_v20  ;;  %v11209_v56 = vld [vmem:[#allocation2 + $0x750] ss:$72 sps:$4 sm:$0xff]   ;;  %v11211_v58 = vld [vmem:[#allocation2 + $0x7e4] ss:$72 sps:$4 sm:$0xff]   ;;  %v11215_v60 = vld [vmem:[#allocation2 + $0x7e0] ss:$72 sps:$4 sm:$0xff]  }
  0x82   :  { %884 = vmatprep.subr.bf16.mxu0 %v11159_v21  ;;  %906 = vmatprep.mubr.bf16.mxu0 %v13101_v50  ;;  %v11210_v57 = vld [vmem:[#allocation2 + $0x1050] ss:$72 sps:$4 sm:$0xff]   ;;  %v11213_v59 = vld [vmem:[#allocation2 + $0x10e4] ss:$72 sps:$4 sm:$0xff]   ;;  %v11216_v61 = vld [vmem:[#allocation2 + $0x10e0] ss:$72 sps:$4 sm:$0xff]  }
  0x83   :  { %v11217_v62 = vld [vmem:[#allocation2 + $0x874] ss:$72 sps:$4 sm:$0xff]   ;;  %v11221_v0 = vld [vmem:[#allocation2 + $0x870] ss:$72 sps:$4 sm:$0xff]   ;;  %v11230_v2 = vld [vmem:[#allocation2 + $0x1204] ss:$72 sps:$4 sm:$0xff]  }
  0x84   :  { %842 = vmatpush1.bf16.msra.mxu1 %v11161_v22  ;;  %v11219_v63 = vld [vmem:[#allocation2 + $0x1174] ss:$72 sps:$4 sm:$0xff]   ;;  %v11222_v1 = vld [vmem:[#allocation2 + $0x1170] ss:$72 sps:$4 sm:$0xff]   ;;  %v11228_v5 = vld [vmem:[#allocation2 + $0x1200] ss:$72 sps:$4 sm:$0xff]  }
  0x85   :  { %885 = vmatpush1.bf16.msra.mxu0 %v11162_v23  ;;  %843 = vmatprep.subr.bf16.mxu1 %v11163_v24  ;;  %v11233_v3 = vld [vmem:[#allocation2 + $0xc] ss:$72 sps:$4 sm:$0xff]   ;;  %v13107_v4 = vld [vmem:[%s13392_s0] ss:$28 sps:$4 sm:$0xff]   ;;  %v11231_v6 = vld [vmem:[#allocation2 + $0x8] ss:$72 sps:$4 sm:$0xff]  }
  0x86   :  { %886 = vmatprep.subr.bf16.mxu0 %v11165_v25  ;;  %v13112_v7 = vld [vmem:[%s13392_s0 + $0x8] ss:$28 sps:$4 sm:$0xff]   ;;  %v11237_v8 = vld [vmem:[#allocation2 + $0x1294] ss:$72 sps:$4 sm:$0xff]   ;;  %v11235_v10 = vld [vmem:[#allocation2 + $0x1290] ss:$72 sps:$4 sm:$0xff]  }
  0x87   :  { %v11240_v9 = vld [vmem:[#allocation2 + $0x9c] ss:$72 sps:$4 sm:$0xff]   ;;  %v11238_v11 = vld [vmem:[#allocation2 + $0x98] ss:$72 sps:$4 sm:$0xff]   ;;  %v11246_v13 = vld [vmem:[#allocation2 + $0x12c] ss:$72 sps:$4 sm:$0xff]  }
  0x88   :  { %844 = vmatpush1.bf16.msra.mxu1 %v11167_v26  ;;  %v11243_v12 = vld [vmem:[#allocation2 + $0x1324] ss:$72 sps:$4 sm:$0xff]   ;;  %v11241_v14 = vld [vmem:[#allocation2 + $0x1320] ss:$72 sps:$4 sm:$0xff]   ;;  %v11249_v16 = vld [vmem:[#allocation2 + $0x13b4] ss:$72 sps:$4 sm:$0xff]  }
  0x89   :  { %887 = vmatpush1.bf16.msra.mxu0 %v11168_v27  ;;  %845 = vmatprep.subr.bf16.mxu1 %v11169_v28  ;;  %v11244_v15 = vld [vmem:[#allocation2 + $0x128] ss:$72 sps:$4 sm:$0xff]   ;;  %v11252_v17 = vld [vmem:[#allocation2 + $0x1bc] ss:$72 sps:$4 sm:$0xff]   ;;  %v11250_v19 = vld [vmem:[#allocation2 + $0x1b8] ss:$72 sps:$4 sm:$0xff]  }
  0x8a   :  { %888 = vmatprep.subr.bf16.mxu0 %v11171_v29  ;;  %v11247_v18 = vld [vmem:[#allocation2 + $0x13b0] ss:$72 sps:$4 sm:$0xff]   ;;  %v11255_v20 = vld [vmem:[#allocation2 + $0x1444] ss:$72 sps:$4 sm:$0xff]   ;;  %v11253_v22 = vld [vmem:[#allocation2 + $0x1440] ss:$72 sps:$4 sm:$0xff]  }
  0x8b   :  { %v11258_v21 = vld [vmem:[#allocation2 + $0x24c] ss:$72 sps:$4 sm:$0xff]   ;;  %v11256_v23 = vld [vmem:[#allocation2 + $0x248] ss:$72 sps:$4 sm:$0xff]   ;;  %v11264_v25 = vld [vmem:[#allocation2 + $0x2dc] ss:$72 sps:$4 sm:$0xff]  }
  0x8c   :  { %846 = vmatpush1.bf16.msra.mxu1 %v11173_v30  ;;  %v11261_v24 = vld [vmem:[#allocation2 + $0x14d4] ss:$72 sps:$4 sm:$0xff]   ;;  %v11259_v26 = vld [vmem:[#allocation2 + $0x14d0] ss:$72 sps:$4 sm:$0xff]   ;;  %v11267_v28 = vld [vmem:[#allocation2 + $0x1564] ss:$72 sps:$4 sm:$0xff]  }
  0x8d   :  { %889 = vmatpush1.bf16.msra.mxu0 %v11174_v31  ;;  %847 = vmatprep.subr.bf16.mxu1 %v11175_v32  ;;  %v11262_v27 = vld [vmem:[#allocation2 + $0x2d8] ss:$72 sps:$4 sm:$0xff]   ;;  %v11270_v29 = vld [vmem:[#allocation2 + $0x36c] ss:$72 sps:$4 sm:$0xff]   ;;  %v11268_v31 = vld [vmem:[#allocation2 + $0x368] ss:$72 sps:$4 sm:$0xff]  }
  0x8e   :  { %890 = vmatprep.subr.bf16.mxu0 %v11177_v33  ;;  %v11265_v30 = vld [vmem:[#allocation2 + $0x1560] ss:$72 sps:$4 sm:$0xff]   ;;  %v11273_v32 = vld [vmem:[#allocation2 + $0x15f4] ss:$72 sps:$4 sm:$0xff]   ;;  %vm12982_vm0 = vmmov 0  }
  0x8f   :  { %v13119_v33 = vld [vmem:[%s13392_s0 + $0x14] ss:$28 sps:$4 sm:$0xff]  }
  0x90   :  { %848 = vmatpush1.bf16.msra.mxu1 %v11179_v34  ;;  %v11276_v34 = vld [vmem:[#allocation2 + $0x3fc] ss:$72 sps:$4 sm:$0xff]  }
  0x91   :  { %891 = vmatpush1.bf16.msra.mxu0 %v11180_v35  ;;  %849 = vmatprep.subr.bf16.mxu1 %v11181_v36  ;;  %v11271_v35 = vld [vmem:[#allocation2 + $0x15f0] ss:$72 sps:$4 sm:$0xff]  }
  0x92   :  { %892 = vmatprep.subr.bf16.mxu0 %v11183_v37  ;;  %v11274_v36 = vld [vmem:[#allocation2 + $0x3f8] ss:$72 sps:$4 sm:$0xff]   ;;  %v11279_v37 = vld [vmem:[#allocation2 + $0x1684] ss:$72 sps:$4 sm:$0xff]  }
  0x94   :  { %850 = vmatpush1.bf16.msra.mxu1 %v11185_v38  ;;  %v11282_v38 = vld [vmem:[#allocation2 + $0x48c] ss:$72 sps:$4 sm:$0xff]  }
  0x95   :  { %893 = vmatpush1.bf16.msra.mxu0 %v11186_v39  ;;  %851 = vmatprep.subr.bf16.mxu1 %v11187_v40  ;;  %v11277_v39 = vld [vmem:[#allocation2 + $0x1680] ss:$72 sps:$4 sm:$0xff]  }
  0x96   :  { %894 = vmatprep.subr.bf16.mxu0 %v11189_v41  ;;  %v11280_v40 = vld [vmem:[#allocation2 + $0x488] ss:$72 sps:$4 sm:$0xff]   ;;  %v11285_v41 = vld [vmem:[#allocation2 + $0x1714] ss:$72 sps:$4 sm:$0xff]  }
  0x98   :  { %852 = vmatpush1.bf16.msra.mxu1 %v11191_v42  ;;  %v11288_v42 = vld [vmem:[#allocation2 + $0x51c] ss:$72 sps:$4 sm:$0xff]  }
  0x99   :  { %895 = vmatpush1.bf16.msra.mxu0 %v11192_v43  ;;  %853 = vmatprep.subr.bf16.mxu1 %v11193_v44  ;;  %v11283_v43 = vld [vmem:[#allocation2 + $0x1710] ss:$72 sps:$4 sm:$0xff]  }
  0x9a   :  { %896 = vmatprep.subr.bf16.mxu0 %v11195_v45  ;;  %v11286_v44 = vld [vmem:[#allocation2 + $0x518] ss:$72 sps:$4 sm:$0xff]   ;;  %v11291_v45 = vld [vmem:[#allocation2 + $0x17a4] ss:$72 sps:$4 sm:$0xff]  }
  0x9c   :  { %854 = vmatpush1.bf16.msra.mxu1 %v11197_v46  ;;  %v11294_v46 = vld [vmem:[#allocation2 + $0x5ac] ss:$72 sps:$4 sm:$0xff]  }
  0x9d   :  { %897 = vmatpush1.bf16.msra.mxu0 %v11198_v47  ;;  %855 = vmatprep.subr.bf16.mxu1 %v11199_v48  ;;  %v11289_v47 = vld [vmem:[#allocation2 + $0x17a0] ss:$72 sps:$4 sm:$0xff]  }
  0x9e   :  { %898 = vmatprep.subr.bf16.mxu0 %v11201_v51  ;;  %v11292_v48 = vld [vmem:[#allocation2 + $0x5a8] ss:$72 sps:$4 sm:$0xff]   ;;  %v11300_v51 = vld [vmem:[#allocation2 + $0x63c] ss:$72 sps:$4 sm:$0xff]  }
  0xa0   :  { %856 = vmatpush1.bf16.msra.mxu1 %v11203_v52  ;;  %v11295_v52 = vld [vmem:[#allocation2 + $0x1830] ss:$72 sps:$4 sm:$0xff]  }
  0xa1   :  { %899 = vmatpush1.bf16.msra.mxu0 %v11204_v53  ;;  %857 = vmatprep.subr.bf16.mxu1 %v11205_v54  ;;  %v11298_v53 = vld [vmem:[#allocation2 + $0x638] ss:$72 sps:$4 sm:$0xff]   ;;  %v11303_v54 = vld [vmem:[#allocation2 + $0x18c4] ss:$72 sps:$4 sm:$0xff]  }
  0xa2   :  { %900 = vmatprep.subr.bf16.mxu0 %v11207_v55  ;;  %v11306_v55 = vld [vmem:[#allocation2 + $0x6cc] ss:$72 sps:$4 sm:$0xff]  }
  0xa4   :  { %858 = vmatpush1.bf16.msra.mxu1 %v11209_v56  ;;  %v11301_v56 = vld [vmem:[#allocation2 + $0x18c0] ss:$72 sps:$4 sm:$0xff]  }
  0xa5   :  { %901 = vmatpush1.bf16.msra.mxu0 %v11210_v57  ;;  %859 = vmatprep.subr.bf16.mxu1 %v11211_v58  ;;  %v11304_v57 = vld [vmem:[#allocation2 + $0x6c8] ss:$72 sps:$4 sm:$0xff]   ;;  %v11309_v58 = vld [vmem:[#allocation2 + $0x1954] ss:$72 sps:$4 sm:$0xff]  }
  0xa6   :  { %902 = vmatprep.subr.bf16.mxu0 %v11213_v59  ;;  %v11312_v59 = vld [vmem:[#allocation2 + $0x75c] ss:$72 sps:$4 sm:$0xff]  }
  0xa8   :  { %860 = vmatpush1.bf16.msra.mxu1 %v11215_v60  ;;  %v11307_v60 = vld [vmem:[#allocation2 + $0x1950] ss:$72 sps:$4 sm:$0xff]  }
  0xa9   :  { %903 = vmatpush1.bf16.msra.mxu0 %v11216_v61  ;;  %861 = vmatprep.subr.bf16.mxu1 %v11217_v62  ;;  %v11310_v61 = vld [vmem:[#allocation2 + $0x758] ss:$72 sps:$4 sm:$0xff]   ;;  %v11315_v62 = vld [vmem:[#allocation2 + $0x19e4] ss:$72 sps:$4 sm:$0xff]  }
  0xaa   :  { %904 = vmatprep.subr.bf16.mxu0 %v11219_v63  ;;  %v11318_v63 = vld [vmem:[#allocation2 + $0x7ec] ss:$72 sps:$4 sm:$0xff]  }
  0xac   :  { %862 = vmatpush1.bf16.msra.mxu1 %v11221_v0  ;;  %v11313_v0 = vld [vmem:[#allocation2 + $0x19e0] ss:$72 sps:$4 sm:$0xff]  }
  0xad   :  { %905 = vmatpush1.bf16.msra.mxu0 %v11222_v1  ;;  %1725 = vmatprep.subr.bf16.mxu1 %v11233_v3  ;;  %v11316_v1 = vld [vmem:[#allocation2 + $0x7e8] ss:$72 sps:$4 sm:$0xff]   ;;  %v11324_v3 = vld [vmem:[#allocation2 + $0x87c] ss:$72 sps:$4 sm:$0xff]  }
  0xae   :  { %917 = vmatprep.subr.bf16.mxu0 %v11230_v2  ;;  %v11321_v2 = vld [vmem:[#allocation2 + $0x1a74] ss:$72 sps:$4 sm:$0xff]  }
  0xaf   :  { %864 = vmatmul.mubr.bf16.vlgmr.msra.gmra.mrb[0].mxu1 %v13107_v4 }
  0xb0   :  { %907 = vmatmul.mubr.bf16.vlgmr.msra.gmra.mrb[0].mxu0 %v13112_v7  ;;  %1726 = vmatpush1.bf16.msra.mxu1 %v11231_v6  ;;  %v11322_v6 = vld [vmem:[#allocation2 + $0x878] ss:$72 sps:$4 sm:$0xff]  }
  0xb1   :  { %918 = vmatpush1.bf16.msra.mxu0 %v11228_v5  ;;  %1727 = vmatprep.subr.bf16.mxu1 %v11240_v9  ;;  %v11319_v5 = vld [vmem:[#allocation2 + $0x1a70] ss:$72 sps:$4 sm:$0xff]   ;;  %v11332_v9 = vld [vmem:[#allocation2 + $0x90c] ss:$72 sps:$4 sm:$0xff]  }
  0xb2   :  { %919 = vmatprep.subr.bf16.mxu0 %v11237_v8  ;;  %1757 = vmatprep.mubr.bf16.mxu1 %v11223_v49  ;;  %v11297_v49 = vld [vmem:[#allocation2 + $0x1834] ss:$72 sps:$4 sm:$0xff]   ;;  %v11329_v8 = vld [vmem:[#allocation2 + $0x1b04] ss:$72 sps:$4 sm:$0xff]  }
  0xb3   :  { %949 = vmatprep.mubr.bf16.mxu0 %v13119_v33 }
  0xb4   :  { %1728 = vmatpush1.bf16.msra.mxu1 %v11238_v11  ;;  %v13125_v11 = vld [vmem:[%s13392_s0 + $0x10] ss:$28 sps:$4 sm:$0xff]  }
  0xb5   :  { %920 = vmatpush1.bf16.msra.mxu0 %v11235_v10  ;;  %1729 = vmatprep.subr.bf16.mxu1 %v11246_v13  ;;  %v11327_v10 = vld [vmem:[#allocation2 + $0x1b00] ss:$72 sps:$4 sm:$0xff]   ;;  %v11336_v13 = vld [vmem:[#allocation2 + $0x1b94] ss:$72 sps:$4 sm:$0xff]  }
  0xb6   :  { %921 = vmatprep.subr.bf16.mxu0 %v11243_v12  ;;  %v11330_v12 = vld [vmem:[#allocation2 + $0x908] ss:$72 sps:$4 sm:$0xff]  }
  0xb8   :  { %1730 = vmatpush1.bf16.msra.mxu1 %v11244_v15  ;;  %v11334_v15 = vld [vmem:[#allocation2 + $0x1b90] ss:$72 sps:$4 sm:$0xff]  }
  0xb9   :  { %922 = vmatpush1.bf16.msra.mxu0 %v11241_v14  ;;  %1731 = vmatprep.subr.bf16.mxu1 %v11252_v17  ;;  %v11339_v14 = vld [vmem:[#allocation2 + $0x99c] ss:$72 sps:$4 sm:$0xff]  }
  0xba   :  { %923 = vmatprep.subr.bf16.mxu0 %v11249_v16  ;;  %v11337_v16 = vld [vmem:[#allocation2 + $0x998] ss:$72 sps:$4 sm:$0xff]   ;;  %v11342_v17 = vld [vmem:[#allocation2 + $0x1c24] ss:$72 sps:$4 sm:$0xff]  }
  0xbc   :  { %1732 = vmatpush1.bf16.msra.mxu1 %v11250_v19  ;;  %v12980_v19 = vmov 0  }
  0xbd   :  { %924 = vmatpush1.bf16.msra.mxu0 %v11247_v18  ;;  %1733 = vmatprep.subr.bf16.mxu1 %v11258_v21  ;;  %v11345_v18 = vld [vmem:[#allocation2 + $0xa2c] ss:$72 sps:$4 sm:$0xff]   ;;  %v11343_v21 = vld [vmem:[#allocation2 + $0xa28] ss:$72 sps:$4 sm:$0xff]  }
  0xbe   :  { %925 = vmatprep.subr.bf16.mxu0 %v11255_v20  ;;  %v11340_v20 = vld [vmem:[#allocation2 + $0x1c20] ss:$72 sps:$4 sm:$0xff]  }
  0xc0   :  { %1734 = vmatpush1.bf16.msra.mxu1 %v11256_v23  ;;  %v11346_v23 = vld [vmem:[#allocation2 + $0x1cb0] ss:$72 sps:$4 sm:$0xff]  }
  0xc1   :  { %926 = vmatpush1.bf16.msra.mxu0 %v11253_v22  ;;  %1735 = vmatprep.subr.bf16.mxu1 %v11264_v25  ;;  %v11348_v22 = vld [vmem:[#allocation2 + $0x1cb4] ss:$72 sps:$4 sm:$0xff]   ;;  %v11354_v25 = vld [vmem:[#allocation2 + $0x1d44] ss:$72 sps:$4 sm:$0xff]  }
  0xc2   :  { %927 = vmatprep.subr.bf16.mxu0 %v11261_v24  ;;  %v11349_v24 = vld [vmem:[#allocation2 + $0xab8] ss:$72 sps:$4 sm:$0xff]  }
  0xc4   :  { %1736 = vmatpush1.bf16.msra.mxu1 %v11262_v27  ;;  %v11352_v27 = vld [vmem:[#allocation2 + $0x1d40] ss:$72 sps:$4 sm:$0xff]  }
  0xc5   :  { %928 = vmatpush1.bf16.msra.mxu0 %v11259_v26  ;;  %1737 = vmatprep.subr.bf16.mxu1 %v11270_v29  ;;  %v11357_v26 = vld [vmem:[#allocation2 + $0xb4c] ss:$72 sps:$4 sm:$0xff]   ;;  %v11363_v29 = vld [vmem:[#allocation2 + $0xbdc] ss:$72 sps:$4 sm:$0xff]  }
  0xc6   :  { %929 = vmatprep.subr.bf16.mxu0 %v11267_v28  ;;  %v11360_v28 = vld [vmem:[#allocation2 + $0x1dd4] ss:$72 sps:$4 sm:$0xff]  }
  0xc8   :  { %1738 = vmatpush1.bf16.msra.mxu1 %v11268_v31  ;;  %v11361_v31 = vld [vmem:[#allocation2 + $0xbd8] ss:$72 sps:$4 sm:$0xff]  }
  0xc9   :  { %930 = vmatpush1.bf16.msra.mxu0 %v11265_v30  ;;  %1739 = vmatprep.subr.bf16.mxu1 %v11276_v34  ;;  %v11358_v30 = vld [vmem:[#allocation2 + $0x1dd0] ss:$72 sps:$4 sm:$0xff]   ;;  %v11369_v34 = vld [vmem:[#allocation2 + $0xc6c] ss:$72 sps:$4 sm:$0xff]  }
  0xca   :  { %931 = vmatprep.subr.bf16.mxu0 %v11273_v32  ;;  %v11366_v32 = vld [vmem:[#allocation2 + $0x1e64] ss:$72 sps:$4 sm:$0xff]  }
  0xcc   :  { %1740 = vmatpush1.bf16.msra.mxu1 %v11274_v36  ;;  %v11367_v36 = vld [vmem:[#allocation2 + $0xc68] ss:$72 sps:$4 sm:$0xff]  }
  0xcd   :  { %932 = vmatpush1.bf16.msra.mxu0 %v11271_v35  ;;  %1741 = vmatprep.subr.bf16.mxu1 %v11282_v38  ;;  %v11364_v35 = vld [vmem:[#allocation2 + $0x1e60] ss:$72 sps:$4 sm:$0xff]   ;;  %v11375_v38 = vld [vmem:[#allocation2 + $0xcfc] ss:$72 sps:$4 sm:$0xff]  }
  0xce   :  { %933 = vmatprep.subr.bf16.mxu0 %v11279_v37  ;;  %v11372_v37 = vld [vmem:[#allocation2 + $0x1ef4] ss:$72 sps:$4 sm:$0xff]  }
  0xd0   :  { %1742 = vmatpush1.bf16.msra.mxu1 %v11280_v40  ;;  %v11373_v40 = vld [vmem:[#allocation2 + $0xcf8] ss:$72 sps:$4 sm:$0xff]  }
  0xd1   :  { %934 = vmatpush1.bf16.msra.mxu0 %v11277_v39  ;;  %1743 = vmatprep.subr.bf16.mxu1 %v11288_v42  ;;  %v11370_v39 = vld [vmem:[#allocation2 + $0x1ef0] ss:$72 sps:$4 sm:$0xff]  }
  0xd2   :  { %935 = vmatprep.subr.bf16.mxu0 %v11285_v41  ;;  %v11379_v41 = vld [vmem:[#allocation2 + $0xd8c] ss:$72 sps:$4 sm:$0xff]  }
  0xd3   :  { %v11376_v42 = vld [vmem:[%s13392_s0 + $0x18] ss:$28 sps:$4 sm:$0xff]  }
  0xd4   :  { %1744 = vmatpush1.bf16.msra.mxu1 %v11286_v44  ;;  %v11382_v44 = vld [vmem:[#allocation2 + $0xe1c] ss:$72 sps:$4 sm:$0xff]  }
  0xd5   :  { %936 = vmatpush1.bf16.msra.mxu0 %v11283_v43  ;;  %1745 = vmatprep.subr.bf16.mxu1 %v11294_v46  ;;  %v11377_v43 = vld [vmem:[#allocation2 + $0xd88] ss:$72 sps:$4 sm:$0xff]   ;;  %v11385_v46 = vld [vmem:[#allocation2 + $0xeac] ss:$72 sps:$4 sm:$0xff]  }
  0xd6   :  { %937 = vmatprep.subr.bf16.mxu0 %v11291_v45  ;;  %v11380_v45 = vld [vmem:[#allocation2 + $0xe18] ss:$72 sps:$4 sm:$0xff]  }
  0xd8   :  { %1746 = vmatpush1.bf16.msra.mxu1 %v11292_v48  ;;  %v11388_v48 = vld [vmem:[#allocation2 + $0xf3c] ss:$72 sps:$4 sm:$0xff]  }
  0xd9   :  { %938 = vmatpush1.bf16.msra.mxu0 %v11289_v47  ;;  %1747 = vmatprep.subr.bf16.mxu1 %v11300_v51  ;;  %v11383_v47 = vld [vmem:[#allocation2 + $0xea8] ss:$72 sps:$4 sm:$0xff]   ;;  %v11391_v51 = vld [vmem:[#allocation2 + $0xfcc] ss:$72 sps:$4 sm:$0xff]  }
  0xda   :  { %939 = vmatprep.subr.bf16.mxu0 %v11297_v49  ;;  %v11386_v49 = vld [vmem:[#allocation2 + $0xf38] ss:$72 sps:$4 sm:$0xff]  }
  0xdc   :  { %1748 = vmatpush1.bf16.msra.mxu1 %v11298_v53  ;;  %v11394_v53 = vld [vmem:[#allocation2 + $0x105c] ss:$72 sps:$4 sm:$0xff]  }
  0xdd   :  { %940 = vmatpush1.bf16.msra.mxu0 %v11295_v52  ;;  %1749 = vmatprep.subr.bf16.mxu1 %v11306_v55  ;;  %v11389_v52 = vld [vmem:[#allocation2 + $0xfc8] ss:$72 sps:$4 sm:$0xff]   ;;  %v11397_v55 = vld [vmem:[#allocation2 + $0x10ec] ss:$72 sps:$4 sm:$0xff]  }
  0xde   :  { %941 = vmatprep.subr.bf16.mxu0 %v11303_v54  ;;  %v11392_v54 = vld [vmem:[#allocation2 + $0x1058] ss:$72 sps:$4 sm:$0xff]  }
  0xe0   :  { %1750 = vmatpush1.bf16.msra.mxu1 %v11304_v57  ;;  %v11400_v57 = vld [vmem:[#allocation2 + $0x117c] ss:$72 sps:$4 sm:$0xff]  }
  0xe1   :  { %942 = vmatpush1.bf16.msra.mxu0 %v11301_v56  ;;  %1751 = vmatprep.subr.bf16.mxu1 %v11312_v59  ;;  %v11395_v56 = vld [vmem:[#allocation2 + $0x10e8] ss:$72 sps:$4 sm:$0xff]   ;;  %v11403_v59 = vld [vmem:[#allocation2 + $0x120c] ss:$72 sps:$4 sm:$0xff]  }
  0xe2   :  { %943 = vmatprep.subr.bf16.mxu0 %v11309_v58  ;;  %v11398_v58 = vld [vmem:[#allocation2 + $0x1178] ss:$72 sps:$4 sm:$0xff]  }
  0xe4   :  { %1752 = vmatpush1.bf16.msra.mxu1 %v11310_v61  ;;  %v11406_v61 = vld [vmem:[#allocation2 + $0x129c] ss:$72 sps:$4 sm:$0xff]  }
  0xe5   :  { %944 = vmatpush1.bf16.msra.mxu0 %v11307_v60  ;;  %1753 = vmatprep.subr.bf16.mxu1 %v11318_v63  ;;  %v11401_v60 = vld [vmem:[#allocation2 + $0x1208] ss:$72 sps:$4 sm:$0xff]   ;;  %v11409_v63 = vld [vmem:[#allocation2 + $0x132c] ss:$72 sps:$4 sm:$0xff]  }
  0xe6   :  { %945 = vmatprep.subr.bf16.mxu0 %v11315_v62  ;;  %v11404_v62 = vld [vmem:[#allocation2 + $0x1298] ss:$72 sps:$4 sm:$0xff]  }
  0xe8   :  { %1754 = vmatpush1.bf16.msra.mxu1 %v11316_v1  ;;  %v11412_v1 = vld [vmem:[#allocation2 + $0x13bc] ss:$72 sps:$4 sm:$0xff]  }
  0xe9   :  { %946 = vmatpush1.bf16.msra.mxu0 %v11313_v0  ;;  %1755 = vmatprep.subr.bf16.mxu1 %v11324_v3  ;;  %v11407_v0 = vld [vmem:[#allocation2 + $0x1328] ss:$72 sps:$4 sm:$0xff]   ;;  %v11415_v3 = vld [vmem:[#allocation2 + $0x144c] ss:$72 sps:$4 sm:$0xff]  }
  0xea   :  { %947 = vmatprep.subr.bf16.mxu0 %v11321_v2  ;;  %v11410_v2 = vld [vmem:[#allocation2 + $0x13b8] ss:$72 sps:$4 sm:$0xff]  }
  0xec   :  { %1756 = vmatpush1.bf16.msra.mxu1 %v11322_v6  ;;  %v11418_v6 = vld [vmem:[#allocation2 + $0x14dc] ss:$72 sps:$4 sm:$0xff]  }
  0xed   :  { %948 = vmatpush1.bf16.msra.mxu0 %v11319_v5  ;;  %1768 = vmatprep.subr.bf16.mxu1 %v11332_v9  ;;  %v11413_v5 = vld [vmem:[#allocation2 + $0x1448] ss:$72 sps:$4 sm:$0xff]   ;;  %v11421_v9 = vld [vmem:[#allocation2 + $0x156c] ss:$72 sps:$4 sm:$0xff]  }
  0xee   :  { %960 = vmatprep.subr.bf16.mxu0 %v11329_v8  ;;  %v11416_v8 = vld [vmem:[#allocation2 + $0x14d8] ss:$72 sps:$4 sm:$0xff]  }
  0xef   :  { %1758 = vmatmul.mubr.bf16.vlgmr.msra.gmra.mrb[4].mxu1 %v13107_v4  ;;  %v11351_v4 = vld [vmem:[#allocation2 + $0xabc] ss:$72 sps:$4 sm:$0xff]  }
  0xf0   :  { %950 = vmatmul.mubr.bf16.vlgmr.msra.gmra.mrb[0].mxu0 %v13125_v11  ;;  %1769 = vmatpush1.bf16.msra.mxu1 %v11330_v12  ;;  %v11427_v12 = vld [vmem:[#allocation2 + $0x168c] ss:$72 sps:$4 sm:$0xff]  }
  0xf1   :  { %961 = vmatpush1.bf16.msra.mxu0 %v11327_v10  ;;  %1770 = vmatprep.subr.bf16.mxu1 %v11339_v14  ;;  %v11424_v10 = vld [vmem:[#allocation2 + $0x15fc] ss:$72 sps:$4 sm:$0xff]  }
  0xf2   :  { %962 = vmatprep.subr.bf16.mxu0 %v11336_v13  ;;  %992 = vmatprep.mubr.bf16.mxu0 %v12980_v19  ;;  %v11425_v13 = vld [vmem:[#allocation2 + $0x1688] ss:$72 sps:$4 sm:$0xff]   ;;  %v11430_v14 = vld [vmem:[#allocation2 + $0x171c] ss:$72 sps:$4 sm:$0xff]  }
  0xf3   :  { %1800 = vmatprep.mubr.bf16.mxu1 %v13101_v50  ;;  %v11355_v50 = vld [vmem:[#allocation2 + $0xb48] ss:$72 sps:$4 sm:$0xff]  }
  0xf4   :  { %1771 = vmatpush1.bf16.msra.mxu1 %v11337_v16  ;;  %v11433_v16 = vld [vmem:[#allocation2 + $0x17ac] ss:$72 sps:$4 sm:$0xff]  }
  0xf5   :  { %963 = vmatpush1.bf16.msra.mxu0 %v11334_v15  ;;  %1772 = vmatprep.subr.bf16.mxu1 %v11345_v18  ;;  %v11428_v15 = vld [vmem:[#allocation2 + $0x1718] ss:$72 sps:$4 sm:$0xff]   ;;  %v11436_v18 = vld [vmem:[#allocation2 + $0x183c] ss:$72 sps:$4 sm:$0xff]  }
  0xf6   :  { %964 = vmatprep.subr.bf16.mxu0 %v11342_v17  ;;  %v11431_v17 = vld [vmem:[#allocation2 + $0x17a8] ss:$72 sps:$4 sm:$0xff]  }
  0xf8   :  { %1773 = vmatpush1.bf16.msra.mxu1 %v11343_v21  ;;  %v11439_v21 = vld [vmem:[#allocation2 + $0x18cc] ss:$72 sps:$4 sm:$0xff]  }
  0xf9   :  { %965 = vmatpush1.bf16.msra.mxu0 %v11340_v20  ;;  %1774 = vmatprep.subr.bf16.mxu1 %v11351_v4  ;;  %v11434_v20 = vld [vmem:[#allocation2 + $0x1838] ss:$72 sps:$4 sm:$0xff]   ;;  %v11442_v4 = vld [vmem:[#allocation2 + $0x195c] ss:$72 sps:$4 sm:$0xff]  }
  0xfa   :  { %966 = vmatprep.subr.bf16.mxu0 %v11348_v22  ;;  %v11437_v22 = vld [vmem:[#allocation2 + $0x18c8] ss:$72 sps:$4 sm:$0xff]  }
  0xfc   :  { %1775 = vmatpush1.bf16.msra.mxu1 %v11349_v24  ;;  %v11445_v24 = vld [vmem:[#allocation2 + $0x19ec] ss:$72 sps:$4 sm:$0xff]  }
  0xfd   :  { %967 = vmatpush1.bf16.msra.mxu0 %v11346_v23  ;;  %1776 = vmatprep.subr.bf16.mxu1 %v11357_v26  ;;  %v11440_v23 = vld [vmem:[#allocation2 + $0x1958] ss:$72 sps:$4 sm:$0xff]   ;;  %v11448_v26 = vld [vmem:[#allocation2 + $0x1a7c] ss:$72 sps:$4 sm:$0xff]  }
  0xfe   :  { %968 = vmatprep.subr.bf16.mxu0 %v11354_v25  ;;  %v11443_v25 = vld [vmem:[#allocation2 + $0x19e8] ss:$72 sps:$4 sm:$0xff]  }
 0x100   :  { %1777 = vmatpush1.bf16.msra.mxu1 %v11355_v50  ;;  %v11451_v50 = vld [vmem:[#allocation2 + $0x1b0c] ss:$72 sps:$4 sm:$0xff]  }
 0x101   :  { %969 = vmatpush1.bf16.msra.mxu0 %v11352_v27  ;;  %1778 = vmatprep.subr.bf16.mxu1 %v11363_v29  ;;  %v11446_v27 = vld [vmem:[#allocation2 + $0x1a78] ss:$72 sps:$4 sm:$0xff]   ;;  %v11454_v29 = vld [vmem:[#allocation2 + $0x1b9c] ss:$72 sps:$4 sm:$0xff]  }
 0x102   :  { %970 = vmatprep.subr.bf16.mxu0 %v11360_v28  ;;  %v11449_v28 = vld [vmem:[#allocation2 + $0x1b08] ss:$72 sps:$4 sm:$0xff]  }
 0x104   :  { %1779 = vmatpush1.bf16.msra.mxu1 %v11361_v31  ;;  %v11490_v31 = vld [vmem:[#allocation6 + $0x80] sm:$0xff]  }
 0x105   :  { %971 = vmatpush1.bf16.msra.mxu0 %v11358_v30  ;;  %1780 = vmatprep.subr.bf16.mxu1 %v11369_v34  ;;  %v11489_v30 = vld [vmem:[#allocation6 + $0xc0] sm:$0xff]  }
 0x106   :  { %972 = vmatprep.subr.bf16.mxu0 %v11366_v32  ;;  %v11491_v32 = vld [vmem:[#allocation6 + $0xc8] sm:$0xff]  }
 0x107   :  { %v11452_v34 = vld [vmem:[#allocation2 + $0x1b98] ss:$72 sps:$4 sm:$0xff]  }
 0x108   :  { %1781 = vmatpush1.bf16.msra.mxu1 %v11367_v36  ;;  %v11492_v36 = vld [vmem:[#allocation6 + $0x88] sm:$0xff]  }
 0x109   :  { %973 = vmatpush1.bf16.msra.mxu0 %v11364_v35  ;;  %1782 = vmatprep.subr.bf16.mxu1 %v11375_v38  ;;  %v11457_v35 = vld [vmem:[#allocation2 + $0x1c2c] ss:$72 sps:$4 sm:$0xff]   ;;  %v11455_v38 = vld [vmem:[#allocation2 + $0x1c28] ss:$72 sps:$4 sm:$0xff]  }
 0x10a   :  { %974 = vmatprep.subr.bf16.mxu0 %v11372_v37  ;;  %v11493_v37 = vld [vmem:[#allocation6 + $0xd0] sm:$0xff]  }
 0x10c   :  { %1783 = vmatpush1.bf16.msra.mxu1 %v11373_v40  ;;  %v11494_v40 = vld [vmem:[#allocation6 + $0x90] sm:$0xff]  }
 0x10d   :  { %975 = vmatpush1.bf16.msra.mxu0 %v11370_v39  ;;  %1784 = vmatprep.subr.bf16.mxu1 %v11379_v41  ;;  %v11460_v39 = vld [vmem:[#allocation2 + $0x1cbc] ss:$72 sps:$4 sm:$0xff]   ;;  %v11495_v41 = vld [vmem:[#allocation6 + $0xd8] sm:$0xff]  }
 0x10e   :  { %10743 = vmatprep.subr.bf16.mxu0 %v11489_v30 }
 0x110   :  { %993 = vmatmul.mubr.bf16.vlgmr.msra.gmra.mrb[0].mxu0 %v11376_v42  ;;  %1785 = vmatpush1.bf16.msra.mxu1 %v11377_v43  ;;  %v11458_v42 = vld [vmem:[#allocation2 + $0x1cb8] ss:$72 sps:$4 sm:$0xff]   ;;  %v11496_v43 = vld [vmem:[#allocation6 + $0x98] sm:$0xff]  }
 0x111   :  { %1786 = vmatprep.subr.bf16.mxu1 %v11382_v44  ;;  %10744 = vmatpush3.bf16.msra.mxu0 %v11490_v31  ;;  %v11497_v44 = vld [vmem:[#allocation6 + $0xe0] sm:$0xff]  }
 0x112   :  { %10745 = vmatprep.subr.bf16.mxu0 %v11491_v32 }
 0x114   :  { %1787 = vmatpush1.bf16.msra.mxu1 %v11380_v45  ;;  %v11461_v45 = vld [vmem:[#allocation2 + $0x1d48] ss:$72 sps:$4 sm:$0xff]  }
 0x115   :  { %1788 = vmatprep.subr.bf16.mxu1 %v11385_v46  ;;  %10746 = vmatpush3.bf16.msra.mxu0 %v11492_v36  ;;  %v11466_v46 = vld [vmem:[#allocation2 + $0x1ddc] ss:$72 sps:$4 sm:$0xff]  }
 0x116   :  { %10747 = vmatprep.subr.bf16.mxu0 %v11493_v37 }
 0x118   :  { %1789 = vmatpush1.bf16.msra.mxu1 %v11383_v47  ;;  %v11498_v47 = vld [vmem:[#allocation6 + $0xa0] sm:$0xff]  }
 0x119   :  { %1790 = vmatprep.subr.bf16.mxu1 %v11388_v48  ;;  %10748 = vmatpush3.bf16.msra.mxu0 %v11494_v40  ;;  %v11499_v48 = vld [vmem:[#allocation6 + $0xe8] sm:$0xff]  }
 0x11a   :  { %10749 = vmatprep.subr.bf16.mxu0 %v11495_v41 }
 0x11c   :  { %1791 = vmatpush1.bf16.msra.mxu1 %v11386_v49  ;;  %v11464_v49 = vld [vmem:[#allocation2 + $0x1dd8] ss:$72 sps:$4 sm:$0xff]  }
 0x11d   :  { %1792 = vmatprep.subr.bf16.mxu1 %v11391_v51  ;;  %10750 = vmatpush3.bf16.msra.mxu0 %v11496_v43  ;;  %v11469_v51 = vld [vmem:[#allocation2 + $0x1e6c] ss:$72 sps:$4 sm:$0xff]   ;;  %v1153_v43 = vld [vmem:[#allocation4 + $0x2] sm:$0x3] }
 0x11e   :  { %10751 = vmatprep.subr.bf16.mxu0 %v11497_v44 }
 0x120   :  { %1793 = vmatpush1.bf16.msra.mxu1 %v11389_v52  ;;  %v11500_v52 = vld [vmem:[#allocation6 + $0xa8] sm:$0xff]  }
 0x121   :  { %1794 = vmatprep.subr.bf16.mxu1 %v11394_v53  ;;  %10752 = vmatpush3.bf16.msra.mxu0 %v11498_v47 }
 0x122   :  { %10753 = vmatprep.subr.bf16.mxu0 %v11499_v48 }
 0x124   :  { %1795 = vmatpush1.bf16.msra.mxu1 %v11392_v54  ;;  %v11467_v54 = vld [vmem:[#allocation2 + $0x1e68] ss:$72 sps:$4 sm:$0xff]  }
 0x125   :  { %1796 = vmatprep.subr.bf16.mxu1 %v11397_v55  ;;  %10754 = vmatpush3.bf16.msra.mxu0 %v11500_v52 }
 0x128   :  { %1797 = vmatpush1.bf16.msra.mxu1 %v11395_v56  ;;  %v11472_v56 = vld [vmem:[#allocation2 + $0x1efc] ss:$72 sps:$4 sm:$0xff]  }
 0x129   :  { %1798 = vmatprep.subr.bf16.mxu1 %v11400_v57 }
 0x12c   :  { %1799 = vmatpush1.bf16.msra.mxu1 %v11398_v58 }
 0x12d   :  { %1811 = vmatprep.subr.bf16.mxu1 %v11403_v59  ;;  %v11470_v59 = vld [vmem:[#allocation2 + $0x1ef8] ss:$72 sps:$4 sm:$0xff]  }
 0x12f   :  { %1801 = vmatmul.mubr.bf16.vlgmr.msra.gmra.mrb[4].mxu1 %v13112_v7  ;;  %v11419_v7 = vld [vmem:[#allocation2 + $0x1568] ss:$72 sps:$4 sm:$0xff]  }
 0x130   :  { %1812 = vmatpush1.bf16.msra.mxu1 %v11401_v60  ;;  %1843 = vmatprep.mubr.bf16.mxu1 %v13119_v33  ;;  %v11422_v33 = vld [vmem:[#allocation2 + $0x15f8] ss:$72 sps:$4 sm:$0xff]  }
 0x131   :  { %1813 = vmatprep.subr.bf16.mxu1 %v11406_v61  ;;  %v11473_v60 = vld [vmem:[#allocation6 + $0x40] sm:$0xff]  }
 0x132   :  { %v11474_v61 = vld [vmem:[#allocation6] sm:$0xff]  }
 0x134   :  { %1814 = vmatpush1.bf16.msra.mxu1 %v11404_v62  ;;  %v11475_v62 = vld [vmem:[#allocation6 + $0x48] sm:$0xff]  }
 0x135   :  { %1815 = vmatprep.subr.bf16.mxu1 %v11409_v63  ;;  %v11476_v63 = vld [vmem:[#allocation6 + $0x8] sm:$0xff]  }
 0x138   :  { %1816 = vmatpush1.bf16.msra.mxu1 %v11407_v0  ;;  %v12801_v0 = vld [vmem:[%s13392_s0 + $0x18] ss:$28 sps:$4 sm:$0xff]  }
 0x139   :  { %1817 = vmatprep.subr.bf16.mxu1 %v11412_v1  ;;  %v11477_v1 = vld [vmem:[#allocation6 + $0x50] sm:$0xff]  }
 0x13c   :  { %1818 = vmatpush1.bf16.msra.mxu1 %v11410_v2  ;;  %v11478_v2 = vld [vmem:[#allocation6 + $0x10] sm:$0xff]  }
 0x13d   :  { %1819 = vmatprep.subr.bf16.mxu1 %v11415_v3  ;;  %v11479_v3 = vld [vmem:[#allocation6 + $0x58] sm:$0xff]  }
 0x140   :  { %1820 = vmatpush1.bf16.msra.mxu1 %v11413_v5  ;;  %v11480_v5 = vld [vmem:[#allocation6 + $0x18] sm:$0xff]  }
 0x141   :  { %1821 = vmatprep.subr.bf16.mxu1 %v11418_v6  ;;  %v11481_v6 = vld [vmem:[#allocation6 + $0x60] sm:$0xff]  }
 0x144   :  { %1822 = vmatpush1.bf16.msra.mxu1 %v11416_v8  ;;  %v11482_v8 = vld [vmem:[#allocation6 + $0x20] sm:$0xff]  }
 0x145   :  { %1823 = vmatprep.subr.bf16.mxu1 %v11421_v9  ;;  %v11483_v9 = vld [vmem:[#allocation6 + $0x68] sm:$0xff]  }
 0x148   :  { %1824 = vmatpush1.bf16.msra.mxu1 %v11419_v7  ;;  %v11484_v7 = vld [vmem:[#allocation6 + $0x28] sm:$0xff]  }
 0x149   :  { %1825 = vmatprep.subr.bf16.mxu1 %v11424_v10  ;;  %v11485_v10 = vld [vmem:[#allocation6 + $0x70] sm:$0xff]  }
 0x14c   :  { %1826 = vmatpush1.bf16.msra.mxu1 %v11422_v33  ;;  %v11486_v33 = vld [vmem:[#allocation6 + $0x30] sm:$0xff]  }
 0x14d   :  { %1827 = vmatprep.subr.bf16.mxu1 %v11427_v12  ;;  %v11487_v12 = vld [vmem:[#allocation6 + $0x78] sm:$0xff]  }
 0x150   :  { %1828 = vmatpush1.bf16.msra.mxu1 %v11425_v13  ;;  %v11488_v13 = vld [vmem:[#allocation6 + $0x38] sm:$0xff]  }
 0x151   :  { %1829 = vmatprep.subr.bf16.mxu1 %v11430_v14  ;;  %v225_v14 = vlaneseq }
 0x154   :  { %1830 = vmatpush1.bf16.msra.mxu1 %v11428_v15  ;;  %v226_v15 = vshrl.u32 %v225_v14, 7  ;;  %v11531_v14 = vld [vmem:[#allocation2 + $0x494] ss:$72 sps:$4 sm:$0xff]  }
 0x155   :  { %1831 = vmatprep.subr.bf16.mxu1 %v11433_v16  ;;  %v223_v16 = vld [vmem:[#allocation4] sm:$0x3] }
 0x158   :  { %1832 = vmatpush1.bf16.msra.mxu1 %v11431_v17  ;;  %v13141_v17 = vsub.s32 0, %v226_v15 }
 0x159   :  { %1833 = vmatprep.subr.bf16.mxu1 %v11436_v18  ;;  %v13143_v18 = vsub.s32 1, %v226_v15  ;;  %v11529_v15 = vld [vmem:[#allocation2 + $0x490] ss:$72 sps:$4 sm:$0xff]  }
 0x15a   :  { %v1158_v44 = vrot.slane %v1153_v43, %v13141_v17 }
 0x15c   :  { %1834 = vmatpush1.bf16.msra.mxu1 %v11434_v20  ;;  %v228_v20 = vrot.slane %v223_v16, %v13141_v17 }
 0x15d   :  { %1835 = vmatprep.subr.bf16.mxu1 %v11439_v21  ;;  %v232_v21 = vrot.slane %v223_v16, %v13143_v18  ;;  %v11534_v16 = vld [vmem:[#allocation2 + $0x524] ss:$72 sps:$4 sm:$0xff]  }
 0x160   :  { %1836 = vmatpush1.bf16.msra.mxu1 %v11437_v22 }
 0x161   :  { %1837 = vmatprep.subr.bf16.mxu1 %v11442_v4 }
 0x164   :  { %1838 = vmatpush1.bf16.msra.mxu1 %v11440_v23 }
 0x165   :  { %1839 = vmatprep.subr.bf16.mxu1 %v11445_v24  ;;  %v11501_v24 = vld [vmem:[#allocation6 + $0xf0] sm:$0xff]  }
 0x166   :  { %10755 = vmatprep.subr.bf16.mxu0 %v11501_v24  ;;  %v11543_v24 = vld [vmem:[#allocation2 + $0x6d4] ss:$72 sps:$4 sm:$0xff]  }
 0x168   :  { %1840 = vmatpush1.bf16.msra.mxu1 %v11443_v25 }
 0x169   :  { %1841 = vmatprep.subr.bf16.mxu1 %v11448_v26 }
 0x16c   :  { %1842 = vmatpush1.bf16.msra.mxu1 %v11446_v27 }
 0x16d   :  { %1854 = vmatprep.subr.bf16.mxu1 %v11451_v50  ;;  %v11502_v50 = vld [vmem:[#allocation6 + $0xb0] sm:$0xff]  }
 0x16e   :  { %10756 = vmatpush3.bf16.msra.mxu0 %v11502_v50  ;;  %v11549_v50 = vld [vmem:[#allocation2 + $0x7f4] ss:$72 sps:$4 sm:$0xff]  }
 0x16f   :  { %1844 = vmatmul.mubr.bf16.vlgmr.msra.gmra.mrb[4].mxu1 %v13125_v11  ;;  %v11463_v11 = vld [vmem:[#allocation2 + $0x1d4c] ss:$72 sps:$4 sm:$0xff]  }
 0x170   :  { %1855 = vmatpush1.bf16.msra.mxu1 %v11449_v28  ;;  %1886 = vmatprep.mubr.bf16.mxu1 %v12980_v19 }
 0x171   :  { %1856 = vmatprep.subr.bf16.mxu1 %v11454_v29 }
 0x174   :  { %1857 = vmatpush1.bf16.msra.mxu1 %v11452_v34 }
 0x175   :  { %1858 = vmatprep.subr.bf16.mxu1 %v11457_v35  ;;  %v11503_v35 = vld [vmem:[#allocation6 + $0xf8] sm:$0xff]  }
 0x176   :  { %10757 = vmatprep.subr.bf16.mxu0 %v11503_v35  ;;  %v13158_v35 = vld [vmem:[%s13392_s0] ss:$28 sps:$4 sm:$0xff]  }
 0x178   :  { %1859 = vmatpush1.bf16.msra.mxu1 %v11455_v38  ;;  %v11504_v38 = vld [vmem:[#allocation6 + $0xb8] sm:$0xff]  }
 0x179   :  { %1860 = vmatprep.subr.bf16.mxu1 %v11460_v39  ;;  %10758 = vmatpush3.bf16.msra.mxu0 %v11504_v38  ;;  %v11561_v38 = vld [vmem:[#allocation2 + $0xa34] ss:$72 sps:$4 sm:$0xff]  }
 0x17c   :  { %1861 = vmatpush1.bf16.msra.mxu1 %v11458_v42 }
 0x17d   :  { %1862 = vmatprep.subr.bf16.mxu1 %v11463_v11  ;;  %v11507_v11 = vld [vmem:[#allocation2 + $0x14] ss:$72 sps:$4 sm:$0xff]  }
 0x17e   :  { %2893 = vmatprep.subr.bf16.mxu0 %v11507_v11  ;;  %v11565_v11 = vld [vmem:[#allocation2 + $0xb50] ss:$72 sps:$4 sm:$0xff]  }
 0x180   :  { %1863 = vmatpush1.bf16.msra.mxu1 %v11461_v45  ;;  %v1162_v45 = vrot.slane %v1153_v43, %v13143_v18  ;;  %v11570_v43 = vld [vmem:[#allocation2 + $0xbe4] ss:$72 sps:$4 sm:$0xff]  }
 0x181   :  { %1864 = vmatprep.subr.bf16.mxu1 %v11466_v46 }
 0x182   :  { %v865_v53 = vpop.f32.mrb[0].mxu1 }
 0x183   :  { %v867_v55 = vpop.f32.mrb[1].mxu1  ;;  %v866_v22 = vadd.f32 %v865_v53, %v228_v20 }
 0x184   :  { %v869_v57 = vpop.f32.mrb[2].mxu1  ;;  %1865 = vmatpush1.bf16.msra.mxu1 %v11464_v49  ;;  %v868_v4 = vadd.f32 %v867_v55, %v232_v21 }
 0x185   :  { %v871_v58 = vpop.f32.mrb[3].mxu1  ;;  %1866 = vmatprep.subr.bf16.mxu1 %v11469_v51  ;;  %v870_v25 = vadd.f32 %v869_v57, %v228_v20  ;;  %v11532_v20 = vld [vmem:[#allocation2 + $0x520] ss:$72 sps:$4 sm:$0xff]  }
 0x186   :  { %v872_v28 = vadd.f32 %v871_v58, %v232_v21  ;;  %v11537_v21 = vld [vmem:[#allocation2 + $0x5b4] ss:$72 sps:$4 sm:$0xff]  }
 0x188   :  { %1867 = vmatpush1.bf16.msra.mxu1 %v11467_v54 }
 0x189   :  { %1868 = vmatprep.subr.bf16.mxu1 %v11472_v56 }
 0x18c   :  { %1869 = vmatpush1.bf16.msra.mxu1 %v11470_v59 }
 0x18d   :  { %10765 = vmatprep.subr.bf16.mxu1 %v11473_v60 }
 0x18f   :  { %1887 = vmatmul.mubr.bf16.vlgmr.msra.gmra.mrb[4].mxu1 %v12801_v0  ;;  %v11513_v0 = vld [vmem:[#allocation2 + $0x134] ss:$72 sps:$4 sm:$0xff]  }
 0x190   :  { %10766 = vmatpush3.bf16.msra.mxu1 %v11474_v61  ;;  %v11505_v61 = vld [vmem:[#allocation2 + $0x10] ss:$72 sps:$4 sm:$0xff]  }
 0x191   :  { %10767 = vmatprep.subr.bf16.mxu1 %v11475_v62  ;;  %v11510_v62 = vld [vmem:[#allocation2 + $0xa4] ss:$72 sps:$4 sm:$0xff]  }
 0x194   :  { %10768 = vmatpush3.bf16.msra.mxu1 %v11476_v63  ;;  %v11508_v63 = vld [vmem:[#allocation2 + $0xa0] ss:$72 sps:$4 sm:$0xff]  }
 0x195   :  { %10769 = vmatprep.subr.bf16.mxu1 %v11477_v1  ;;  %v13152_v1 = vld [vmem:[%s13392_s0 + $0x4] ss:$28 sps:$4 sm:$0xff]  }
 0x198   :  { %10770 = vmatpush3.bf16.msra.mxu1 %v11478_v2  ;;  %v11511_v2 = vld [vmem:[#allocation2 + $0x130] ss:$72 sps:$4 sm:$0xff]  }
 0x199   :  { %10771 = vmatprep.subr.bf16.mxu1 %v11479_v3  ;;  %v11516_v3 = vld [vmem:[#allocation2 + $0x1c4] ss:$72 sps:$4 sm:$0xff]  }
 0x19c   :  { %10772 = vmatpush3.bf16.msra.mxu1 %v11480_v5  ;;  %v11514_v5 = vld [vmem:[#allocation2 + $0x1c0] ss:$72 sps:$4 sm:$0xff]  }
 0x19d   :  { %10773 = vmatprep.subr.bf16.mxu1 %v11481_v6  ;;  %v11519_v6 = vld [vmem:[#allocation2 + $0x254] ss:$72 sps:$4 sm:$0xff]  }
 0x1a0   :  { %10774 = vmatpush3.bf16.msra.mxu1 %v11482_v8  ;;  %v11517_v8 = vld [vmem:[#allocation2 + $0x250] ss:$72 sps:$4 sm:$0xff]  }
 0x1a1   :  { %10775 = vmatprep.subr.bf16.mxu1 %v11483_v9  ;;  %v11522_v9 = vld [vmem:[#allocation2 + $0x2e4] ss:$72 sps:$4 sm:$0xff]  }
 0x1a4   :  { %10776 = vmatpush3.bf16.msra.mxu1 %v11484_v7  ;;  %v11520_v7 = vld [vmem:[#allocation2 + $0x2e0] ss:$72 sps:$4 sm:$0xff]  }
 0x1a5   :  { %10777 = vmatprep.subr.bf16.mxu1 %v11485_v10  ;;  %v11525_v10 = vld [vmem:[#allocation2 + $0x374] ss:$72 sps:$4 sm:$0xff]  }
 0x1a8   :  { %10778 = vmatpush3.bf16.msra.mxu1 %v11486_v33  ;;  %v11523_v33 = vld [vmem:[#allocation2 + $0x370] ss:$72 sps:$4 sm:$0xff]  }
 0x1a9   :  { %10779 = vmatprep.subr.bf16.mxu1 %v11487_v12  ;;  %v11528_v12 = vld [vmem:[#allocation2 + $0x404] ss:$72 sps:$4 sm:$0xff]  }
 0x1ac   :  { %10780 = vmatpush3.bf16.msra.mxu1 %v11488_v13  ;;  %v11526_v13 = vld [vmem:[#allocation2 + $0x400] ss:$72 sps:$4 sm:$0xff]  }
 0x1e3   :  { %v994_v23 = vpop.f32.mrb[0].mxu0 }
 0x1e4   :  { %v10971_v26 = vadd.f32 %v994_v23, %v866_v22  ;;  %v996_v27 = vpop.f32.mrb[1].mxu0  ;;  %v11535_v22 = vld [vmem:[#allocation2 + $0x5b0] ss:$72 sps:$4 sm:$0xff]   ;;  %v11538_v23 = vld [vmem:[#allocation2 + $0x640] ss:$72 sps:$4 sm:$0xff]  }
 0x1e5   :  { %v10973_v29 = vadd.f32 %v996_v27, %v868_v4  ;;  %v998_v30 = vpop.f32.mrb[2].mxu0  ;;  %v11540_v4 = vld [vmem:[#allocation2 + $0x644] ss:$72 sps:$4 sm:$0xff]   ;;  %v11544_v27 = vld [vmem:[#allocation2 + $0x760] ss:$72 sps:$4 sm:$0xff]  }
 0x1e6   :  { %v10975_v31 = vadd.f32 %v998_v30, %v870_v25  ;;  %v1000_v32 = vpop.f32.mrb[3].mxu0  ;;  %v1003_v36 = vmax.f32 %v10971_v26, 0.0  ;;  %v11541_v25 = vld [vmem:[#allocation2 + $0x6d0] ss:$72 sps:$4 sm:$0xff]   ;;  %v11546_v26 = vld [vmem:[#allocation2 + $0x764] ss:$72 sps:$4 sm:$0xff]  }
 0x1e7   :  { %v10977_v34 = vadd.f32 %v1000_v32, %v872_v28  ;;  %v1004_v39 = vmax.f32 %v10973_v29, 0.0  ;;  %v11547_v28 = vld [vmem:[#allocation2 + $0x7f0] ss:$72 sps:$4 sm:$0xff]   ;;  %v11552_v29 = vld [vmem:[#allocation2 + $0x884] ss:$72 sps:$4 sm:$0xff]  }
 0x1e8   :  { %v1005_v37 = vmax.f32 %v10975_v31, 0.0  ;;  %v11550_v30 = vld [vmem:[#allocation2 + $0x880] ss:$72 sps:$4 sm:$0xff]   ;;  %v11555_v31 = vld [vmem:[#allocation2 + $0x914] ss:$72 sps:$4 sm:$0xff]  }
 0x1e9   :  { %v1006_v40 = vmax.f32 %v10977_v34, 0.0  ;;  %v11553_v32 = vld [vmem:[#allocation2 + $0x910] ss:$72 sps:$4 sm:$0xff]   ;;  %v11558_v34 = vld [vmem:[#allocation2 + $0x9a4] ss:$72 sps:$4 sm:$0xff]  }
 0x1ea   :  { %v1007_v41 = vpack.c.bf16 %v1005_v37, %v1003_v36  ;;  %v11556_v36 = vld [vmem:[#allocation2 + $0x9a0] ss:$72 sps:$4 sm:$0xff]  }
 0x1eb   :  { %v1008_v42 = vpack.c.bf16 %v1006_v40, %v1004_v39  ;;  %v13164_v37 = vld [vmem:[%s13392_s0 + $0xc] ss:$28 sps:$4 sm:$0xff]   ;;  %v11559_v39 = vld [vmem:[#allocation2 + $0xa30] ss:$72 sps:$4 sm:$0xff]  }
 0x1ec   :  { %v11564_v40 = vld [vmem:[#allocation2 + $0xac4] ss:$72 sps:$4 sm:$0xff]  }
 0x1ed   :  { %2200 = vmatprep.mubr.bf16.mxu1 %v1008_v42  ;;  %v11567_v42 = vld [vmem:[#allocation2 + $0xb54] ss:$72 sps:$4 sm:$0xff]  }
 0x1ee   :  { %2201 = vmatmul.mubr.bf16.vlgmr.msra.gmra.mrb[8].mxu1 %v1007_v41  ;;  %v11562_v41 = vld [vmem:[#allocation2 + $0xac0] ss:$72 sps:$4 sm:$0xff]  }
 0x262   :  { %v1888_v46 = vpop.f32.mrb[4].mxu1 }
 0x263   :  { %v10978_v47 = vadd.f32 %v1888_v46, %v1158_v44  ;;  %v1890_v48 = vpop.f32.mrb[5].mxu1 }
 0x264   :  { %v10979_v49 = vadd.f32 %v1890_v48, %v1162_v45  ;;  %v1892_v51 = vpop.f32.mrb[6].mxu1 }
 0x265   :  { %v10980_v52 = vadd.f32 %v1892_v51, %v1158_v44  ;;  %v1894_v53 = vpop.f32.mrb[7].mxu1  ;;  %v1897_v55 = vmax.f32 %v10978_v47, 0.0  ;;  %v11568_v44 = vld [vmem:[#allocation2 + $0xbe0] ss:$72 sps:$4 sm:$0xff]   ;;  %v11571_v51 = vld [vmem:[#allocation2 + $0xc70] ss:$72 sps:$4 sm:$0xff]  }
 0x266   :  { %v10981_v54 = vadd.f32 %v1894_v53, %v1162_v45  ;;  %v1898_v57 = vmax.f32 %v10979_v49, 0.0  ;;  %v11573_v45 = vld [vmem:[#allocation2 + $0xc74] ss:$72 sps:$4 sm:$0xff]   ;;  %v11576_v53 = vld [vmem:[#allocation2 + $0xd04] ss:$72 sps:$4 sm:$0xff]  }
 0x267   :  { %v1899_v56 = vmax.f32 %v10980_v52, 0.0 }
 0x268   :  { %v1900_v58 = vmax.f32 %v10981_v54, 0.0 }
 0x269   :  { %v1901_v59 = vpack.c.bf16 %v1899_v56, %v1897_v55  ;;  %v11574_v55 = vld [vmem:[#allocation2 + $0xd00] ss:$72 sps:$4 sm:$0xff]   ;;  %v11579_v56 = vld [vmem:[#allocation2 + $0xd94] ss:$72 sps:$4 sm:$0xff]  }
 0x26a   :  { %v1902_v60 = vpack.c.bf16 %v1900_v58, %v1898_v57  ;;  %v11577_v57 = vld [vmem:[#allocation2 + $0xd90] ss:$72 sps:$4 sm:$0xff]   ;;  %v11582_v58 = vld [vmem:[#allocation2 + $0xe24] ss:$72 sps:$4 sm:$0xff]  }
 0x26c   :  { %2063 = vmatprep.mubr.bf16.mxu0 %v1902_v60  ;;  %v11674_v60 = vld [vmem:[#allocation6 + $0x100] sm:$0xff]  }
 0x26d   :  { %2064 = vmatmul.mubr.bf16.vlgmr.msra.gmra.mrb[4].mxu0 %v1901_v59  ;;  %v11673_v59 = vld [vmem:[#allocation6 + $0x140] sm:$0xff]  }
 0x26e   :  { %2894 = vmatpush1.bf16.msra.mxu0 %v11505_v61  ;;  %2925 = vmatprep.mubr.bf16.mxu0 %v13152_v1  ;;  %v11675_v61 = vld [vmem:[#allocation6 + $0x148] sm:$0xff]  }
 0x26f   :  { %2895 = vmatprep.subr.bf16.mxu0 %v11510_v62  ;;  %v11580_v62 = vld [vmem:[#allocation2 + $0xe20] ss:$72 sps:$4 sm:$0xff]   ;;  %10787 = vmatprep.subr.bf16.mxu1 %v11673_v59  ;;  %v11643_v59 = vld [vmem:[#allocation2 + $0x19f0] ss:$72 sps:$4 sm:$0xff]  }
 0x270   :  { %10788 = vmatpush3.bf16.msra.mxu1 %v11674_v60  ;;  %v11648_v60 = vld [vmem:[#allocation2 + $0x1a84] ss:$72 sps:$4 sm:$0xff]  }
 0x271   :  { %10789 = vmatprep.subr.bf16.mxu1 %v11675_v61  ;;  %v11646_v61 = vld [vmem:[#allocation2 + $0x1a80] ss:$72 sps:$4 sm:$0xff]  }
 0x272   :  { %2896 = vmatpush1.bf16.msra.mxu0 %v11508_v63  ;;  %v11585_v63 = vld [vmem:[#allocation2 + $0xeb4] ss:$72 sps:$4 sm:$0xff]  }
 0x273   :  { %2897 = vmatprep.subr.bf16.mxu0 %v11513_v0  ;;  %v11676_v0 = vld [vmem:[#allocation6 + $0x108] sm:$0xff]  }
 0x274   :  { %10790 = vmatpush3.bf16.msra.mxu1 %v11676_v0  ;;  %v11654_v0 = vld [vmem:[#allocation2 + $0x1ba4] ss:$72 sps:$4 sm:$0xff]  }
 0x276   :  { %2898 = vmatpush1.bf16.msra.mxu0 %v11511_v2  ;;  %v11677_v2 = vld [vmem:[#allocation6 + $0x150] sm:$0xff]  }
 0x277   :  { %2899 = vmatprep.subr.bf16.mxu0 %v11516_v3  ;;  %v11583_v3 = vld [vmem:[#allocation2 + $0xeb0] ss:$72 sps:$4 sm:$0xff]   ;;  %10791 = vmatprep.subr.bf16.mxu1 %v11677_v2 }
 0x278   :  { %v13186_v2 = vld [vmem:[%s13392_s0 + $0x10] ss:$28 sps:$4 sm:$0xff]  }
 0x27a   :  { %2900 = vmatpush1.bf16.msra.mxu0 %v11514_v5  ;;  %v11588_v5 = vld [vmem:[#allocation2 + $0xf44] ss:$72 sps:$4 sm:$0xff]  }
 0x27b   :  { %2901 = vmatprep.subr.bf16.mxu0 %v11519_v6  ;;  %v11678_v6 = vld [vmem:[#allocation6 + $0x110] sm:$0xff]  }
 0x27c   :  { %10792 = vmatpush3.bf16.msra.mxu1 %v11678_v6  ;;  %v11655_v6 = vld [vmem:[#allocation2 + $0x1c30] ss:$72 sps:$4 sm:$0xff]  }
 0x27e   :  { %2902 = vmatpush1.bf16.msra.mxu0 %v11517_v8  ;;  %v11679_v8 = vld [vmem:[#allocation6 + $0x158] sm:$0xff]  }
 0x27f   :  { %2903 = vmatprep.subr.bf16.mxu0 %v11522_v9  ;;  %v11586_v9 = vld [vmem:[#allocation2 + $0xf40] ss:$72 sps:$4 sm:$0xff]   ;;  %10793 = vmatprep.subr.bf16.mxu1 %v11679_v8  ;;  %v11660_v8 = vld [vmem:[#allocation2 + $0x1cc4] ss:$72 sps:$4 sm:$0xff]  }
 0x282   :  { %2904 = vmatpush1.bf16.msra.mxu0 %v11520_v7  ;;  %v11591_v7 = vld [vmem:[#allocation2 + $0xfd4] ss:$72 sps:$4 sm:$0xff]  }
 0x283   :  { %2905 = vmatprep.subr.bf16.mxu0 %v11525_v10  ;;  %v11680_v10 = vld [vmem:[#allocation6 + $0x118] sm:$0xff]  }
 0x284   :  { %10794 = vmatpush3.bf16.msra.mxu1 %v11680_v10  ;;  %v11661_v10 = vld [vmem:[#allocation2 + $0x1d50] ss:$72 sps:$4 sm:$0xff]  }
 0x286   :  { %2906 = vmatpush1.bf16.msra.mxu0 %v11523_v33  ;;  %v11681_v33 = vld [vmem:[#allocation6 + $0x160] sm:$0xff]  }
 0x287   :  { %2907 = vmatprep.subr.bf16.mxu0 %v11528_v12  ;;  %v11589_v12 = vld [vmem:[#allocation2 + $0xfd0] ss:$72 sps:$4 sm:$0xff]   ;;  %10795 = vmatprep.subr.bf16.mxu1 %v11681_v33  ;;  %v11666_v33 = vld [vmem:[#allocation2 + $0x1de4] ss:$72 sps:$4 sm:$0xff]  }
 0x28a   :  { %2908 = vmatpush1.bf16.msra.mxu0 %v11526_v13  ;;  %v11594_v13 = vld [vmem:[#allocation2 + $0x1064] ss:$72 sps:$4 sm:$0xff]  }
 0x28b   :  { %2909 = vmatprep.subr.bf16.mxu0 %v11531_v14  ;;  %v11682_v14 = vld [vmem:[#allocation6 + $0x120] sm:$0xff]  }
 0x28c   :  { %10796 = vmatpush3.bf16.msra.mxu1 %v11682_v14 }
 0x28e   :  { %2910 = vmatpush1.bf16.msra.mxu0 %v11529_v15  ;;  %v11683_v15 = vld [vmem:[#allocation6 + $0x168] sm:$0xff]  }
 0x28f   :  { %2911 = vmatprep.subr.bf16.mxu0 %v11534_v16  ;;  %v11592_v16 = vld [vmem:[#allocation2 + $0x1060] ss:$72 sps:$4 sm:$0xff]   ;;  %10797 = vmatprep.subr.bf16.mxu1 %v11683_v15 }
 0x292   :  { %2912 = vmatpush1.bf16.msra.mxu0 %v11532_v20  ;;  %v11597_v20 = vld [vmem:[#allocation2 + $0x10f4] ss:$72 sps:$4 sm:$0xff]  }
 0x293   :  { %2913 = vmatprep.subr.bf16.mxu0 %v11537_v21  ;;  %v11684_v21 = vld [vmem:[#allocation6 + $0x128] sm:$0xff]  }
 0x294   :  { %10798 = vmatpush3.bf16.msra.mxu1 %v11684_v21  ;;  %v11667_v21 = vld [vmem:[#allocation2 + $0x1e70] ss:$72 sps:$4 sm:$0xff]  }
 0x296   :  { %2914 = vmatpush1.bf16.msra.mxu0 %v11535_v22  ;;  %v11595_v22 = vld [vmem:[#allocation2 + $0x10f0] ss:$72 sps:$4 sm:$0xff]  }
 0x297   :  { %2915 = vmatprep.subr.bf16.mxu0 %v11540_v4  ;;  %v11600_v4 = vld [vmem:[#allocation2 + $0x1184] ss:$72 sps:$4 sm:$0xff]  }
 0x29a   :  { %2916 = vmatpush1.bf16.msra.mxu0 %v11538_v23  ;;  %v11598_v23 = vld [vmem:[#allocation2 + $0x1180] ss:$72 sps:$4 sm:$0xff]  }
 0x29b   :  { %2917 = vmatprep.subr.bf16.mxu0 %v11543_v24  ;;  %v11603_v24 = vld [vmem:[#allocation2 + $0x1214] ss:$72 sps:$4 sm:$0xff]  }
 0x29e   :  { %2918 = vmatpush1.bf16.msra.mxu0 %v11541_v25  ;;  %v11601_v25 = vld [vmem:[#allocation2 + $0x1210] ss:$72 sps:$4 sm:$0xff]  }
 0x29f   :  { %2919 = vmatprep.subr.bf16.mxu0 %v11546_v26  ;;  %v11606_v26 = vld [vmem:[#allocation2 + $0x12a4] ss:$72 sps:$4 sm:$0xff]  }
 0x2a2   :  { %2920 = vmatpush1.bf16.msra.mxu0 %v11544_v27  ;;  %v13174_v27 = vld [vmem:[%s13392_s0 + $0x8] ss:$28 sps:$4 sm:$0xff]  }
 0x2a3   :  { %2921 = vmatprep.subr.bf16.mxu0 %v11549_v50  ;;  %v11604_v50 = vld [vmem:[#allocation2 + $0x12a0] ss:$72 sps:$4 sm:$0xff]  }
 0x2a6   :  { %2922 = vmatpush1.bf16.msra.mxu0 %v11547_v28  ;;  %v13180_v28 = vld [vmem:[%s13392_s0 + $0x14] ss:$28 sps:$4 sm:$0xff]  }
 0x2a7   :  { %2923 = vmatprep.subr.bf16.mxu0 %v11552_v29  ;;  %v11609_v29 = vld [vmem:[#allocation2 + $0x1334] ss:$72 sps:$4 sm:$0xff]  }
 0x2aa   :  { %2924 = vmatpush1.bf16.msra.mxu0 %v11550_v30  ;;  %v11607_v30 = vld [vmem:[#allocation2 + $0x1330] ss:$72 sps:$4 sm:$0xff]  }
 0x2ab   :  { %2936 = vmatprep.subr.bf16.mxu0 %v11555_v31  ;;  %v11612_v31 = vld [vmem:[#allocation2 + $0x13c4] ss:$72 sps:$4 sm:$0xff]  }
 0x2ad   :  { %2926 = vmatmul.mubr.bf16.vlgmr.msra.gmra.mrb[8].mxu0 %v13158_v35 }
 0x2ae   :  { %2937 = vmatpush1.bf16.msra.mxu0 %v11553_v32  ;;  %2968 = vmatprep.mubr.bf16.mxu0 %v13164_v37  ;;  %v11610_v32 = vld [vmem:[#allocation2 + $0x13c0] ss:$72 sps:$4 sm:$0xff]  }
 0x2af   :  { %2938 = vmatprep.subr.bf16.mxu0 %v11558_v34  ;;  %v11615_v34 = vld [vmem:[#allocation2 + $0x1454] ss:$72 sps:$4 sm:$0xff]  }
 0x2b2   :  { %2939 = vmatpush1.bf16.msra.mxu0 %v11556_v36  ;;  %v11613_v36 = vld [vmem:[#allocation2 + $0x1450] ss:$72 sps:$4 sm:$0xff]  }
 0x2b3   :  { %2940 = vmatprep.subr.bf16.mxu0 %v11561_v38  ;;  %v11618_v38 = vld [vmem:[#allocation2 + $0x14e4] ss:$72 sps:$4 sm:$0xff]  }
 0x2b6   :  { %2941 = vmatpush1.bf16.msra.mxu0 %v11559_v39  ;;  %v11616_v39 = vld [vmem:[#allocation2 + $0x14e0] ss:$72 sps:$4 sm:$0xff]  }
 0x2b7   :  { %2942 = vmatprep.subr.bf16.mxu0 %v11564_v40  ;;  %v11621_v40 = vld [vmem:[#allocation2 + $0x1574] ss:$72 sps:$4 sm:$0xff]  }
 0x2ba   :  { %2943 = vmatpush1.bf16.msra.mxu0 %v11562_v41  ;;  %v11619_v41 = vld [vmem:[#allocation2 + $0x1570] ss:$72 sps:$4 sm:$0xff]  }
 0x2bb   :  { %2944 = vmatprep.subr.bf16.mxu0 %v11567_v42  ;;  %v11624_v42 = vld [vmem:[#allocation2 + $0x1604] ss:$72 sps:$4 sm:$0xff]  }
 0x2be   :  { %2945 = vmatpush1.bf16.msra.mxu0 %v11565_v11  ;;  %v11622_v11 = vld [vmem:[#allocation2 + $0x1600] ss:$72 sps:$4 sm:$0xff]  }
 0x2bf   :  { %2946 = vmatprep.subr.bf16.mxu0 %v11570_v43  ;;  %v11627_v43 = vld [vmem:[#allocation2 + $0x1694] ss:$72 sps:$4 sm:$0xff]  }
 0x2c1   :  { %v10781_v46 = vpop.f32.mrb[8].mxu1 }
 0x2c2   :  { %v10782_v47 = vpop.f32.mrb[9].mxu1  ;;  %2947 = vmatpush1.bf16.msra.mxu0 %v11568_v44  ;;  %v11625_v44 = vld [vmem:[#allocation2 + $0x1690] ss:$72 sps:$4 sm:$0xff]  }
 0x2c3   :  { %v13167_v48 = vadd.f32 %v10782_v47, %v10781_v46  ;;  %v10784_v49 = vpop.f32.mrb[10].mxu1  ;;  %2948 = vmatprep.subr.bf16.mxu0 %v11573_v45  ;;  %v11630_v45 = vld [vmem:[#allocation2 + $0x1724] ss:$72 sps:$4 sm:$0xff]   ;;  %v11628_v46 = vld [vmem:[#allocation2 + $0x1720] ss:$72 sps:$4 sm:$0xff]  }
 0x2c4   :  { %v10785_v52 = vpop.f32.mrb[11].mxu1  ;;  %v11633_v47 = vld [vmem:[#allocation2 + $0x17b4] ss:$72 sps:$4 sm:$0xff]  }
 0x2c5   :  { %v13169_v54 = vadd.f32 %v10785_v52, %v10784_v49  ;;  %v11631_v49 = vld [vmem:[#allocation2 + $0x17b0] ss:$72 sps:$4 sm:$0xff]   ;;  %v11634_v52 = vld [vmem:[#allocation2 + $0x1840] ss:$72 sps:$4 sm:$0xff]  }
 0x2c6   :  { %2949 = vmatpush1.bf16.msra.mxu0 %v11571_v51  ;;  %v11636_v51 = vld [vmem:[#allocation2 + $0x1844] ss:$72 sps:$4 sm:$0xff]  }
 0x2c7   :  { %2950 = vmatprep.subr.bf16.mxu0 %v11576_v53  ;;  %v11639_v53 = vld [vmem:[#allocation2 + $0x18d4] ss:$72 sps:$4 sm:$0xff]  }
 0x2ca   :  { %2951 = vmatpush1.bf16.msra.mxu0 %v11574_v55  ;;  %v11637_v55 = vld [vmem:[#allocation2 + $0x18d0] ss:$72 sps:$4 sm:$0xff]  }
 0x2cb   :  { %2952 = vmatprep.subr.bf16.mxu0 %v11579_v56  ;;  %v11642_v56 = vld [vmem:[#allocation2 + $0x1964] ss:$72 sps:$4 sm:$0xff]  }
 0x2ce   :  { %2953 = vmatpush1.bf16.msra.mxu0 %v11577_v57  ;;  %v11640_v57 = vld [vmem:[#allocation2 + $0x1960] ss:$72 sps:$4 sm:$0xff]  }
 0x2cf   :  { %2954 = vmatprep.subr.bf16.mxu0 %v11582_v58  ;;  %v11645_v58 = vld [vmem:[#allocation2 + $0x19f4] ss:$72 sps:$4 sm:$0xff]  }
 0x2d2   :  { %2955 = vmatpush1.bf16.msra.mxu0 %v11580_v62  ;;  %v11651_v62 = vld [vmem:[#allocation2 + $0x1b14] ss:$72 sps:$4 sm:$0xff]  }
 0x2d3   :  { %2956 = vmatprep.subr.bf16.mxu0 %v11585_v63  ;;  %v11649_v63 = vld [vmem:[#allocation2 + $0x1b10] ss:$72 sps:$4 sm:$0xff]  }
 0x2d6   :  { %2957 = vmatpush1.bf16.msra.mxu0 %v11583_v3  ;;  %v11652_v3 = vld [vmem:[#allocation2 + $0x1ba0] ss:$72 sps:$4 sm:$0xff]  }
 0x2d7   :  { %2958 = vmatprep.subr.bf16.mxu0 %v11588_v5  ;;  %v11657_v5 = vld [vmem:[#allocation2 + $0x1c34] ss:$72 sps:$4 sm:$0xff]  }
 0x2da   :  { %2959 = vmatpush1.bf16.msra.mxu0 %v11586_v9  ;;  %v11658_v9 = vld [vmem:[#allocation2 + $0x1cc0] ss:$72 sps:$4 sm:$0xff]  }
 0x2db   :  { %2960 = vmatprep.subr.bf16.mxu0 %v11591_v7  ;;  %v11663_v7 = vld [vmem:[#allocation2 + $0x1d54] ss:$72 sps:$4 sm:$0xff]  }
 0x2de   :  { %2961 = vmatpush1.bf16.msra.mxu0 %v11589_v12  ;;  %v11664_v12 = vld [vmem:[#allocation2 + $0x1de0] ss:$72 sps:$4 sm:$0xff]  }
 0x2df   :  { %2962 = vmatprep.subr.bf16.mxu0 %v11594_v13  ;;  %v11669_v13 = vld [vmem:[#allocation2 + $0x1e74] ss:$72 sps:$4 sm:$0xff]  }
 0x2e2   :  { %2963 = vmatpush1.bf16.msra.mxu0 %v11592_v16 }
 0x2e3   :  { %2964 = vmatprep.subr.bf16.mxu0 %v11597_v20 }
 0x2e6   :  { %2965 = vmatpush1.bf16.msra.mxu0 %v11595_v22 }
 0x2e7   :  { %2966 = vmatprep.subr.bf16.mxu0 %v11600_v4  ;;  %v11672_v4 = vld [vmem:[#allocation2 + $0x1f04] ss:$72 sps:$4 sm:$0xff]  }
 0x2ea   :  { %2967 = vmatpush1.bf16.msra.mxu0 %v11598_v23 }
 0x2eb   :  { %2979 = vmatprep.subr.bf16.mxu0 %v11603_v24 }
 0x2ed   :  { %2969 = vmatmul.mubr.bf16.vlgmr.msra.gmra.mrb[8].mxu0 %v13174_v27 }
 0x2ee   :  { %2980 = vmatpush1.bf16.msra.mxu0 %v11601_v25  ;;  %3011 = vmatprep.mubr.bf16.mxu0 %v13180_v28 }
 0x2ef   :  { %2981 = vmatprep.subr.bf16.mxu0 %v11606_v26  ;;  %v11670_v26 = vld [vmem:[#allocation2 + $0x1f00] ss:$72 sps:$4 sm:$0xff]  }
 0x2f2   :  { %2982 = vmatpush1.bf16.msra.mxu0 %v11604_v50  ;;  %v13199_v50 = vld [vmem:[%s13392_s0 + $0x18] ss:$28 sps:$4 sm:$0xff]  }
 0x2f3   :  { %2983 = vmatprep.subr.bf16.mxu0 %v11609_v29  ;;  %v11685_v29 = vld [vmem:[#allocation6 + $0x170] sm:$0xff]  }
 0x2f4   :  { %10799 = vmatprep.subr.bf16.mxu1 %v11685_v29  ;;  %v11739_v29 = vld [vmem:[#allocation2 + $0x91c] ss:$72 sps:$4 sm:$0xff]  }
 0x2f6   :  { %2984 = vmatpush1.bf16.msra.mxu0 %v11607_v30  ;;  %v11686_v30 = vld [vmem:[#allocation6 + $0x130] sm:$0xff]  }
 0x2f7   :  { %2985 = vmatprep.subr.bf16.mxu0 %v11612_v31  ;;  %10800 = vmatpush3.bf16.msra.mxu1 %v11686_v30  ;;  %v11688_v31 = vld [vmem:[#allocation6 + $0x138] sm:$0xff]   ;;  %v11737_v30 = vld [vmem:[#allocation2 + $0x918] ss:$72 sps:$4 sm:$0xff]  }
 0x2fa   :  { %2986 = vmatpush1.bf16.msra.mxu0 %v11610_v32  ;;  %v2321_v32 = vld [vmem:[#allocation4 + $0x4] sm:$0x3] }
 0x2fb   :  { %2987 = vmatprep.subr.bf16.mxu0 %v11615_v34  ;;  %v2326_v34 = vrot.slane %v2321_v32, %v13141_v17 }
 0x2fe   :  { %2988 = vmatpush1.bf16.msra.mxu0 %v11613_v36  ;;  %v2330_v36 = vrot.slane %v2321_v32, %v13143_v18  ;;  %v11743_v32 = vld [vmem:[#allocation2 + $0xa38] ss:$72 sps:$4 sm:$0xff]  }
 0x2ff   :  { %2989 = vmatprep.subr.bf16.mxu0 %v11618_v38 }
 0x302   :  { %2990 = vmatpush1.bf16.msra.mxu0 %v11616_v39 }
 0x303   :  { %2991 = vmatprep.subr.bf16.mxu0 %v11621_v40 }
 0x306   :  { %2992 = vmatpush1.bf16.msra.mxu0 %v11619_v41 }
 0x307   :  { %2993 = vmatprep.subr.bf16.mxu0 %v11624_v42 }
 0x30a   :  { %2994 = vmatpush1.bf16.msra.mxu0 %v11622_v11 }
 0x30b   :  { %2995 = vmatprep.subr.bf16.mxu0 %v11627_v43 }
 0x30e   :  { %2996 = vmatpush1.bf16.msra.mxu0 %v11625_v44 }
 0x30f   :  { %2997 = vmatprep.subr.bf16.mxu0 %v11630_v45 }
 0x312   :  { %2998 = vmatpush1.bf16.msra.mxu0 %v11628_v46 }
 0x313   :  { %2999 = vmatprep.subr.bf16.mxu0 %v11633_v47 }
 0x316   :  { %3000 = vmatpush1.bf16.msra.mxu0 %v11631_v49 }
 0x317   :  { %3001 = vmatprep.subr.bf16.mxu0 %v11636_v51 }
 0x31a   :  { %3002 = vmatpush1.bf16.msra.mxu0 %v11634_v52 }
 0x31b   :  { %3003 = vmatprep.subr.bf16.mxu0 %v11639_v53  ;;  %v11689_v53 = vld [vmem:[#allocation2 + $0x18] ss:$72 sps:$4 sm:$0xff]  }
 0x31e   :  { %3004 = vmatpush1.bf16.msra.mxu0 %v11637_v55  ;;  %v11694_v55 = vld [vmem:[#allocation2 + $0xac] ss:$72 sps:$4 sm:$0xff]  }
 0x31f   :  { %3005 = vmatprep.subr.bf16.mxu0 %v11642_v56  ;;  %v11692_v56 = vld [vmem:[#allocation2 + $0xa8] ss:$72 sps:$4 sm:$0xff]  }
 0x322   :  { %3006 = vmatpush1.bf16.msra.mxu0 %v11640_v57  ;;  %v11697_v57 = vld [vmem:[#allocation2 + $0x13c] ss:$72 sps:$4 sm:$0xff]  }
 0x323   :  { %3007 = vmatprep.subr.bf16.mxu0 %v11645_v58  ;;  %v11695_v58 = vld [vmem:[#allocation2 + $0x138] ss:$72 sps:$4 sm:$0xff]  }
 0x326   :  { %3008 = vmatpush1.bf16.msra.mxu0 %v11643_v59  ;;  %v11700_v59 = vld [vmem:[#allocation2 + $0x1cc] ss:$72 sps:$4 sm:$0xff]  }
 0x327   :  { %3009 = vmatprep.subr.bf16.mxu0 %v11648_v60  ;;  %v11698_v60 = vld [vmem:[#allocation2 + $0x1c8] ss:$72 sps:$4 sm:$0xff]  }
 0x32a   :  { %3010 = vmatpush1.bf16.msra.mxu0 %v11646_v61  ;;  %v11703_v61 = vld [vmem:[#allocation2 + $0x25c] ss:$72 sps:$4 sm:$0xff]  }
 0x32b   :  { %3022 = vmatprep.subr.bf16.mxu0 %v11651_v62  ;;  %v11701_v62 = vld [vmem:[#allocation2 + $0x258] ss:$72 sps:$4 sm:$0xff]  }
 0x32d   :  { %3012 = vmatmul.mubr.bf16.vlgmr.msra.gmra.mrb[8].mxu0 %v13186_v2 }
 0x32e   :  { %3023 = vmatpush1.bf16.msra.mxu0 %v11649_v63  ;;  %3054 = vmatprep.mubr.bf16.mxu0 %v12980_v19  ;;  %v11706_v63 = vld [vmem:[#allocation2 + $0x2ec] ss:$72 sps:$4 sm:$0xff]  }
 0x32f   :  { %3024 = vmatprep.subr.bf16.mxu0 %v11654_v0  ;;  %v11704_v0 = vld [vmem:[#allocation2 + $0x2e8] ss:$72 sps:$4 sm:$0xff]  }
 0x332   :  { %3025 = vmatpush1.bf16.msra.mxu0 %v11652_v3  ;;  %v11709_v3 = vld [vmem:[#allocation2 + $0x37c] ss:$72 sps:$4 sm:$0xff]  }
 0x333   :  { %3026 = vmatprep.subr.bf16.mxu0 %v11657_v5  ;;  %v11712_v5 = vld [vmem:[#allocation2 + $0x40c] ss:$72 sps:$4 sm:$0xff]  }
 0x336   :  { %3027 = vmatpush1.bf16.msra.mxu0 %v11655_v6  ;;  %v11710_v6 = vld [vmem:[#allocation2 + $0x408] ss:$72 sps:$4 sm:$0xff]  }
 0x337   :  { %3028 = vmatprep.subr.bf16.mxu0 %v11660_v8  ;;  %v11715_v8 = vld [vmem:[#allocation2 + $0x49c] ss:$72 sps:$4 sm:$0xff]  }
 0x33a   :  { %3029 = vmatpush1.bf16.msra.mxu0 %v11658_v9  ;;  %v11713_v9 = vld [vmem:[#allocation2 + $0x498] ss:$72 sps:$4 sm:$0xff]  }
 0x33b   :  { %3030 = vmatprep.subr.bf16.mxu0 %v11663_v7  ;;  %v11718_v7 = vld [vmem:[#allocation2 + $0x52c] ss:$72 sps:$4 sm:$0xff]  }
 0x33e   :  { %3031 = vmatpush1.bf16.msra.mxu0 %v11661_v10  ;;  %v11716_v10 = vld [vmem:[#allocation2 + $0x528] ss:$72 sps:$4 sm:$0xff]  }
 0x33f   :  { %3032 = vmatprep.subr.bf16.mxu0 %v11666_v33  ;;  %v11721_v33 = vld [vmem:[#allocation2 + $0x5bc] ss:$72 sps:$4 sm:$0xff]  }
 0x340   :  { %v10759_v14 = vpop.f32.mrb[4].mxu0 }
 0x341   :  { %v10760_v15 = vpop.f32.mrb[5].mxu0 }
 0x342   :  { %v10761_v16 = vadd.f32 %v10760_v15, %v10759_v14  ;;  %3033 = vmatpush1.bf16.msra.mxu0 %v11664_v12  ;;  %v10762_v20 = vpop.f32.mrb[6].mxu0  ;;  %v11719_v12 = vld [vmem:[#allocation2 + $0x5b8] ss:$72 sps:$4 sm:$0xff]   ;;  %v11722_v14 = vld [vmem:[#allocation2 + $0x648] ss:$72 sps:$4 sm:$0xff]  }
 0x343   :  { %v10763_v22 = vpop.f32.mrb[7].mxu0  ;;  %3034 = vmatprep.subr.bf16.mxu0 %v11669_v13  ;;  %v11724_v13 = vld [vmem:[#allocation2 + $0x64c] ss:$72 sps:$4 sm:$0xff]   ;;  %v11727_v15 = vld [vmem:[#allocation2 + $0x6dc] ss:$72 sps:$4 sm:$0xff]  }
 0x344   :  { %v13191_v23 = vadd.f32 %v13167_v48, %v10761_v16  ;;  %v10764_v24 = vadd.f32 %v10763_v22, %v10762_v20  ;;  %v11687_v48 = vld [vmem:[#allocation6 + $0x178] sm:$0xff]   ;;  %v11725_v16 = vld [vmem:[#allocation2 + $0x6d8] ss:$72 sps:$4 sm:$0xff]   ;;  %v11733_v22 = vld [vmem:[#allocation2 + $0x7fc] ss:$72 sps:$4 sm:$0xff]  }
 0x345   :  { %10801 = vmatprep.subr.bf16.mxu1 %v11687_v48  ;;  %v11730_v20 = vld [vmem:[#allocation2 + $0x76c] ss:$72 sps:$4 sm:$0xff]  }
 0x346   :  { %v13194_v25 = vadd.f32 %v13169_v54, %v10764_v24  ;;  %3035 = vmatpush1.bf16.msra.mxu0 %v11667_v21  ;;  %10802 = vmatpush3.bf16.msra.mxu1 %v11688_v31  ;;  %v11691_v54 = vld [vmem:[#allocation2 + $0x1c] ss:$72 sps:$4 sm:$0xff]   ;;  %v11728_v21 = vld [vmem:[#allocation2 + $0x768] ss:$72 sps:$4 sm:$0xff]   ;;  %v11736_v24 = vld [vmem:[#allocation2 + $0x88c] ss:$72 sps:$4 sm:$0xff]  }
 0x347   :  { %3036 = vmatprep.subr.bf16.mxu0 %v11672_v4  ;;  %3926 = vmatprep.subr.bf16.mxu1 %v11691_v54  ;;  %v11731_v4 = vld [vmem:[#allocation2 + $0x7f8] ss:$72 sps:$4 sm:$0xff]   ;;  %v11742_v48 = vld [vmem:[#allocation2 + $0x9ac] ss:$72 sps:$4 sm:$0xff]   ;;  %v11740_v31 = vld [vmem:[#allocation2 + $0x9a8] ss:$72 sps:$4 sm:$0xff]  }
 0x348   :  { %v11745_v54 = vld [vmem:[#allocation2 + $0xa3c] ss:$72 sps:$4 sm:$0xff]  }
 0x34a   :  { %3037 = vmatpush1.bf16.msra.mxu0 %v11670_v26  ;;  %v11734_v26 = vld [vmem:[#allocation2 + $0x888] ss:$72 sps:$4 sm:$0xff]  }
 0x34d   :  { %3055 = vmatmul.mubr.bf16.vlgmr.msra.gmra.mrb[8].mxu0 %v13199_v50 }
 0x420   :  { %v3056_v38 = vpop.f32.mrb[8].mxu0 }
 0x421   :  { %v10982_v39 = vadd.f32 %v3056_v38, %v2326_v34  ;;  %v3058_v40 = vpop.f32.mrb[9].mxu0  ;;  %v11751_v38 = vld [vmem:[#allocation2 + $0xb5c] ss:$72 sps:$4 sm:$0xff]  }
 0x422   :  { %v10983_v41 = vadd.f32 %v3058_v40, %v2330_v36  ;;  %v3060_v42 = vpop.f32.mrb[10].mxu0  ;;  %v11754_v40 = vld [vmem:[#allocation2 + $0xbec] ss:$72 sps:$4 sm:$0xff]  }
 0x423   :  { %v10984_v11 = vadd.f32 %v3060_v42, %v2326_v34  ;;  %v3062_v43 = vpop.f32.mrb[11].mxu0  ;;  %v3065_v45 = vmax.f32 %v10982_v39, 0.0  ;;  %v11748_v34 = vld [vmem:[#allocation2 + $0xacc] ss:$72 sps:$4 sm:$0xff]   ;;  %v11749_v39 = vld [vmem:[#allocation2 + $0xb58] ss:$72 sps:$4 sm:$0xff]  }
 0x424   :  { %v10985_v44 = vadd.f32 %v3062_v43, %v2330_v36  ;;  %v3066_v47 = vmax.f32 %v10983_v41, 0.0  ;;  %v11746_v36 = vld [vmem:[#allocation2 + $0xac8] ss:$72 sps:$4 sm:$0xff]   ;;  %v11757_v41 = vld [vmem:[#allocation2 + $0xc7c] ss:$72 sps:$4 sm:$0xff]  }
 0x425   :  { %v3067_v46 = vmax.f32 %v10984_v11, 0.0  ;;  %v11760_v42 = vld [vmem:[#allocation2 + $0xd0c] ss:$72 sps:$4 sm:$0xff]   ;;  %v11758_v11 = vld [vmem:[#allocation2 + $0xd08] ss:$72 sps:$4 sm:$0xff]  }
 0x426   :  { %v3068_v49 = vmax.f32 %v10985_v44, 0.0  ;;  %v11763_v43 = vld [vmem:[#allocation2 + $0xd9c] ss:$72 sps:$4 sm:$0xff]   ;;  %v11761_v44 = vld [vmem:[#allocation2 + $0xd98] ss:$72 sps:$4 sm:$0xff]  }
 0x427   :  { %v3069_v51 = vpack.c.bf16 %v3067_v46, %v3065_v45  ;;  %v11766_v45 = vld [vmem:[#allocation2 + $0xe2c] ss:$72 sps:$4 sm:$0xff]  }
 0x428   :  { %v3070_v52 = vpack.c.bf16 %v3068_v49, %v3066_v47  ;;  %v11857_v46 = vld [vmem:[#allocation6 + $0x1c0] sm:$0xff]   ;;  %v11859_v49 = vld [vmem:[#allocation6 + $0x1c8] sm:$0xff]  }
 0x429   :  { %v11858_v47 = vld [vmem:[#allocation6 + $0x180] sm:$0xff]   ;;  %10809 = vmatprep.subr.bf16.mxu0 %v11857_v46  ;;  %v11835_v46 = vld [vmem:[#allocation2 + $0x1b1c] ss:$72 sps:$4 sm:$0xff]  }
 0x42a   :  { %3231 = vmatprep.mubr.bf16.mxu1 %v3070_v52  ;;  %v11769_v52 = vld [vmem:[#allocation2 + $0xebc] ss:$72 sps:$4 sm:$0xff]   ;;  %10810 = vmatpush3.bf16.msra.mxu0 %v11858_v47  ;;  %v11833_v47 = vld [vmem:[#allocation2 + $0x1b18] ss:$72 sps:$4 sm:$0xff]  }
 0x42b   :  { %3232 = vmatmul.mubr.bf16.vlgmr.msra.gmra.mrb[12].mxu1 %v3069_v51  ;;  %v11764_v51 = vld [vmem:[#allocation2 + $0xe28] ss:$72 sps:$4 sm:$0xff]   ;;  %10811 = vmatprep.subr.bf16.mxu0 %v11859_v49  ;;  %v11838_v49 = vld [vmem:[#allocation2 + $0x1bac] ss:$72 sps:$4 sm:$0xff]  }
 0x42c   :  { %3927 = vmatpush1.bf16.msra.mxu1 %v11689_v53  ;;  %3958 = vmatprep.mubr.bf16.mxu1 %v13152_v1  ;;  %v11707_v1 = vld [vmem:[#allocation2 + $0x378] ss:$72 sps:$4 sm:$0xff]  }
 0x42d   :  { %3928 = vmatprep.subr.bf16.mxu1 %v11694_v55  ;;  %v11860_v53 = vld [vmem:[#allocation6 + $0x188] sm:$0xff]   ;;  %v11861_v55 = vld [vmem:[#allocation6 + $0x1d0] sm:$0xff]  }
 0x42e   :  { %10812 = vmatpush3.bf16.msra.mxu0 %v11860_v53  ;;  %v11839_v53 = vld [vmem:[#allocation2 + $0x1c38] ss:$72 sps:$4 sm:$0xff]  }
 0x42f   :  { %10813 = vmatprep.subr.bf16.mxu0 %v11861_v55  ;;  %v11844_v55 = vld [vmem:[#allocation2 + $0x1ccc] ss:$72 sps:$4 sm:$0xff]  }
 0x430   :  { %3929 = vmatpush1.bf16.msra.mxu1 %v11692_v56  ;;  %v11767_v56 = vld [vmem:[#allocation2 + $0xeb8] ss:$72 sps:$4 sm:$0xff]  }
 0x431   :  { %3930 = vmatprep.subr.bf16.mxu1 %v11697_v57  ;;  %v11772_v57 = vld [vmem:[#allocation2 + $0xf4c] ss:$72 sps:$4 sm:$0xff]  }
 0x434   :  { %3931 = vmatpush1.bf16.msra.mxu1 %v11695_v58  ;;  %v11862_v58 = vld [vmem:[#allocation6 + $0x190] sm:$0xff]  }
 0x435   :  { %3932 = vmatprep.subr.bf16.mxu1 %v11700_v59  ;;  %v11863_v59 = vld [vmem:[#allocation6 + $0x1d8] sm:$0xff]   ;;  %10814 = vmatpush3.bf16.msra.mxu0 %v11862_v58  ;;  %v11845_v58 = vld [vmem:[#allocation2 + $0x1d58] ss:$72 sps:$4 sm:$0xff]  }
 0x436   :  { %10815 = vmatprep.subr.bf16.mxu0 %v11863_v59  ;;  %v11850_v59 = vld [vmem:[#allocation2 + $0x1dec] ss:$72 sps:$4 sm:$0xff]  }
 0x438   :  { %3933 = vmatpush1.bf16.msra.mxu1 %v11698_v60  ;;  %v11770_v60 = vld [vmem:[#allocation2 + $0xf48] ss:$72 sps:$4 sm:$0xff]  }
 0x439   :  { %3934 = vmatprep.subr.bf16.mxu1 %v11703_v61  ;;  %v11775_v61 = vld [vmem:[#allocation2 + $0xfdc] ss:$72 sps:$4 sm:$0xff]  }
 0x43c   :  { %3935 = vmatpush1.bf16.msra.mxu1 %v11701_v62  ;;  %v11864_v62 = vld [vmem:[#allocation6 + $0x198] sm:$0xff]  }
 0x43d   :  { %3936 = vmatprep.subr.bf16.mxu1 %v11706_v63  ;;  %v11865_v63 = vld [vmem:[#allocation6 + $0x1e0] sm:$0xff]   ;;  %10816 = vmatpush3.bf16.msra.mxu0 %v11864_v62 }
 0x43e   :  { %10817 = vmatprep.subr.bf16.mxu0 %v11865_v63 }
 0x440   :  { %3937 = vmatpush1.bf16.msra.mxu1 %v11704_v0  ;;  %v11773_v0 = vld [vmem:[#allocation2 + $0xfd8] ss:$72 sps:$4 sm:$0xff]  }
 0x441   :  { %3938 = vmatprep.subr.bf16.mxu1 %v11709_v3  ;;  %v11778_v3 = vld [vmem:[#allocation2 + $0x106c] ss:$72 sps:$4 sm:$0xff]  }
 0x444   :  { %3939 = vmatpush1.bf16.msra.mxu1 %v11707_v1  ;;  %v11866_v1 = vld [vmem:[#allocation6 + $0x1a0] sm:$0xff]  }
 0x445   :  { %3940 = vmatprep.subr.bf16.mxu1 %v11712_v5  ;;  %v11867_v5 = vld [vmem:[#allocation6 + $0x1e8] sm:$0xff]   ;;  %10818 = vmatpush3.bf16.msra.mxu0 %v11866_v1 }
 0x446   :  { %10819 = vmatprep.subr.bf16.mxu0 %v11867_v5  ;;  %v11856_v5 = vld [vmem:[#allocation2 + $0x1f0c] ss:$72 sps:$4 sm:$0xff]  }
 0x448   :  { %3941 = vmatpush1.bf16.msra.mxu1 %v11710_v6  ;;  %v11776_v6 = vld [vmem:[#allocation2 + $0x1068] ss:$72 sps:$4 sm:$0xff]  }
 0x449   :  { %3942 = vmatprep.subr.bf16.mxu1 %v11715_v8  ;;  %v11781_v8 = vld [vmem:[#allocation2 + $0x10fc] ss:$72 sps:$4 sm:$0xff]  }
 0x44c   :  { %3943 = vmatpush1.bf16.msra.mxu1 %v11713_v9  ;;  %v11868_v9 = vld [vmem:[#allocation6 + $0x1a8] sm:$0xff]  }
 0x44d   :  { %3944 = vmatprep.subr.bf16.mxu1 %v11718_v7  ;;  %v11779_v7 = vld [vmem:[#allocation2 + $0x10f8] ss:$72 sps:$4 sm:$0xff]   ;;  %10820 = vmatpush3.bf16.msra.mxu0 %v11868_v9 }
 0x450   :  { %3945 = vmatpush1.bf16.msra.mxu1 %v11716_v10  ;;  %v11784_v10 = vld [vmem:[#allocation2 + $0x118c] ss:$72 sps:$4 sm:$0xff]  }
 0x451   :  { %3946 = vmatprep.subr.bf16.mxu1 %v11721_v33  ;;  %v11782_v33 = vld [vmem:[#allocation2 + $0x1188] ss:$72 sps:$4 sm:$0xff]  }
 0x454   :  { %3947 = vmatpush1.bf16.msra.mxu1 %v11719_v12  ;;  %v11787_v12 = vld [vmem:[#allocation2 + $0x121c] ss:$72 sps:$4 sm:$0xff]  }
 0x455   :  { %3948 = vmatprep.subr.bf16.mxu1 %v11724_v13  ;;  %v11785_v13 = vld [vmem:[#allocation2 + $0x1218] ss:$72 sps:$4 sm:$0xff]  }
 0x458   :  { %3949 = vmatpush1.bf16.msra.mxu1 %v11722_v14  ;;  %v11790_v14 = vld [vmem:[#allocation2 + $0x12ac] ss:$72 sps:$4 sm:$0xff]  }
 0x459   :  { %3950 = vmatprep.subr.bf16.mxu1 %v11727_v15  ;;  %v11788_v15 = vld [vmem:[#allocation2 + $0x12a8] ss:$72 sps:$4 sm:$0xff]  }
 0x45c   :  { %3951 = vmatpush1.bf16.msra.mxu1 %v11725_v16  ;;  %v11793_v16 = vld [vmem:[#allocation2 + $0x133c] ss:$72 sps:$4 sm:$0xff]  }
 0x45d   :  { %3952 = vmatprep.subr.bf16.mxu1 %v11730_v20  ;;  %v11791_v20 = vld [vmem:[#allocation2 + $0x1338] ss:$72 sps:$4 sm:$0xff]  }
 0x460   :  { %3953 = vmatpush1.bf16.msra.mxu1 %v11728_v21  ;;  %v11796_v21 = vld [vmem:[#allocation2 + $0x13cc] ss:$72 sps:$4 sm:$0xff]  }
 0x461   :  { %3954 = vmatprep.subr.bf16.mxu1 %v11733_v22  ;;  %v11794_v22 = vld [vmem:[#allocation2 + $0x13c8] ss:$72 sps:$4 sm:$0xff]  }
 0x464   :  { %3955 = vmatpush1.bf16.msra.mxu1 %v11731_v4  ;;  %v11799_v4 = vld [vmem:[#allocation2 + $0x145c] ss:$72 sps:$4 sm:$0xff]  }
 0x465   :  { %3956 = vmatprep.subr.bf16.mxu1 %v11736_v24  ;;  %v11797_v24 = vld [vmem:[#allocation2 + $0x1458] ss:$72 sps:$4 sm:$0xff]  }
 0x468   :  { %3957 = vmatpush1.bf16.msra.mxu1 %v11734_v26  ;;  %v11802_v26 = vld [vmem:[#allocation2 + $0x14ec] ss:$72 sps:$4 sm:$0xff]  }
 0x469   :  { %3969 = vmatprep.subr.bf16.mxu1 %v11739_v29  ;;  %v11805_v29 = vld [vmem:[#allocation2 + $0x157c] ss:$72 sps:$4 sm:$0xff]  }
 0x46b   :  { %3959 = vmatmul.mubr.bf16.vlgmr.msra.gmra.mrb[16].mxu1 %v13158_v35  ;;  %v11752_v35 = vld [vmem:[#allocation2 + $0xbe8] ss:$72 sps:$4 sm:$0xff]  }
 0x46c   :  { %3970 = vmatpush1.bf16.msra.mxu1 %v11737_v30  ;;  %4001 = vmatprep.mubr.bf16.mxu1 %v13164_v37  ;;  %v11755_v37 = vld [vmem:[#allocation2 + $0xc78] ss:$72 sps:$4 sm:$0xff]   ;;  %v11808_v30 = vld [vmem:[#allocation2 + $0x160c] ss:$72 sps:$4 sm:$0xff]  }
 0x46d   :  { %3971 = vmatprep.subr.bf16.mxu1 %v11742_v48  ;;  %v11806_v48 = vld [vmem:[#allocation2 + $0x1608] ss:$72 sps:$4 sm:$0xff]  }
 0x470   :  { %3972 = vmatpush1.bf16.msra.mxu1 %v11740_v31  ;;  %v11811_v31 = vld [vmem:[#allocation2 + $0x169c] ss:$72 sps:$4 sm:$0xff]  }
 0x471   :  { %3973 = vmatprep.subr.bf16.mxu1 %v11745_v54  ;;  %v11809_v54 = vld [vmem:[#allocation2 + $0x1698] ss:$72 sps:$4 sm:$0xff]  }
 0x474   :  { %3974 = vmatpush1.bf16.msra.mxu1 %v11743_v32  ;;  %v11814_v32 = vld [vmem:[#allocation2 + $0x172c] ss:$72 sps:$4 sm:$0xff]  }
 0x475   :  { %3975 = vmatprep.subr.bf16.mxu1 %v11748_v34  ;;  %v11812_v34 = vld [vmem:[#allocation2 + $0x1728] ss:$72 sps:$4 sm:$0xff]  }
 0x478   :  { %3976 = vmatpush1.bf16.msra.mxu1 %v11746_v36  ;;  %v11817_v36 = vld [vmem:[#allocation2 + $0x17bc] ss:$72 sps:$4 sm:$0xff]  }
 0x479   :  { %3977 = vmatprep.subr.bf16.mxu1 %v11751_v38  ;;  %v11815_v38 = vld [vmem:[#allocation2 + $0x17b8] ss:$72 sps:$4 sm:$0xff]  }
 0x47c   :  { %3978 = vmatpush1.bf16.msra.mxu1 %v11749_v39  ;;  %v11820_v39 = vld [vmem:[#allocation2 + $0x184c] ss:$72 sps:$4 sm:$0xff]  }
 0x47d   :  { %3979 = vmatprep.subr.bf16.mxu1 %v11754_v40  ;;  %v11818_v40 = vld [vmem:[#allocation2 + $0x1848] ss:$72 sps:$4 sm:$0xff]  }
 0x480   :  { %3980 = vmatpush1.bf16.msra.mxu1 %v11752_v35  ;;  %v11823_v35 = vld [vmem:[#allocation2 + $0x18dc] ss:$72 sps:$4 sm:$0xff]  }
 0x481   :  { %3981 = vmatprep.subr.bf16.mxu1 %v11757_v41  ;;  %v11821_v41 = vld [vmem:[#allocation2 + $0x18d8] ss:$72 sps:$4 sm:$0xff]  }
 0x484   :  { %3982 = vmatpush1.bf16.msra.mxu1 %v11755_v37  ;;  %v11826_v37 = vld [vmem:[#allocation2 + $0x196c] ss:$72 sps:$4 sm:$0xff]  }
 0x485   :  { %3983 = vmatprep.subr.bf16.mxu1 %v11760_v42  ;;  %v11824_v42 = vld [vmem:[#allocation2 + $0x1968] ss:$72 sps:$4 sm:$0xff]  }
 0x488   :  { %3984 = vmatpush1.bf16.msra.mxu1 %v11758_v11  ;;  %v11829_v11 = vld [vmem:[#allocation2 + $0x19fc] ss:$72 sps:$4 sm:$0xff]  }
 0x489   :  { %3985 = vmatprep.subr.bf16.mxu1 %v11763_v43  ;;  %v11827_v43 = vld [vmem:[#allocation2 + $0x19f8] ss:$72 sps:$4 sm:$0xff]  }
 0x48c   :  { %3986 = vmatpush1.bf16.msra.mxu1 %v11761_v44  ;;  %v11832_v44 = vld [vmem:[#allocation2 + $0x1a8c] ss:$72 sps:$4 sm:$0xff]  }
 0x48d   :  { %3987 = vmatprep.subr.bf16.mxu1 %v11766_v45  ;;  %v11830_v45 = vld [vmem:[#allocation2 + $0x1a88] ss:$72 sps:$4 sm:$0xff]  }
 0x490   :  { %3988 = vmatpush1.bf16.msra.mxu1 %v11764_v51  ;;  %v11836_v51 = vld [vmem:[#allocation2 + $0x1ba8] ss:$72 sps:$4 sm:$0xff]  }
 0x491   :  { %3989 = vmatprep.subr.bf16.mxu1 %v11769_v52  ;;  %v11841_v52 = vld [vmem:[#allocation2 + $0x1c3c] ss:$72 sps:$4 sm:$0xff]  }
 0x494   :  { %3990 = vmatpush1.bf16.msra.mxu1 %v11767_v56  ;;  %v11842_v56 = vld [vmem:[#allocation2 + $0x1cc8] ss:$72 sps:$4 sm:$0xff]  }
 0x495   :  { %3991 = vmatprep.subr.bf16.mxu1 %v11772_v57  ;;  %v11847_v57 = vld [vmem:[#allocation2 + $0x1d5c] ss:$72 sps:$4 sm:$0xff]  }
 0x498   :  { %3992 = vmatpush1.bf16.msra.mxu1 %v11770_v60  ;;  %v11853_v60 = vld [vmem:[#allocation2 + $0x1e7c] ss:$72 sps:$4 sm:$0xff]  }
 0x499   :  { %3993 = vmatprep.subr.bf16.mxu1 %v11775_v61 }
 0x49c   :  { %3994 = vmatpush1.bf16.msra.mxu1 %v11773_v0 }
 0x49d   :  { %3995 = vmatprep.subr.bf16.mxu1 %v11778_v3  ;;  %v11851_v3 = vld [vmem:[#allocation2 + $0x1e78] ss:$72 sps:$4 sm:$0xff]  }
 0x4a0   :  { %3996 = vmatpush1.bf16.msra.mxu1 %v11776_v6 }
 0x4a1   :  { %3997 = vmatprep.subr.bf16.mxu1 %v11781_v8 }
 0x4a4   :  { %3998 = vmatpush1.bf16.msra.mxu1 %v11779_v7  ;;  %v11854_v7 = vld [vmem:[#allocation2 + $0x1f08] ss:$72 sps:$4 sm:$0xff]  }
 0x4a5   :  { %3999 = vmatprep.subr.bf16.mxu1 %v11784_v10  ;;  %v11869_v10 = vld [vmem:[#allocation6 + $0x1f0] sm:$0xff]  }
 0x4a6   :  { %10821 = vmatprep.subr.bf16.mxu0 %v11869_v10  ;;  %v13235_v10 = vld [vmem:[%s13392_s0 + $0xc] ss:$28 sps:$4 sm:$0xff]  }
 0x4a8   :  { %4000 = vmatpush1.bf16.msra.mxu1 %v11782_v33  ;;  %v11870_v33 = vld [vmem:[#allocation6 + $0x1b0] sm:$0xff]  }
 0x4a9   :  { %4012 = vmatprep.subr.bf16.mxu1 %v11787_v12  ;;  %10822 = vmatpush3.bf16.msra.mxu0 %v11870_v33  ;;  %v11871_v12 = vld [vmem:[#allocation6 + $0x1f8] sm:$0xff]  }
 0x4aa   :  { %10823 = vmatprep.subr.bf16.mxu0 %v11871_v12  ;;  %v11929_v33 = vld [vmem:[#allocation2 + $0xa44] ss:$72 sps:$4 sm:$0xff]   ;;  %v11927_v12 = vld [vmem:[#allocation2 + $0xa40] ss:$72 sps:$4 sm:$0xff]  }
 0x4ab   :  { %4002 = vmatmul.mubr.bf16.vlgmr.msra.gmra.mrb[16].mxu1 %v13174_v27  ;;  %v11800_v27 = vld [vmem:[#allocation2 + $0x14e8] ss:$72 sps:$4 sm:$0xff]  }
 0x4ac   :  { %4013 = vmatpush1.bf16.msra.mxu1 %v11785_v13  ;;  %4044 = vmatprep.mubr.bf16.mxu1 %v13180_v28  ;;  %v11803_v28 = vld [vmem:[#allocation2 + $0x1578] ss:$72 sps:$4 sm:$0xff]   ;;  %v11872_v13 = vld [vmem:[#allocation6 + $0x1b8] sm:$0xff]  }
 0x4ad   :  { %4014 = vmatprep.subr.bf16.mxu1 %v11790_v14  ;;  %10824 = vmatpush3.bf16.msra.mxu0 %v11872_v13  ;;  %v3354_v14 = vld [vmem:[#allocation4 + $0x6] sm:$0x3]  ;;  %v11932_v13 = vld [vmem:[#allocation2 + $0xad4] ss:$72 sps:$4 sm:$0xff]  }
 0x4b0   :  { %4015 = vmatpush1.bf16.msra.mxu1 %v11788_v15  ;;  %v3363_v15 = vrot.slane %v3354_v14, %v13143_v18 }
 0x4b1   :  { %4016 = vmatprep.subr.bf16.mxu1 %v11793_v16 }
 0x4b4   :  { %4017 = vmatpush1.bf16.msra.mxu1 %v11791_v20 }
 0x4b5   :  { %4018 = vmatprep.subr.bf16.mxu1 %v11796_v21 }
 0x4b8   :  { %4019 = vmatpush1.bf16.msra.mxu1 %v11794_v22 }
 0x4b9   :  { %4020 = vmatprep.subr.bf16.mxu1 %v11799_v4 }
 0x4bc   :  { %4021 = vmatpush1.bf16.msra.mxu1 %v11797_v24 }
 0x4bd   :  { %4022 = vmatprep.subr.bf16.mxu1 %v11802_v26 }
 0x4c0   :  { %4023 = vmatpush1.bf16.msra.mxu1 %v11800_v27 }
 0x4c1   :  { %4024 = vmatprep.subr.bf16.mxu1 %v11805_v29 }
 0x4c4   :  { %4025 = vmatpush1.bf16.msra.mxu1 %v11803_v28 }
 0x4c5   :  { %4026 = vmatprep.subr.bf16.mxu1 %v11808_v30 }
 0x4c8   :  { %4027 = vmatpush1.bf16.msra.mxu1 %v11806_v48 }
 0x4c9   :  { %4028 = vmatprep.subr.bf16.mxu1 %v11811_v31 }
 0x4cc   :  { %4029 = vmatpush1.bf16.msra.mxu1 %v11809_v54  ;;  %v11873_v54 = vld [vmem:[#allocation2 + $0x20] ss:$72 sps:$4 sm:$0xff]  }
 0x4cd   :  { %4030 = vmatprep.subr.bf16.mxu1 %v11814_v32  ;;  %v11878_v32 = vld [vmem:[#allocation2 + $0xb4] ss:$72 sps:$4 sm:$0xff]  }
 0x4d0   :  { %4031 = vmatpush1.bf16.msra.mxu1 %v11812_v34  ;;  %v11876_v34 = vld [vmem:[#allocation2 + $0xb0] ss:$72 sps:$4 sm:$0xff]  }
 0x4d1   :  { %4032 = vmatprep.subr.bf16.mxu1 %v11817_v36  ;;  %v13223_v36 = vld [vmem:[%s13392_s0 + $0x4] ss:$28 sps:$4 sm:$0xff]  }
 0x4d4   :  { %4033 = vmatpush1.bf16.msra.mxu1 %v11815_v38  ;;  %v11881_v38 = vld [vmem:[#allocation2 + $0x144] ss:$72 sps:$4 sm:$0xff]  }
 0x4d5   :  { %4034 = vmatprep.subr.bf16.mxu1 %v11820_v39  ;;  %v11879_v39 = vld [vmem:[#allocation2 + $0x140] ss:$72 sps:$4 sm:$0xff]  }
 0x4d8   :  { %4035 = vmatpush1.bf16.msra.mxu1 %v11818_v40  ;;  %v11884_v40 = vld [vmem:[#allocation2 + $0x1d4] ss:$72 sps:$4 sm:$0xff]  }
 0x4d9   :  { %4036 = vmatprep.subr.bf16.mxu1 %v11823_v35  ;;  %v11882_v35 = vld [vmem:[#allocation2 + $0x1d0] ss:$72 sps:$4 sm:$0xff]  }
 0x4dc   :  { %4037 = vmatpush1.bf16.msra.mxu1 %v11821_v41  ;;  %v11887_v41 = vld [vmem:[#allocation2 + $0x264] ss:$72 sps:$4 sm:$0xff]  }
 0x4dd   :  { %4038 = vmatprep.subr.bf16.mxu1 %v11826_v37  ;;  %v11885_v37 = vld [vmem:[#allocation2 + $0x260] ss:$72 sps:$4 sm:$0xff]  }
 0x4e0   :  { %4039 = vmatpush1.bf16.msra.mxu1 %v11824_v42  ;;  %v11890_v42 = vld [vmem:[#allocation2 + $0x2f4] ss:$72 sps:$4 sm:$0xff]  }
 0x4e1   :  { %4040 = vmatprep.subr.bf16.mxu1 %v11829_v11  ;;  %v11888_v11 = vld [vmem:[#allocation2 + $0x2f0] ss:$72 sps:$4 sm:$0xff]  }
 0x4e4   :  { %4041 = vmatpush1.bf16.msra.mxu1 %v11827_v43  ;;  %v11893_v43 = vld [vmem:[#allocation2 + $0x384] ss:$72 sps:$4 sm:$0xff]  }
 0x4e5   :  { %4042 = vmatprep.subr.bf16.mxu1 %v11832_v44  ;;  %v11891_v44 = vld [vmem:[#allocation2 + $0x380] ss:$72 sps:$4 sm:$0xff]  }
 0x4e8   :  { %4043 = vmatpush1.bf16.msra.mxu1 %v11830_v45  ;;  %v11896_v45 = vld [vmem:[#allocation2 + $0x414] ss:$72 sps:$4 sm:$0xff]  }
 0x4e9   :  { %4055 = vmatprep.subr.bf16.mxu1 %v11835_v46  ;;  %v11894_v46 = vld [vmem:[#allocation2 + $0x410] ss:$72 sps:$4 sm:$0xff]  }
 0x4eb   :  { %4045 = vmatmul.mubr.bf16.vlgmr.msra.gmra.mrb[16].mxu1 %v13186_v2  ;;  %v11848_v2 = vld [vmem:[#allocation2 + $0x1de8] ss:$72 sps:$4 sm:$0xff]  }
 0x4ec   :  { %4056 = vmatpush1.bf16.msra.mxu1 %v11833_v47  ;;  %4087 = vmatprep.mubr.bf16.mxu1 %v12980_v19  ;;  %v11899_v47 = vld [vmem:[#allocation2 + $0x4a4] ss:$72 sps:$4 sm:$0xff]  }
 0x4ed   :  { %4057 = vmatprep.subr.bf16.mxu1 %v11838_v49  ;;  %v11897_v49 = vld [vmem:[#allocation2 + $0x4a0] ss:$72 sps:$4 sm:$0xff]  }
 0x4f0   :  { %4058 = vmatpush1.bf16.msra.mxu1 %v11836_v51  ;;  %v11902_v51 = vld [vmem:[#allocation2 + $0x534] ss:$72 sps:$4 sm:$0xff]  }
 0x4f1   :  { %4059 = vmatprep.subr.bf16.mxu1 %v11841_v52  ;;  %v11900_v52 = vld [vmem:[#allocation2 + $0x530] ss:$72 sps:$4 sm:$0xff]  }
 0x4f4   :  { %4060 = vmatpush1.bf16.msra.mxu1 %v11839_v53  ;;  %v11905_v53 = vld [vmem:[#allocation2 + $0x5c4] ss:$72 sps:$4 sm:$0xff]  }
 0x4f5   :  { %4061 = vmatprep.subr.bf16.mxu1 %v11844_v55  ;;  %v11903_v55 = vld [vmem:[#allocation2 + $0x5c0] ss:$72 sps:$4 sm:$0xff]  }
 0x4f8   :  { %4062 = vmatpush1.bf16.msra.mxu1 %v11842_v56  ;;  %v11908_v56 = vld [vmem:[#allocation2 + $0x654] ss:$72 sps:$4 sm:$0xff]  }
 0x4f9   :  { %4063 = vmatprep.subr.bf16.mxu1 %v11847_v57  ;;  %v11906_v57 = vld [vmem:[#allocation2 + $0x650] ss:$72 sps:$4 sm:$0xff]  }
 0x4fc   :  { %4064 = vmatpush1.bf16.msra.mxu1 %v11845_v58  ;;  %v11911_v58 = vld [vmem:[#allocation2 + $0x6e4] ss:$72 sps:$4 sm:$0xff]  }
 0x4fd   :  { %4065 = vmatprep.subr.bf16.mxu1 %v11850_v59  ;;  %v11909_v59 = vld [vmem:[#allocation2 + $0x6e0] ss:$72 sps:$4 sm:$0xff]  }
 0x4fe   :  { %v10803_v61 = vpop.f32.mrb[12].mxu1 }
 0x4ff   :  { %v10804_v62 = vpop.f32.mrb[13].mxu1 }
 0x500   :  { %v10805_v63 = vadd.f32 %v10804_v62, %v10803_v61  ;;  %4066 = vmatpush1.bf16.msra.mxu1 %v11848_v2  ;;  %v10806_v0 = vpop.f32.mrb[14].mxu1  ;;  %v11914_v2 = vld [vmem:[#allocation2 + $0x774] ss:$72 sps:$4 sm:$0xff]   ;;  %v11917_v61 = vld [vmem:[#allocation2 + $0x804] ss:$72 sps:$4 sm:$0xff]  }
 0x501   :  { %v10807_v1 = vpop.f32.mrb[15].mxu1  ;;  %4067 = vmatprep.subr.bf16.mxu1 %v11853_v60  ;;  %v11912_v60 = vld [vmem:[#allocation2 + $0x770] ss:$72 sps:$4 sm:$0xff]   ;;  %v11915_v62 = vld [vmem:[#allocation2 + $0x800] ss:$72 sps:$4 sm:$0xff]  }
 0x502   :  { %v13212_v6 = vadd.f32 %v10805_v63, %v13191_v23  ;;  %v10808_v8 = vadd.f32 %v10807_v1, %v10806_v0  ;;  %v11875_v23 = vld [vmem:[#allocation2 + $0x24] ss:$72 sps:$4 sm:$0xff]   ;;  %v11920_v63 = vld [vmem:[#allocation2 + $0x894] ss:$72 sps:$4 sm:$0xff]   ;;  %v11918_v0 = vld [vmem:[#allocation2 + $0x890] ss:$72 sps:$4 sm:$0xff]  }
 0x503   :  { %4959 = vmatprep.subr.bf16.mxu0 %v11875_v23  ;;  %v11921_v1 = vld [vmem:[#allocation2 + $0x920] ss:$72 sps:$4 sm:$0xff]   ;;  %v11930_v23 = vld [vmem:[#allocation2 + $0xad0] ss:$72 sps:$4 sm:$0xff]  }
 0x504   :  { %v13215_v9 = vadd.f32 %v10808_v8, %v13194_v25  ;;  %4068 = vmatpush1.bf16.msra.mxu1 %v11851_v3  ;;  %v3359_v25 = vrot.slane %v3354_v14, %v13141_v17  ;;  %v11923_v3 = vld [vmem:[#allocation2 + $0x924] ss:$72 sps:$4 sm:$0xff]   ;;  %v13229_v8 = vld [vmem:[%s13392_s0] ss:$28 sps:$4 sm:$0xff]  }
 0x505   :  { %4069 = vmatprep.subr.bf16.mxu1 %v11856_v5  ;;  %v11926_v5 = vld [vmem:[#allocation2 + $0x9b4] ss:$72 sps:$4 sm:$0xff]   ;;  %v11935_v14 = vld [vmem:[#allocation2 + $0xb64] ss:$72 sps:$4 sm:$0xff]  }
 0x508   :  { %4070 = vmatpush1.bf16.msra.mxu1 %v11854_v7  ;;  %v11924_v7 = vld [vmem:[#allocation2 + $0x9b0] ss:$72 sps:$4 sm:$0xff]  }
 0x50b   :  { %4088 = vmatmul.mubr.bf16.vlgmr.msra.gmra.mrb[16].mxu1 %v13199_v50 }
 0x5de   :  { %v4089_v16 = vpop.f32.mrb[16].mxu1 }
 0x5df   :  { %v10986_v20 = vadd.f32 %v4089_v16, %v3359_v25  ;;  %v4091_v21 = vpop.f32.mrb[17].mxu1  ;;  %v11936_v16 = vld [vmem:[#allocation2 + $0xbf0] ss:$72 sps:$4 sm:$0xff]  }
 0x5e0   :  { %v10987_v22 = vadd.f32 %v4091_v21, %v3363_v15  ;;  %v4093_v50 = vpop.f32.mrb[18].mxu1  ;;  %v11939_v21 = vld [vmem:[#allocation2 + $0xc80] ss:$72 sps:$4 sm:$0xff]  }
 0x5e1   :  { %v10988_v4 = vadd.f32 %v4093_v50, %v3359_v25  ;;  %v4095_v24 = vpop.f32.mrb[19].mxu1  ;;  %v4098_v27 = vmax.f32 %v10986_v20, 0.0  ;;  %v11933_v25 = vld [vmem:[#allocation2 + $0xb60] ss:$72 sps:$4 sm:$0xff]   ;;  %v11941_v20 = vld [vmem:[#allocation2 + $0xc84] ss:$72 sps:$4 sm:$0xff]  }
 0x5e2   :  { %v10989_v26 = vadd.f32 %v4095_v24, %v3363_v15  ;;  %v4099_v28 = vmax.f32 %v10987_v22, 0.0  ;;  %v11938_v15 = vld [vmem:[#allocation2 + $0xbf4] ss:$72 sps:$4 sm:$0xff]   ;;  %v11942_v50 = vld [vmem:[#allocation2 + $0xd10] ss:$72 sps:$4 sm:$0xff]  }
 0x5e3   :  { %v4100_v29 = vmax.f32 %v10988_v4, 0.0  ;;  %v11944_v22 = vld [vmem:[#allocation2 + $0xd14] ss:$72 sps:$4 sm:$0xff]   ;;  %v11947_v4 = vld [vmem:[#allocation2 + $0xda4] ss:$72 sps:$4 sm:$0xff]  }
 0x5e4   :  { %v4101_v30 = vmax.f32 %v10989_v26, 0.0  ;;  %v11945_v24 = vld [vmem:[#allocation2 + $0xda0] ss:$72 sps:$4 sm:$0xff]   ;;  %v11950_v26 = vld [vmem:[#allocation2 + $0xe34] ss:$72 sps:$4 sm:$0xff]  }
 0x5e5   :  { %v4102_v48 = vpack.c.bf16 %v4100_v29, %v4098_v27  ;;  %v12041_v27 = vld [vmem:[#allocation6 + $0x240] sm:$0xff]  }
 0x5e6   :  { %v4103_v31 = vpack.c.bf16 %v4101_v30, %v4099_v28  ;;  %v12042_v29 = vld [vmem:[#allocation6 + $0x200] sm:$0xff]   ;;  %v12043_v28 = vld [vmem:[#allocation6 + $0x248] sm:$0xff]   ;;  %10831 = vmatprep.subr.bf16.mxu1 %v12041_v27 }
 0x5e7   :  { %v11948_v30 = vld [vmem:[#allocation2 + $0xe30] ss:$72 sps:$4 sm:$0xff]   ;;  %10832 = vmatpush3.bf16.msra.mxu1 %v12042_v29  ;;  %v12011_v27 = vld [vmem:[#allocation2 + $0x1a00] ss:$72 sps:$4 sm:$0xff]   ;;  %v12016_v29 = vld [vmem:[#allocation2 + $0x1a94] ss:$72 sps:$4 sm:$0xff]  }
 0x5e8   :  { %4264 = vmatprep.mubr.bf16.mxu0 %v4103_v31  ;;  %v12044_v31 = vld [vmem:[#allocation6 + $0x208] sm:$0xff]   ;;  %10833 = vmatprep.subr.bf16.mxu1 %v12043_v28 }
 0x5e9   :  { %4265 = vmatmul.mubr.bf16.vlgmr.msra.gmra.mrb[12].mxu0 %v4102_v48  ;;  %v11953_v48 = vld [vmem:[#allocation2 + $0xec4] ss:$72 sps:$4 sm:$0xff]   ;;  %v12014_v28 = vld [vmem:[#allocation2 + $0x1a90] ss:$72 sps:$4 sm:$0xff]  }
 0x5ea   :  { %4960 = vmatpush1.bf16.msra.mxu0 %v11873_v54  ;;  %4991 = vmatprep.mubr.bf16.mxu0 %v13223_v36  ;;  %v12045_v54 = vld [vmem:[#allocation6 + $0x250] sm:$0xff]  }
 0x5eb   :  { %4961 = vmatprep.subr.bf16.mxu0 %v11878_v32  ;;  %v11951_v32 = vld [vmem:[#allocation2 + $0xec0] ss:$72 sps:$4 sm:$0xff]   ;;  %10834 = vmatpush3.bf16.msra.mxu1 %v12044_v31  ;;  %v12022_v31 = vld [vmem:[#allocation2 + $0x1bb4] ss:$72 sps:$4 sm:$0xff]  }
 0x5ec   :  { %10835 = vmatprep.subr.bf16.mxu1 %v12045_v54  ;;  %v13253_v54 = vld [vmem:[%s13392_s0 + $0x10] ss:$28 sps:$4 sm:$0xff]  }
 0x5ee   :  { %4962 = vmatpush1.bf16.msra.mxu0 %v11876_v34  ;;  %v11956_v34 = vld [vmem:[#allocation2 + $0xf54] ss:$72 sps:$4 sm:$0xff]  }
 0x5ef   :  { %4963 = vmatprep.subr.bf16.mxu0 %v11881_v38  ;;  %v12046_v38 = vld [vmem:[#allocation6 + $0x210] sm:$0xff]  }
 0x5f0   :  { %10836 = vmatpush3.bf16.msra.mxu1 %v12046_v38  ;;  %v12023_v38 = vld [vmem:[#allocation2 + $0x1c40] ss:$72 sps:$4 sm:$0xff]  }
 0x5f2   :  { %4964 = vmatpush1.bf16.msra.mxu0 %v11879_v39  ;;  %v12047_v39 = vld [vmem:[#allocation6 + $0x258] sm:$0xff]  }
 0x5f3   :  { %4965 = vmatprep.subr.bf16.mxu0 %v11884_v40  ;;  %v11954_v40 = vld [vmem:[#allocation2 + $0xf50] ss:$72 sps:$4 sm:$0xff]   ;;  %10837 = vmatprep.subr.bf16.mxu1 %v12047_v39  ;;  %v12028_v39 = vld [vmem:[#allocation2 + $0x1cd4] ss:$72 sps:$4 sm:$0xff]  }
 0x5f6   :  { %4966 = vmatpush1.bf16.msra.mxu0 %v11882_v35  ;;  %v11959_v35 = vld [vmem:[#allocation2 + $0xfe4] ss:$72 sps:$4 sm:$0xff]  }
 0x5f7   :  { %4967 = vmatprep.subr.bf16.mxu0 %v11887_v41  ;;  %v12048_v41 = vld [vmem:[#allocation6 + $0x218] sm:$0xff]  }
 0x5f8   :  { %10838 = vmatpush3.bf16.msra.mxu1 %v12048_v41  ;;  %v12029_v41 = vld [vmem:[#allocation2 + $0x1d60] ss:$72 sps:$4 sm:$0xff]  }
 0x5fa   :  { %4968 = vmatpush1.bf16.msra.mxu0 %v11885_v37  ;;  %v12049_v37 = vld [vmem:[#allocation6 + $0x260] sm:$0xff]  }
 0x5fb   :  { %4969 = vmatprep.subr.bf16.mxu0 %v11890_v42  ;;  %v11957_v42 = vld [vmem:[#allocation2 + $0xfe0] ss:$72 sps:$4 sm:$0xff]   ;;  %10839 = vmatprep.subr.bf16.mxu1 %v12049_v37  ;;  %v12034_v37 = vld [vmem:[#allocation2 + $0x1df4] ss:$72 sps:$4 sm:$0xff]  }
 0x5fe   :  { %4970 = vmatpush1.bf16.msra.mxu0 %v11888_v11  ;;  %v11962_v11 = vld [vmem:[#allocation2 + $0x1074] ss:$72 sps:$4 sm:$0xff]  }
 0x5ff   :  { %4971 = vmatprep.subr.bf16.mxu0 %v11893_v43  ;;  %v12050_v43 = vld [vmem:[#allocation6 + $0x220] sm:$0xff]  }
 0x600   :  { %10840 = vmatpush3.bf16.msra.mxu1 %v12050_v43 }
 0x602   :  { %4972 = vmatpush1.bf16.msra.mxu0 %v11891_v44  ;;  %v12051_v44 = vld [vmem:[#allocation6 + $0x268] sm:$0xff]  }
 0x603   :  { %4973 = vmatprep.subr.bf16.mxu0 %v11896_v45  ;;  %v11960_v45 = vld [vmem:[#allocation2 + $0x1070] ss:$72 sps:$4 sm:$0xff]   ;;  %10841 = vmatprep.subr.bf16.mxu1 %v12051_v44 }
 0x606   :  { %4974 = vmatpush1.bf16.msra.mxu0 %v11894_v46  ;;  %v11965_v46 = vld [vmem:[#allocation2 + $0x1104] ss:$72 sps:$4 sm:$0xff]  }
 0x607   :  { %4975 = vmatprep.subr.bf16.mxu0 %v11899_v47  ;;  %v12052_v47 = vld [vmem:[#allocation6 + $0x228] sm:$0xff]  }
 0x608   :  { %10842 = vmatpush3.bf16.msra.mxu1 %v12052_v47  ;;  %v12035_v47 = vld [vmem:[#allocation2 + $0x1e80] ss:$72 sps:$4 sm:$0xff]  }
 0x60a   :  { %4976 = vmatpush1.bf16.msra.mxu0 %v11897_v49  ;;  %v11963_v49 = vld [vmem:[#allocation2 + $0x1100] ss:$72 sps:$4 sm:$0xff]  }
 0x60b   :  { %4977 = vmatprep.subr.bf16.mxu0 %v11902_v51  ;;  %v11968_v51 = vld [vmem:[#allocation2 + $0x1194] ss:$72 sps:$4 sm:$0xff]  }
 0x60e   :  { %4978 = vmatpush1.bf16.msra.mxu0 %v11900_v52  ;;  %v11966_v52 = vld [vmem:[#allocation2 + $0x1190] ss:$72 sps:$4 sm:$0xff]  }
 0x60f   :  { %4979 = vmatprep.subr.bf16.mxu0 %v11905_v53  ;;  %v11971_v53 = vld [vmem:[#allocation2 + $0x1224] ss:$72 sps:$4 sm:$0xff]  }
 0x612   :  { %4980 = vmatpush1.bf16.msra.mxu0 %v11903_v55  ;;  %v11969_v55 = vld [vmem:[#allocation2 + $0x1220] ss:$72 sps:$4 sm:$0xff]  }
 0x613   :  { %4981 = vmatprep.subr.bf16.mxu0 %v11908_v56  ;;  %v11974_v56 = vld [vmem:[#allocation2 + $0x12b4] ss:$72 sps:$4 sm:$0xff]  }
 0x616   :  { %4982 = vmatpush1.bf16.msra.mxu0 %v11906_v57  ;;  %v13241_v57 = vld [vmem:[%s13392_s0 + $0x8] ss:$28 sps:$4 sm:$0xff]  }
 0x617   :  { %4983 = vmatprep.subr.bf16.mxu0 %v11911_v58  ;;  %v11972_v58 = vld [vmem:[#allocation2 + $0x12b0] ss:$72 sps:$4 sm:$0xff]  }
 0x61a   :  { %4984 = vmatpush1.bf16.msra.mxu0 %v11909_v59  ;;  %v13247_v59 = vld [vmem:[%s13392_s0 + $0x14] ss:$28 sps:$4 sm:$0xff]  }
 0x61b   :  { %4985 = vmatprep.subr.bf16.mxu0 %v11914_v2  ;;  %v11977_v2 = vld [vmem:[#allocation2 + $0x1344] ss:$72 sps:$4 sm:$0xff]  }
 0x61e   :  { %4986 = vmatpush1.bf16.msra.mxu0 %v11912_v60  ;;  %v11975_v60 = vld [vmem:[#allocation2 + $0x1340] ss:$72 sps:$4 sm:$0xff]  }
 0x61f   :  { %4987 = vmatprep.subr.bf16.mxu0 %v11917_v61  ;;  %v11980_v61 = vld [vmem:[#allocation2 + $0x13d4] ss:$72 sps:$4 sm:$0xff]  }
 0x622   :  { %4988 = vmatpush1.bf16.msra.mxu0 %v11915_v62  ;;  %v11978_v62 = vld [vmem:[#allocation2 + $0x13d0] ss:$72 sps:$4 sm:$0xff]  }
 0x623   :  { %4989 = vmatprep.subr.bf16.mxu0 %v11920_v63  ;;  %v11983_v63 = vld [vmem:[#allocation2 + $0x1464] ss:$72 sps:$4 sm:$0xff]  }
 0x626   :  { %4990 = vmatpush1.bf16.msra.mxu0 %v11918_v0  ;;  %v11981_v0 = vld [vmem:[#allocation2 + $0x1460] ss:$72 sps:$4 sm:$0xff]  }
 0x627   :  { %5002 = vmatprep.subr.bf16.mxu0 %v11923_v3  ;;  %v11986_v3 = vld [vmem:[#allocation2 + $0x14f4] ss:$72 sps:$4 sm:$0xff]  }
 0x629   :  { %4992 = vmatmul.mubr.bf16.vlgmr.msra.gmra.mrb[16].mxu0 %v13229_v8 }
 0x62a   :  { %5003 = vmatpush1.bf16.msra.mxu0 %v11921_v1  ;;  %5034 = vmatprep.mubr.bf16.mxu0 %v13235_v10  ;;  %v11984_v1 = vld [vmem:[#allocation2 + $0x14f0] ss:$72 sps:$4 sm:$0xff]  }
 0x62b   :  { %5004 = vmatprep.subr.bf16.mxu0 %v11926_v5  ;;  %v11989_v5 = vld [vmem:[#allocation2 + $0x1584] ss:$72 sps:$4 sm:$0xff]  }
 0x62e   :  { %5005 = vmatpush1.bf16.msra.mxu0 %v11924_v7  ;;  %v11987_v7 = vld [vmem:[#allocation2 + $0x1580] ss:$72 sps:$4 sm:$0xff]  }
 0x62f   :  { %5006 = vmatprep.subr.bf16.mxu0 %v11929_v33  ;;  %v11992_v33 = vld [vmem:[#allocation2 + $0x1614] ss:$72 sps:$4 sm:$0xff]  }
 0x632   :  { %5007 = vmatpush1.bf16.msra.mxu0 %v11927_v12  ;;  %v11990_v12 = vld [vmem:[#allocation2 + $0x1610] ss:$72 sps:$4 sm:$0xff]  }
 0x633   :  { %5008 = vmatprep.subr.bf16.mxu0 %v11932_v13  ;;  %v11995_v13 = vld [vmem:[#allocation2 + $0x16a4] ss:$72 sps:$4 sm:$0xff]  }
 0x636   :  { %5009 = vmatpush1.bf16.msra.mxu0 %v11930_v23  ;;  %v11993_v23 = vld [vmem:[#allocation2 + $0x16a0] ss:$72 sps:$4 sm:$0xff]  }
 0x637   :  { %5010 = vmatprep.subr.bf16.mxu0 %v11935_v14  ;;  %v11998_v14 = vld [vmem:[#allocation2 + $0x1734] ss:$72 sps:$4 sm:$0xff]  }
 0x63a   :  { %5011 = vmatpush1.bf16.msra.mxu0 %v11933_v25  ;;  %v11996_v25 = vld [vmem:[#allocation2 + $0x1730] ss:$72 sps:$4 sm:$0xff]  }
 0x63b   :  { %5012 = vmatprep.subr.bf16.mxu0 %v11938_v15  ;;  %v12001_v15 = vld [vmem:[#allocation2 + $0x17c4] ss:$72 sps:$4 sm:$0xff]  }
 0x63e   :  { %5013 = vmatpush1.bf16.msra.mxu0 %v11936_v16  ;;  %v11999_v16 = vld [vmem:[#allocation2 + $0x17c0] ss:$72 sps:$4 sm:$0xff]  }
 0x63f   :  { %5014 = vmatprep.subr.bf16.mxu0 %v11941_v20  ;;  %v12004_v20 = vld [vmem:[#allocation2 + $0x1854] ss:$72 sps:$4 sm:$0xff]  }
 0x642   :  { %5015 = vmatpush1.bf16.msra.mxu0 %v11939_v21  ;;  %v12002_v21 = vld [vmem:[#allocation2 + $0x1850] ss:$72 sps:$4 sm:$0xff]  }
 0x643   :  { %5016 = vmatprep.subr.bf16.mxu0 %v11944_v22  ;;  %v12007_v22 = vld [vmem:[#allocation2 + $0x18e4] ss:$72 sps:$4 sm:$0xff]  }
 0x646   :  { %5017 = vmatpush1.bf16.msra.mxu0 %v11942_v50  ;;  %v12005_v50 = vld [vmem:[#allocation2 + $0x18e0] ss:$72 sps:$4 sm:$0xff]  }
 0x647   :  { %5018 = vmatprep.subr.bf16.mxu0 %v11947_v4  ;;  %v12010_v4 = vld [vmem:[#allocation2 + $0x1974] ss:$72 sps:$4 sm:$0xff]  }
 0x64a   :  { %5019 = vmatpush1.bf16.msra.mxu0 %v11945_v24  ;;  %v12008_v24 = vld [vmem:[#allocation2 + $0x1970] ss:$72 sps:$4 sm:$0xff]  }
 0x64b   :  { %5020 = vmatprep.subr.bf16.mxu0 %v11950_v26  ;;  %v12013_v26 = vld [vmem:[#allocation2 + $0x1a04] ss:$72 sps:$4 sm:$0xff]  }
 0x64e   :  { %5021 = vmatpush1.bf16.msra.mxu0 %v11948_v30  ;;  %v12019_v30 = vld [vmem:[#allocation2 + $0x1b24] ss:$72 sps:$4 sm:$0xff]  }
 0x64f   :  { %5022 = vmatprep.subr.bf16.mxu0 %v11953_v48  ;;  %v12017_v48 = vld [vmem:[#allocation2 + $0x1b20] ss:$72 sps:$4 sm:$0xff]  }
 0x652   :  { %5023 = vmatpush1.bf16.msra.mxu0 %v11951_v32  ;;  %v12020_v32 = vld [vmem:[#allocation2 + $0x1bb0] ss:$72 sps:$4 sm:$0xff]  }
 0x653   :  { %5024 = vmatprep.subr.bf16.mxu0 %v11956_v34  ;;  %v12025_v34 = vld [vmem:[#allocation2 + $0x1c44] ss:$72 sps:$4 sm:$0xff]  }
 0x656   :  { %5025 = vmatpush1.bf16.msra.mxu0 %v11954_v40  ;;  %v12026_v40 = vld [vmem:[#allocation2 + $0x1cd0] ss:$72 sps:$4 sm:$0xff]  }
 0x657   :  { %5026 = vmatprep.subr.bf16.mxu0 %v11959_v35  ;;  %v12031_v35 = vld [vmem:[#allocation2 + $0x1d64] ss:$72 sps:$4 sm:$0xff]  }
 0x65a   :  { %5027 = vmatpush1.bf16.msra.mxu0 %v11957_v42  ;;  %v12032_v42 = vld [vmem:[#allocation2 + $0x1df0] ss:$72 sps:$4 sm:$0xff]  }
 0x65b   :  { %5028 = vmatprep.subr.bf16.mxu0 %v11962_v11  ;;  %v12037_v11 = vld [vmem:[#allocation2 + $0x1e84] ss:$72 sps:$4 sm:$0xff]  }
 0x65e   :  { %5029 = vmatpush1.bf16.msra.mxu0 %v11960_v45 }
 0x65f   :  { %5030 = vmatprep.subr.bf16.mxu0 %v11965_v46 }
 0x662   :  { %5031 = vmatpush1.bf16.msra.mxu0 %v11963_v49 }
 0x663   :  { %5032 = vmatprep.subr.bf16.mxu0 %v11968_v51  ;;  %v12040_v51 = vld [vmem:[#allocation2 + $0x1f14] ss:$72 sps:$4 sm:$0xff]  }
 0x666   :  { %5033 = vmatpush1.bf16.msra.mxu0 %v11966_v52 }
 0x667   :  { %5045 = vmatprep.subr.bf16.mxu0 %v11971_v53 }
 0x669   :  { %5035 = vmatmul.mubr.bf16.vlgmr.msra.gmra.mrb[16].mxu0 %v13241_v57 }
 0x66a   :  { %5046 = vmatpush1.bf16.msra.mxu0 %v11969_v55  ;;  %5077 = vmatprep.mubr.bf16.mxu0 %v13247_v59 }
 0x66b   :  { %5047 = vmatprep.subr.bf16.mxu0 %v11974_v56  ;;  %v12038_v56 = vld [vmem:[#allocation2 + $0x1f10] ss:$72 sps:$4 sm:$0xff]  }
 0x66e   :  { %5048 = vmatpush1.bf16.msra.mxu0 %v11972_v58  ;;  %v13266_v58 = vld [vmem:[%s13392_s0 + $0x18] ss:$28 sps:$4 sm:$0xff]  }
 0x66f   :  { %5049 = vmatprep.subr.bf16.mxu0 %v11977_v2  ;;  %v12053_v2 = vld [vmem:[#allocation6 + $0x270] sm:$0xff]  }
 0x670   :  { %10843 = vmatprep.subr.bf16.mxu1 %v12053_v2  ;;  %v12107_v2 = vld [vmem:[#allocation2 + $0x92c] ss:$72 sps:$4 sm:$0xff]  }
 0x672   :  { %5050 = vmatpush1.bf16.msra.mxu0 %v11975_v60  ;;  %v12054_v60 = vld [vmem:[#allocation6 + $0x230] sm:$0xff]  }
 0x673   :  { %5051 = vmatprep.subr.bf16.mxu0 %v11980_v61  ;;  %10844 = vmatpush3.bf16.msra.mxu1 %v12054_v60  ;;  %v12056_v61 = vld [vmem:[#allocation6 + $0x238] sm:$0xff]  }
 0x674   :  { %v12105_v60 = vld [vmem:[#allocation2 + $0x928] ss:$72 sps:$4 sm:$0xff]  }
 0x676   :  { %5052 = vmatpush1.bf16.msra.mxu0 %v11978_v62  ;;  %v4387_v62 = vld [vmem:[#allocation4 + $0x8] sm:$0x3] }
 0x677   :  { %5053 = vmatprep.subr.bf16.mxu0 %v11983_v63  ;;  %v4392_v63 = vrot.slane %v4387_v62, %v13141_v17 }
 0x67a   :  { %5054 = vmatpush1.bf16.msra.mxu0 %v11981_v0  ;;  %v4396_v0 = vrot.slane %v4387_v62, %v13143_v18  ;;  %v12111_v62 = vld [vmem:[#allocation2 + $0xa48] ss:$72 sps:$4 sm:$0xff]  }
 0x67b   :  { %5055 = vmatprep.subr.bf16.mxu0 %v11986_v3 }
 0x67e   :  { %5056 = vmatpush1.bf16.msra.mxu0 %v11984_v1 }
 0x67f   :  { %5057 = vmatprep.subr.bf16.mxu0 %v11989_v5 }
 0x682   :  { %5058 = vmatpush1.bf16.msra.mxu0 %v11987_v7 }
 0x683   :  { %5059 = vmatprep.subr.bf16.mxu0 %v11992_v33 }
 0x686   :  { %5060 = vmatpush1.bf16.msra.mxu0 %v11990_v12 }
 0x687   :  { %5061 = vmatprep.subr.bf16.mxu0 %v11995_v13 }
 0x68a   :  { %5062 = vmatpush1.bf16.msra.mxu0 %v11993_v23 }
 0x68b   :  { %5063 = vmatprep.subr.bf16.mxu0 %v11998_v14 }
 0x68e   :  { %5064 = vmatpush1.bf16.msra.mxu0 %v11996_v25 }
 0x68f   :  { %5065 = vmatprep.subr.bf16.mxu0 %v12001_v15 }
 0x692   :  { %5066 = vmatpush1.bf16.msra.mxu0 %v11999_v16 }
 0x693   :  { %5067 = vmatprep.subr.bf16.mxu0 %v12004_v20 }
 0x696   :  { %5068 = vmatpush1.bf16.msra.mxu0 %v12002_v21 }
 0x697   :  { %5069 = vmatprep.subr.bf16.mxu0 %v12007_v22  ;;  %v12057_v22 = vld [vmem:[#allocation2 + $0x28] ss:$72 sps:$4 sm:$0xff]  }
 0x69a   :  { %5070 = vmatpush1.bf16.msra.mxu0 %v12005_v50  ;;  %v12062_v50 = vld [vmem:[#allocation2 + $0xbc] ss:$72 sps:$4 sm:$0xff]  }
 0x69b   :  { %5071 = vmatprep.subr.bf16.mxu0 %v12010_v4  ;;  %v12060_v4 = vld [vmem:[#allocation2 + $0xb8] ss:$72 sps:$4 sm:$0xff]  }
 0x69e   :  { %5072 = vmatpush1.bf16.msra.mxu0 %v12008_v24  ;;  %v12065_v24 = vld [vmem:[#allocation2 + $0x14c] ss:$72 sps:$4 sm:$0xff]  }
 0x69f   :  { %5073 = vmatprep.subr.bf16.mxu0 %v12013_v26  ;;  %v12063_v26 = vld [vmem:[#allocation2 + $0x148] ss:$72 sps:$4 sm:$0xff]  }
 0x6a2   :  { %5074 = vmatpush1.bf16.msra.mxu0 %v12011_v27  ;;  %v12068_v27 = vld [vmem:[#allocation2 + $0x1dc] ss:$72 sps:$4 sm:$0xff]  }
 0x6a3   :  { %5075 = vmatprep.subr.bf16.mxu0 %v12016_v29  ;;  %v12066_v29 = vld [vmem:[#allocation2 + $0x1d8] ss:$72 sps:$4 sm:$0xff]  }
 0x6a6   :  { %5076 = vmatpush1.bf16.msra.mxu0 %v12014_v28  ;;  %v12071_v28 = vld [vmem:[#allocation2 + $0x26c] ss:$72 sps:$4 sm:$0xff]  }
 0x6a7   :  { %5088 = vmatprep.subr.bf16.mxu0 %v12019_v30  ;;  %v12069_v30 = vld [vmem:[#allocation2 + $0x268] ss:$72 sps:$4 sm:$0xff]  }
 0x6a9   :  { %5078 = vmatmul.mubr.bf16.vlgmr.msra.gmra.mrb[16].mxu0 %v13253_v54 }
 0x6aa   :  { %5089 = vmatpush1.bf16.msra.mxu0 %v12017_v48  ;;  %5120 = vmatprep.mubr.bf16.mxu0 %v12980_v19  ;;  %v12074_v48 = vld [vmem:[#allocation2 + $0x2fc] ss:$72 sps:$4 sm:$0xff]  }
 0x6ab   :  { %5090 = vmatprep.subr.bf16.mxu0 %v12022_v31  ;;  %v12072_v31 = vld [vmem:[#allocation2 + $0x2f8] ss:$72 sps:$4 sm:$0xff]  }
 0x6ae   :  { %5091 = vmatpush1.bf16.msra.mxu0 %v12020_v32  ;;  %v12077_v32 = vld [vmem:[#allocation2 + $0x38c] ss:$72 sps:$4 sm:$0xff]  }
 0x6af   :  { %5092 = vmatprep.subr.bf16.mxu0 %v12025_v34  ;;  %v12080_v34 = vld [vmem:[#allocation2 + $0x41c] ss:$72 sps:$4 sm:$0xff]  }
 0x6b2   :  { %5093 = vmatpush1.bf16.msra.mxu0 %v12023_v38  ;;  %v12078_v38 = vld [vmem:[#allocation2 + $0x418] ss:$72 sps:$4 sm:$0xff]  }
 0x6b3   :  { %5094 = vmatprep.subr.bf16.mxu0 %v12028_v39  ;;  %v12083_v39 = vld [vmem:[#allocation2 + $0x4ac] ss:$72 sps:$4 sm:$0xff]  }
 0x6b6   :  { %5095 = vmatpush1.bf16.msra.mxu0 %v12026_v40  ;;  %v12081_v40 = vld [vmem:[#allocation2 + $0x4a8] ss:$72 sps:$4 sm:$0xff]  }
 0x6b7   :  { %5096 = vmatprep.subr.bf16.mxu0 %v12031_v35  ;;  %v12086_v35 = vld [vmem:[#allocation2 + $0x53c] ss:$72 sps:$4 sm:$0xff]  }
 0x6ba   :  { %5097 = vmatpush1.bf16.msra.mxu0 %v12029_v41  ;;  %v12084_v41 = vld [vmem:[#allocation2 + $0x538] ss:$72 sps:$4 sm:$0xff]  }
 0x6bb   :  { %5098 = vmatprep.subr.bf16.mxu0 %v12034_v37  ;;  %v12089_v37 = vld [vmem:[#allocation2 + $0x5cc] ss:$72 sps:$4 sm:$0xff]  }
 0x6bc   :  { %v10825_v43 = vpop.f32.mrb[12].mxu0 }
 0x6bd   :  { %v10826_v44 = vpop.f32.mrb[13].mxu0 }
 0x6be   :  { %v10827_v45 = vadd.f32 %v10826_v44, %v10825_v43  ;;  %5099 = vmatpush1.bf16.msra.mxu0 %v12032_v42  ;;  %v10828_v46 = vpop.f32.mrb[14].mxu0  ;;  %v12087_v42 = vld [vmem:[#allocation2 + $0x5c8] ss:$72 sps:$4 sm:$0xff]   ;;  %v12090_v43 = vld [vmem:[#allocation2 + $0x658] ss:$72 sps:$4 sm:$0xff]  }
 0x6bf   :  { %v10829_v49 = vpop.f32.mrb[15].mxu0  ;;  %5100 = vmatprep.subr.bf16.mxu0 %v12037_v11  ;;  %v12092_v11 = vld [vmem:[#allocation2 + $0x65c] ss:$72 sps:$4 sm:$0xff]   ;;  %v12095_v44 = vld [vmem:[#allocation2 + $0x6ec] ss:$72 sps:$4 sm:$0xff]  }
 0x6c0   :  { %v13258_v52 = vadd.f32 %v10827_v45, %v13212_v6  ;;  %v10830_v53 = vadd.f32 %v10829_v49, %v10828_v46  ;;  %v12055_v6 = vld [vmem:[#allocation6 + $0x278] sm:$0xff]   ;;  %v12098_v46 = vld [vmem:[#allocation2 + $0x77c] ss:$72 sps:$4 sm:$0xff]  }
 0x6c1   :  { %10845 = vmatprep.subr.bf16.mxu1 %v12055_v6  ;;  %v12093_v45 = vld [vmem:[#allocation2 + $0x6e8] ss:$72 sps:$4 sm:$0xff]   ;;  %v12101_v49 = vld [vmem:[#allocation2 + $0x80c] ss:$72 sps:$4 sm:$0xff]   ;;  %v12110_v6 = vld [vmem:[#allocation2 + $0x9bc] ss:$72 sps:$4 sm:$0xff]  }
 0x6c2   :  { %v13261_v55 = vadd.f32 %v10830_v53, %v13215_v9  ;;  %5101 = vmatpush1.bf16.msra.mxu0 %v12035_v47  ;;  %10846 = vmatpush3.bf16.msra.mxu1 %v12056_v61  ;;  %v12059_v9 = vld [vmem:[#allocation2 + $0x2c] ss:$72 sps:$4 sm:$0xff]   ;;  %v12096_v47 = vld [vmem:[#allocation2 + $0x778] ss:$72 sps:$4 sm:$0xff]   ;;  %v12104_v53 = vld [vmem:[#allocation2 + $0x89c] ss:$72 sps:$4 sm:$0xff]  }
 0x6c3   :  { %5102 = vmatprep.subr.bf16.mxu0 %v12040_v51  ;;  %5992 = vmatprep.subr.bf16.mxu1 %v12059_v9  ;;  %v12099_v51 = vld [vmem:[#allocation2 + $0x808] ss:$72 sps:$4 sm:$0xff]   ;;  %v12108_v61 = vld [vmem:[#allocation2 + $0x9b8] ss:$72 sps:$4 sm:$0xff]   ;;  %v12113_v9 = vld [vmem:[#allocation2 + $0xa4c] ss:$72 sps:$4 sm:$0xff]  }
 0x6c6   :  { %5103 = vmatpush1.bf16.msra.mxu0 %v12038_v56  ;;  %v12102_v56 = vld [vmem:[#allocation2 + $0x898] ss:$72 sps:$4 sm:$0xff]  }
 0x6c9   :  { %5121 = vmatmul.mubr.bf16.vlgmr.msra.gmra.mrb[16].mxu0 %v13266_v58 }
 0x79c   :  { %v5122_v3 = vpop.f32.mrb[16].mxu0 }
 0x79d   :  { %v10990_v1 = vadd.f32 %v5122_v3, %v4392_v63  ;;  %v5124_v5 = vpop.f32.mrb[17].mxu0  ;;  %v12119_v3 = vld [vmem:[#allocation2 + $0xb6c] ss:$72 sps:$4 sm:$0xff]  }
 0x79e   :  { %v10991_v7 = vadd.f32 %v5124_v5, %v4396_v0  ;;  %v5126_v33 = vpop.f32.mrb[18].mxu0  ;;  %v12122_v5 = vld [vmem:[#allocation2 + $0xbfc] ss:$72 sps:$4 sm:$0xff]  }
 0x79f   :  { %v10992_v12 = vadd.f32 %v5126_v33, %v4392_v63  ;;  %v5128_v13 = vpop.f32.mrb[19].mxu0  ;;  %v5131_v14 = vmax.f32 %v10990_v1, 0.0  ;;  %v12116_v63 = vld [vmem:[#allocation2 + $0xadc] ss:$72 sps:$4 sm:$0xff]   ;;  %v12117_v1 = vld [vmem:[#allocation2 + $0xb68] ss:$72 sps:$4 sm:$0xff]  }
 0x7a0   :  { %v10993_v23 = vadd.f32 %v5128_v13, %v4396_v0  ;;  %v5132_v15 = vmax.f32 %v10991_v7, 0.0  ;;  %v12114_v0 = vld [vmem:[#allocation2 + $0xad8] ss:$72 sps:$4 sm:$0xff]   ;;  %v12125_v7 = vld [vmem:[#allocation2 + $0xc8c] ss:$72 sps:$4 sm:$0xff]  }
 0x7a1   :  { %v5133_v25 = vmax.f32 %v10992_v12, 0.0  ;;  %v12128_v33 = vld [vmem:[#allocation2 + $0xd1c] ss:$72 sps:$4 sm:$0xff]   ;;  %v12126_v12 = vld [vmem:[#allocation2 + $0xd18] ss:$72 sps:$4 sm:$0xff]  }
 0x7a2   :  { %v5134_v16 = vmax.f32 %v10993_v23, 0.0  ;;  %v12131_v13 = vld [vmem:[#allocation2 + $0xdac] ss:$72 sps:$4 sm:$0xff]   ;;  %v12129_v23 = vld [vmem:[#allocation2 + $0xda8] ss:$72 sps:$4 sm:$0xff]  }
 0x7a3   :  { %v5135_v20 = vpack.c.bf16 %v5133_v25, %v5131_v14  ;;  %v12134_v14 = vld [vmem:[#allocation2 + $0xe3c] ss:$72 sps:$4 sm:$0xff]   ;;  %v12225_v25 = vld [vmem:[#allocation6 + $0x2c0] sm:$0xff]  }
 0x7a4   :  { %v5136_v21 = vpack.c.bf16 %v5134_v16, %v5132_v15  ;;  %v12226_v15 = vld [vmem:[#allocation6 + $0x280] sm:$0xff]   ;;  %v12227_v16 = vld [vmem:[#allocation6 + $0x2c8] sm:$0xff]   ;;  %10853 = vmatprep.subr.bf16.mxu0 %v12225_v25 }
 0x7a5   :  { %10854 = vmatpush3.bf16.msra.mxu0 %v12226_v15  ;;  %v12203_v25 = vld [vmem:[#allocation2 + $0x1b2c] ss:$72 sps:$4 sm:$0xff]   ;;  %v12201_v15 = vld [vmem:[#allocation2 + $0x1b28] ss:$72 sps:$4 sm:$0xff]  }
 0x7a6   :  { %5297 = vmatprep.mubr.bf16.mxu1 %v5136_v21  ;;  %v12137_v21 = vld [vmem:[#allocation2 + $0xecc] ss:$72 sps:$4 sm:$0xff]   ;;  %10855 = vmatprep.subr.bf16.mxu0 %v12227_v16  ;;  %v12206_v16 = vld [vmem:[#allocation2 + $0x1bbc] ss:$72 sps:$4 sm:$0xff]  }
 0x7a7   :  { %5298 = vmatmul.mubr.bf16.vlgmr.msra.gmra.mrb[20].mxu1 %v5135_v20  ;;  %v12132_v20 = vld [vmem:[#allocation2 + $0xe38] ss:$72 sps:$4 sm:$0xff]  }
 0x7a8   :  { %5993 = vmatpush1.bf16.msra.mxu1 %v12057_v22  ;;  %6024 = vmatprep.mubr.bf16.mxu1 %v13223_v36  ;;  %v12075_v36 = vld [vmem:[#allocation2 + $0x388] ss:$72 sps:$4 sm:$0xff]   ;;  %v12228_v22 = vld [vmem:[#allocation6 + $0x288] sm:$0xff]  }
 0x7a9   :  { %5994 = vmatprep.subr.bf16.mxu1 %v12062_v50  ;;  %v12229_v50 = vld [vmem:[#allocation6 + $0x2d0] sm:$0xff]   ;;  %10856 = vmatpush3.bf16.msra.mxu0 %v12228_v22 }
 0x7aa   :  { %10857 = vmatprep.subr.bf16.mxu0 %v12229_v50  ;;  %v12207_v22 = vld [vmem:[#allocation2 + $0x1c48] ss:$72 sps:$4 sm:$0xff]   ;;  %v12212_v50 = vld [vmem:[#allocation2 + $0x1cdc] ss:$72 sps:$4 sm:$0xff]  }
 0x7ac   :  { %5995 = vmatpush1.bf16.msra.mxu1 %v12060_v4  ;;  %v12135_v4 = vld [vmem:[#allocation2 + $0xec8] ss:$72 sps:$4 sm:$0xff]  }
 0x7ad   :  { %5996 = vmatprep.subr.bf16.mxu1 %v12065_v24  ;;  %v12140_v24 = vld [vmem:[#allocation2 + $0xf5c] ss:$72 sps:$4 sm:$0xff]  }
 0x7b0   :  { %5997 = vmatpush1.bf16.msra.mxu1 %v12063_v26  ;;  %v12230_v26 = vld [vmem:[#allocation6 + $0x290] sm:$0xff]  }
 0x7b1   :  { %5998 = vmatprep.subr.bf16.mxu1 %v12068_v27  ;;  %v12231_v27 = vld [vmem:[#allocation6 + $0x2d8] sm:$0xff]   ;;  %10858 = vmatpush3.bf16.msra.mxu0 %v12230_v26 }
 0x7b2   :  { %10859 = vmatprep.subr.bf16.mxu0 %v12231_v27  ;;  %v12213_v26 = vld [vmem:[#allocation2 + $0x1d68] ss:$72 sps:$4 sm:$0xff]   ;;  %v12218_v27 = vld [vmem:[#allocation2 + $0x1dfc] ss:$72 sps:$4 sm:$0xff]  }
 0x7b4   :  { %5999 = vmatpush1.bf16.msra.mxu1 %v12066_v29  ;;  %v12138_v29 = vld [vmem:[#allocation2 + $0xf58] ss:$72 sps:$4 sm:$0xff]  }
 0x7b5   :  { %6000 = vmatprep.subr.bf16.mxu1 %v12071_v28  ;;  %v12143_v28 = vld [vmem:[#allocation2 + $0xfec] ss:$72 sps:$4 sm:$0xff]  }
 0x7b8   :  { %6001 = vmatpush1.bf16.msra.mxu1 %v12069_v30  ;;  %v12232_v30 = vld [vmem:[#allocation6 + $0x298] sm:$0xff]  }
 0x7b9   :  { %6002 = vmatprep.subr.bf16.mxu1 %v12074_v48  ;;  %v12233_v48 = vld [vmem:[#allocation6 + $0x2e0] sm:$0xff]   ;;  %10860 = vmatpush3.bf16.msra.mxu0 %v12232_v30 }
 0x7ba   :  { %10861 = vmatprep.subr.bf16.mxu0 %v12233_v48 }
 0x7bc   :  { %6003 = vmatpush1.bf16.msra.mxu1 %v12072_v31  ;;  %v12141_v31 = vld [vmem:[#allocation2 + $0xfe8] ss:$72 sps:$4 sm:$0xff]  }
 0x7bd   :  { %6004 = vmatprep.subr.bf16.mxu1 %v12077_v32  ;;  %v12146_v32 = vld [vmem:[#allocation2 + $0x107c] ss:$72 sps:$4 sm:$0xff]  }
 0x7c0   :  { %6005 = vmatpush1.bf16.msra.mxu1 %v12075_v36  ;;  %v12234_v36 = vld [vmem:[#allocation6 + $0x2a0] sm:$0xff]  }
 0x7c1   :  { %6006 = vmatprep.subr.bf16.mxu1 %v12080_v34  ;;  %v12235_v34 = vld [vmem:[#allocation6 + $0x2e8] sm:$0xff]   ;;  %10862 = vmatpush3.bf16.msra.mxu0 %v12234_v36 }
 0x7c2   :  { %10863 = vmatprep.subr.bf16.mxu0 %v12235_v34  ;;  %v12224_v34 = vld [vmem:[#allocation2 + $0x1f1c] ss:$72 sps:$4 sm:$0xff]  }
 0x7c4   :  { %6007 = vmatpush1.bf16.msra.mxu1 %v12078_v38  ;;  %v12144_v38 = vld [vmem:[#allocation2 + $0x1078] ss:$72 sps:$4 sm:$0xff]  }
 0x7c5   :  { %6008 = vmatprep.subr.bf16.mxu1 %v12083_v39  ;;  %v12149_v39 = vld [vmem:[#allocation2 + $0x110c] ss:$72 sps:$4 sm:$0xff]  }
 0x7c8   :  { %6009 = vmatpush1.bf16.msra.mxu1 %v12081_v40  ;;  %v12236_v40 = vld [vmem:[#allocation6 + $0x2a8] sm:$0xff]  }
 0x7c9   :  { %6010 = vmatprep.subr.bf16.mxu1 %v12086_v35  ;;  %v12147_v35 = vld [vmem:[#allocation2 + $0x1108] ss:$72 sps:$4 sm:$0xff]   ;;  %10864 = vmatpush3.bf16.msra.mxu0 %v12236_v40 }
 0x7cc   :  { %6011 = vmatpush1.bf16.msra.mxu1 %v12084_v41  ;;  %v12152_v41 = vld [vmem:[#allocation2 + $0x119c] ss:$72 sps:$4 sm:$0xff]  }
 0x7cd   :  { %6012 = vmatprep.subr.bf16.mxu1 %v12089_v37  ;;  %v12150_v37 = vld [vmem:[#allocation2 + $0x1198] ss:$72 sps:$4 sm:$0xff]  }
 0x7d0   :  { %6013 = vmatpush1.bf16.msra.mxu1 %v12087_v42  ;;  %v12155_v42 = vld [vmem:[#allocation2 + $0x122c] ss:$72 sps:$4 sm:$0xff]  }
 0x7d1   :  { %6014 = vmatprep.subr.bf16.mxu1 %v12092_v11  ;;  %v12153_v11 = vld [vmem:[#allocation2 + $0x1228] ss:$72 sps:$4 sm:$0xff]  }
 0x7d4   :  { %6015 = vmatpush1.bf16.msra.mxu1 %v12090_v43  ;;  %v12158_v43 = vld [vmem:[#allocation2 + $0x12bc] ss:$72 sps:$4 sm:$0xff]  }
 0x7d5   :  { %6016 = vmatprep.subr.bf16.mxu1 %v12095_v44  ;;  %v12156_v44 = vld [vmem:[#allocation2 + $0x12b8] ss:$72 sps:$4 sm:$0xff]  }
 0x7d8   :  { %6017 = vmatpush1.bf16.msra.mxu1 %v12093_v45  ;;  %v12161_v45 = vld [vmem:[#allocation2 + $0x134c] ss:$72 sps:$4 sm:$0xff]  }
 0x7d9   :  { %6018 = vmatprep.subr.bf16.mxu1 %v12098_v46  ;;  %v12159_v46 = vld [vmem:[#allocation2 + $0x1348] ss:$72 sps:$4 sm:$0xff]  }
 0x7dc   :  { %6019 = vmatpush1.bf16.msra.mxu1 %v12096_v47  ;;  %v12164_v47 = vld [vmem:[#allocation2 + $0x13dc] ss:$72 sps:$4 sm:$0xff]  }
 0x7dd   :  { %6020 = vmatprep.subr.bf16.mxu1 %v12101_v49  ;;  %v12162_v49 = vld [vmem:[#allocation2 + $0x13d8] ss:$72 sps:$4 sm:$0xff]  }
 0x7e0   :  { %6021 = vmatpush1.bf16.msra.mxu1 %v12099_v51  ;;  %v12167_v51 = vld [vmem:[#allocation2 + $0x146c] ss:$72 sps:$4 sm:$0xff]  }
 0x7e1   :  { %6022 = vmatprep.subr.bf16.mxu1 %v12104_v53  ;;  %v12165_v53 = vld [vmem:[#allocation2 + $0x1468] ss:$72 sps:$4 sm:$0xff]  }
 0x7e4   :  { %6023 = vmatpush1.bf16.msra.mxu1 %v12102_v56  ;;  %v12170_v56 = vld [vmem:[#allocation2 + $0x14fc] ss:$72 sps:$4 sm:$0xff]  }
 0x7e5   :  { %6035 = vmatprep.subr.bf16.mxu1 %v12107_v2  ;;  %v12173_v2 = vld [vmem:[#allocation2 + $0x158c] ss:$72 sps:$4 sm:$0xff]  }
 0x7e7   :  { %6025 = vmatmul.mubr.bf16.vlgmr.msra.gmra.mrb[24].mxu1 %v13229_v8  ;;  %v12120_v8 = vld [vmem:[#allocation2 + $0xbf8] ss:$72 sps:$4 sm:$0xff]  }
 0x7e8   :  { %6036 = vmatpush1.bf16.msra.mxu1 %v12105_v60  ;;  %6067 = vmatprep.mubr.bf16.mxu1 %v13235_v10  ;;  %v12123_v10 = vld [vmem:[#allocation2 + $0xc88] ss:$72 sps:$4 sm:$0xff]   ;;  %v12176_v60 = vld [vmem:[#allocation2 + $0x161c] ss:$72 sps:$4 sm:$0xff]  }
 0x7e9   :  { %6037 = vmatprep.subr.bf16.mxu1 %v12110_v6  ;;  %v12174_v6 = vld [vmem:[#allocation2 + $0x1618] ss:$72 sps:$4 sm:$0xff]  }
 0x7ec   :  { %6038 = vmatpush1.bf16.msra.mxu1 %v12108_v61  ;;  %v12179_v61 = vld [vmem:[#allocation2 + $0x16ac] ss:$72 sps:$4 sm:$0xff]  }
 0x7ed   :  { %6039 = vmatprep.subr.bf16.mxu1 %v12113_v9  ;;  %v12177_v9 = vld [vmem:[#allocation2 + $0x16a8] ss:$72 sps:$4 sm:$0xff]  }
 0x7f0   :  { %6040 = vmatpush1.bf16.msra.mxu1 %v12111_v62  ;;  %v12182_v62 = vld [vmem:[#allocation2 + $0x173c] ss:$72 sps:$4 sm:$0xff]  }
 0x7f1   :  { %6041 = vmatprep.subr.bf16.mxu1 %v12116_v63  ;;  %v12180_v63 = vld [vmem:[#allocation2 + $0x1738] ss:$72 sps:$4 sm:$0xff]  }
 0x7f4   :  { %6042 = vmatpush1.bf16.msra.mxu1 %v12114_v0  ;;  %v12185_v0 = vld [vmem:[#allocation2 + $0x17cc] ss:$72 sps:$4 sm:$0xff]  }
 0x7f5   :  { %6043 = vmatprep.subr.bf16.mxu1 %v12119_v3  ;;  %v12183_v3 = vld [vmem:[#allocation2 + $0x17c8] ss:$72 sps:$4 sm:$0xff]  }
 0x7f8   :  { %6044 = vmatpush1.bf16.msra.mxu1 %v12117_v1  ;;  %v12188_v1 = vld [vmem:[#allocation2 + $0x185c] ss:$72 sps:$4 sm:$0xff]  }
 0x7f9   :  { %6045 = vmatprep.subr.bf16.mxu1 %v12122_v5  ;;  %v12186_v5 = vld [vmem:[#allocation2 + $0x1858] ss:$72 sps:$4 sm:$0xff]  }
 0x7fc   :  { %6046 = vmatpush1.bf16.msra.mxu1 %v12120_v8  ;;  %v12191_v8 = vld [vmem:[#allocation2 + $0x18ec] ss:$72 sps:$4 sm:$0xff]  }
 0x7fd   :  { %6047 = vmatprep.subr.bf16.mxu1 %v12125_v7  ;;  %v12189_v7 = vld [vmem:[#allocation2 + $0x18e8] ss:$72 sps:$4 sm:$0xff]  }
 0x800   :  { %6048 = vmatpush1.bf16.msra.mxu1 %v12123_v10  ;;  %v12194_v10 = vld [vmem:[#allocation2 + $0x197c] ss:$72 sps:$4 sm:$0xff]  }
 0x801   :  { %6049 = vmatprep.subr.bf16.mxu1 %v12128_v33  ;;  %v12192_v33 = vld [vmem:[#allocation2 + $0x1978] ss:$72 sps:$4 sm:$0xff]  }
 0x804   :  { %6050 = vmatpush1.bf16.msra.mxu1 %v12126_v12  ;;  %v12197_v12 = vld [vmem:[#allocation2 + $0x1a0c] ss:$72 sps:$4 sm:$0xff]  }
 0x805   :  { %6051 = vmatprep.subr.bf16.mxu1 %v12131_v13  ;;  %v12195_v13 = vld [vmem:[#allocation2 + $0x1a08] ss:$72 sps:$4 sm:$0xff]  }
 0x808   :  { %6052 = vmatpush1.bf16.msra.mxu1 %v12129_v23  ;;  %v12200_v23 = vld [vmem:[#allocation2 + $0x1a9c] ss:$72 sps:$4 sm:$0xff]  }
 0x809   :  { %6053 = vmatprep.subr.bf16.mxu1 %v12134_v14  ;;  %v12198_v14 = vld [vmem:[#allocation2 + $0x1a98] ss:$72 sps:$4 sm:$0xff]  }
 0x80c   :  { %6054 = vmatpush1.bf16.msra.mxu1 %v12132_v20  ;;  %v12204_v20 = vld [vmem:[#allocation2 + $0x1bb8] ss:$72 sps:$4 sm:$0xff]  }
 0x80d   :  { %6055 = vmatprep.subr.bf16.mxu1 %v12137_v21  ;;  %v12209_v21 = vld [vmem:[#allocation2 + $0x1c4c] ss:$72 sps:$4 sm:$0xff]  }
 0x810   :  { %6056 = vmatpush1.bf16.msra.mxu1 %v12135_v4  ;;  %v12210_v4 = vld [vmem:[#allocation2 + $0x1cd8] ss:$72 sps:$4 sm:$0xff]  }
 0x811   :  { %6057 = vmatprep.subr.bf16.mxu1 %v12140_v24  ;;  %v12215_v24 = vld [vmem:[#allocation2 + $0x1d6c] ss:$72 sps:$4 sm:$0xff]  }
 0x814   :  { %6058 = vmatpush1.bf16.msra.mxu1 %v12138_v29  ;;  %v12221_v29 = vld [vmem:[#allocation2 + $0x1e8c] ss:$72 sps:$4 sm:$0xff]  }
 0x815   :  { %6059 = vmatprep.subr.bf16.mxu1 %v12143_v28 }
 0x818   :  { %6060 = vmatpush1.bf16.msra.mxu1 %v12141_v31 }
 0x819   :  { %6061 = vmatprep.subr.bf16.mxu1 %v12146_v32  ;;  %v12219_v32 = vld [vmem:[#allocation2 + $0x1e88] ss:$72 sps:$4 sm:$0xff]  }
 0x81c   :  { %6062 = vmatpush1.bf16.msra.mxu1 %v12144_v38 }
 0x81d   :  { %6063 = vmatprep.subr.bf16.mxu1 %v12149_v39 }
 0x820   :  { %6064 = vmatpush1.bf16.msra.mxu1 %v12147_v35  ;;  %v12222_v35 = vld [vmem:[#allocation2 + $0x1f18] ss:$72 sps:$4 sm:$0xff]  }
 0x821   :  { %6065 = vmatprep.subr.bf16.mxu1 %v12152_v41  ;;  %v12237_v41 = vld [vmem:[#allocation6 + $0x2f0] sm:$0xff]  }
 0x822   :  { %10865 = vmatprep.subr.bf16.mxu0 %v12237_v41  ;;  %v13302_v41 = vld [vmem:[%s13392_s0 + $0xc] ss:$28 sps:$4 sm:$0xff]  }
 0x824   :  { %6066 = vmatpush1.bf16.msra.mxu1 %v12150_v37  ;;  %v12238_v37 = vld [vmem:[#allocation6 + $0x2b0] sm:$0xff]  }
 0x825   :  { %6078 = vmatprep.subr.bf16.mxu1 %v12155_v42  ;;  %10866 = vmatpush3.bf16.msra.mxu0 %v12238_v37  ;;  %v12239_v42 = vld [vmem:[#allocation6 + $0x2f8] sm:$0xff]   ;;  %v12297_v37 = vld [vmem:[#allocation2 + $0xa54] ss:$72 sps:$4 sm:$0xff]  }
 0x826   :  { %10867 = vmatprep.subr.bf16.mxu0 %v12239_v42  ;;  %v12295_v42 = vld [vmem:[#allocation2 + $0xa50] ss:$72 sps:$4 sm:$0xff]  }
 0x827   :  { %6068 = vmatmul.mubr.bf16.vlgmr.msra.gmra.mrb[24].mxu1 %v13241_v57  ;;  %v12168_v57 = vld [vmem:[#allocation2 + $0x14f8] ss:$72 sps:$4 sm:$0xff]  }
 0x828   :  { %6079 = vmatpush1.bf16.msra.mxu1 %v12153_v11  ;;  %6110 = vmatprep.mubr.bf16.mxu1 %v13247_v59  ;;  %v12171_v59 = vld [vmem:[#allocation2 + $0x1588] ss:$72 sps:$4 sm:$0xff]  }
 0x829   :  { %6080 = vmatprep.subr.bf16.mxu1 %v12158_v43  ;;  %v12240_v11 = vld [vmem:[#allocation6 + $0x2b8] sm:$0xff]  }
 0x82a   :  { %10868 = vmatpush3.bf16.msra.mxu0 %v12240_v11  ;;  %v5420_v43 = vld [vmem:[#allocation4 + $0xa] sm:$0x3]  ;;  %v12300_v11 = vld [vmem:[#allocation2 + $0xae4] ss:$72 sps:$4 sm:$0xff]  }
 0x82c   :  { %6081 = vmatpush1.bf16.msra.mxu1 %v12156_v44  ;;  %v5429_v44 = vrot.slane %v5420_v43, %v13143_v18 }
 0x82d   :  { %6082 = vmatprep.subr.bf16.mxu1 %v12161_v45 }
 0x830   :  { %6083 = vmatpush1.bf16.msra.mxu1 %v12159_v46 }
 0x831   :  { %6084 = vmatprep.subr.bf16.mxu1 %v12164_v47 }
 0x834   :  { %6085 = vmatpush1.bf16.msra.mxu1 %v12162_v49 }
 0x835   :  { %6086 = vmatprep.subr.bf16.mxu1 %v12167_v51 }
 0x838   :  { %6087 = vmatpush1.bf16.msra.mxu1 %v12165_v53 }
 0x839   :  { %6088 = vmatprep.subr.bf16.mxu1 %v12170_v56 }
 0x83c   :  { %6089 = vmatpush1.bf16.msra.mxu1 %v12168_v57 }
 0x83d   :  { %6090 = vmatprep.subr.bf16.mxu1 %v12173_v2 }
 0x840   :  { %6091 = vmatpush1.bf16.msra.mxu1 %v12171_v59 }
 0x841   :  { %6092 = vmatprep.subr.bf16.mxu1 %v12176_v60 }
 0x844   :  { %6093 = vmatpush1.bf16.msra.mxu1 %v12174_v6 }
 0x845   :  { %6094 = vmatprep.subr.bf16.mxu1 %v12179_v61 }
 0x848   :  { %6095 = vmatpush1.bf16.msra.mxu1 %v12177_v9  ;;  %v12241_v9 = vld [vmem:[#allocation2 + $0x30] ss:$72 sps:$4 sm:$0xff]  }
 0x849   :  { %6096 = vmatprep.subr.bf16.mxu1 %v12182_v62  ;;  %v12246_v62 = vld [vmem:[#allocation2 + $0xc4] ss:$72 sps:$4 sm:$0xff]  }
 0x84c   :  { %6097 = vmatpush1.bf16.msra.mxu1 %v12180_v63  ;;  %v12244_v63 = vld [vmem:[#allocation2 + $0xc0] ss:$72 sps:$4 sm:$0xff]  }
 0x84d   :  { %6098 = vmatprep.subr.bf16.mxu1 %v12185_v0  ;;  %v13290_v0 = vld [vmem:[%s13392_s0 + $0x4] ss:$28 sps:$4 sm:$0xff]  }
 0x850   :  { %6099 = vmatpush1.bf16.msra.mxu1 %v12183_v3  ;;  %v12249_v3 = vld [vmem:[#allocation2 + $0x154] ss:$72 sps:$4 sm:$0xff]  }
 0x851   :  { %6100 = vmatprep.subr.bf16.mxu1 %v12188_v1  ;;  %v12247_v1 = vld [vmem:[#allocation2 + $0x150] ss:$72 sps:$4 sm:$0xff]  }
 0x854   :  { %6101 = vmatpush1.bf16.msra.mxu1 %v12186_v5  ;;  %v12252_v5 = vld [vmem:[#allocation2 + $0x1e4] ss:$72 sps:$4 sm:$0xff]  }
 0x855   :  { %6102 = vmatprep.subr.bf16.mxu1 %v12191_v8  ;;  %v12250_v8 = vld [vmem:[#allocation2 + $0x1e0] ss:$72 sps:$4 sm:$0xff]  }
 0x858   :  { %6103 = vmatpush1.bf16.msra.mxu1 %v12189_v7  ;;  %v12255_v7 = vld [vmem:[#allocation2 + $0x274] ss:$72 sps:$4 sm:$0xff]  }
 0x859   :  { %6104 = vmatprep.subr.bf16.mxu1 %v12194_v10  ;;  %v12253_v10 = vld [vmem:[#allocation2 + $0x270] ss:$72 sps:$4 sm:$0xff]  }
 0x85c   :  { %6105 = vmatpush1.bf16.msra.mxu1 %v12192_v33  ;;  %v12258_v33 = vld [vmem:[#allocation2 + $0x304] ss:$72 sps:$4 sm:$0xff]  }
 0x85d   :  { %6106 = vmatprep.subr.bf16.mxu1 %v12197_v12  ;;  %v12256_v12 = vld [vmem:[#allocation2 + $0x300] ss:$72 sps:$4 sm:$0xff]  }
 0x860   :  { %6107 = vmatpush1.bf16.msra.mxu1 %v12195_v13  ;;  %v12261_v13 = vld [vmem:[#allocation2 + $0x394] ss:$72 sps:$4 sm:$0xff]  }
 0x861   :  { %6108 = vmatprep.subr.bf16.mxu1 %v12200_v23  ;;  %v12259_v23 = vld [vmem:[#allocation2 + $0x390] ss:$72 sps:$4 sm:$0xff]  }
 0x864   :  { %6109 = vmatpush1.bf16.msra.mxu1 %v12198_v14  ;;  %v12264_v14 = vld [vmem:[#allocation2 + $0x424] ss:$72 sps:$4 sm:$0xff]  }
 0x865   :  { %6121 = vmatprep.subr.bf16.mxu1 %v12203_v25  ;;  %v12262_v25 = vld [vmem:[#allocation2 + $0x420] ss:$72 sps:$4 sm:$0xff]  }
 0x867   :  { %6111 = vmatmul.mubr.bf16.vlgmr.msra.gmra.mrb[24].mxu1 %v13253_v54  ;;  %v12216_v54 = vld [vmem:[#allocation2 + $0x1df8] ss:$72 sps:$4 sm:$0xff]  }
 0x868   :  { %6122 = vmatpush1.bf16.msra.mxu1 %v12201_v15  ;;  %6153 = vmatprep.mubr.bf16.mxu1 %v12980_v19  ;;  %v12267_v15 = vld [vmem:[#allocation2 + $0x4b4] ss:$72 sps:$4 sm:$0xff]  }
 0x869   :  { %6123 = vmatprep.subr.bf16.mxu1 %v12206_v16  ;;  %v12265_v16 = vld [vmem:[#allocation2 + $0x4b0] ss:$72 sps:$4 sm:$0xff]  }
 0x86c   :  { %6124 = vmatpush1.bf16.msra.mxu1 %v12204_v20  ;;  %v12270_v20 = vld [vmem:[#allocation2 + $0x544] ss:$72 sps:$4 sm:$0xff]  }
 0x86d   :  { %6125 = vmatprep.subr.bf16.mxu1 %v12209_v21  ;;  %v12268_v21 = vld [vmem:[#allocation2 + $0x540] ss:$72 sps:$4 sm:$0xff]  }
 0x870   :  { %6126 = vmatpush1.bf16.msra.mxu1 %v12207_v22  ;;  %v12273_v22 = vld [vmem:[#allocation2 + $0x5d4] ss:$72 sps:$4 sm:$0xff]  }
 0x871   :  { %6127 = vmatprep.subr.bf16.mxu1 %v12212_v50  ;;  %v12271_v50 = vld [vmem:[#allocation2 + $0x5d0] ss:$72 sps:$4 sm:$0xff]  }
 0x874   :  { %6128 = vmatpush1.bf16.msra.mxu1 %v12210_v4  ;;  %v12276_v4 = vld [vmem:[#allocation2 + $0x664] ss:$72 sps:$4 sm:$0xff]  }
 0x875   :  { %6129 = vmatprep.subr.bf16.mxu1 %v12215_v24  ;;  %v12274_v24 = vld [vmem:[#allocation2 + $0x660] ss:$72 sps:$4 sm:$0xff]  }
 0x878   :  { %6130 = vmatpush1.bf16.msra.mxu1 %v12213_v26  ;;  %v12279_v26 = vld [vmem:[#allocation2 + $0x6f4] ss:$72 sps:$4 sm:$0xff]  }
 0x879   :  { %6131 = vmatprep.subr.bf16.mxu1 %v12218_v27  ;;  %v12277_v27 = vld [vmem:[#allocation2 + $0x6f0] ss:$72 sps:$4 sm:$0xff]  }
 0x87a   :  { %v10847_v28 = vpop.f32.mrb[20].mxu1 }
 0x87b   :  { %v10848_v30 = vpop.f32.mrb[21].mxu1 }
 0x87c   :  { %v10849_v48 = vadd.f32 %v10848_v30, %v10847_v28  ;;  %6132 = vmatpush1.bf16.msra.mxu1 %v12216_v54  ;;  %v10850_v31 = vpop.f32.mrb[22].mxu1  ;;  %v12282_v54 = vld [vmem:[#allocation2 + $0x784] ss:$72 sps:$4 sm:$0xff]   ;;  %v12285_v28 = vld [vmem:[#allocation2 + $0x814] ss:$72 sps:$4 sm:$0xff]  }
 0x87d   :  { %v10851_v36 = vpop.f32.mrb[23].mxu1  ;;  %6133 = vmatprep.subr.bf16.mxu1 %v12221_v29  ;;  %v12280_v29 = vld [vmem:[#allocation2 + $0x780] ss:$72 sps:$4 sm:$0xff]   ;;  %v12283_v30 = vld [vmem:[#allocation2 + $0x810] ss:$72 sps:$4 sm:$0xff]  }
 0x87e   :  { %v13279_v38 = vadd.f32 %v10849_v48, %v13258_v52  ;;  %v10852_v39 = vadd.f32 %v10851_v36, %v10850_v31  ;;  %v12243_v52 = vld [vmem:[#allocation2 + $0x34] ss:$72 sps:$4 sm:$0xff]   ;;  %v12288_v48 = vld [vmem:[#allocation2 + $0x8a4] ss:$72 sps:$4 sm:$0xff]   ;;  %v12286_v31 = vld [vmem:[#allocation2 + $0x8a0] ss:$72 sps:$4 sm:$0xff]  }
 0x87f   :  { %7025 = vmatprep.subr.bf16.mxu0 %v12243_v52  ;;  %v12289_v36 = vld [vmem:[#allocation2 + $0x930] ss:$72 sps:$4 sm:$0xff]   ;;  %v12298_v52 = vld [vmem:[#allocation2 + $0xae0] ss:$72 sps:$4 sm:$0xff]  }
 0x880   :  { %v13282_v40 = vadd.f32 %v10852_v39, %v13261_v55  ;;  %6134 = vmatpush1.bf16.msra.mxu1 %v12219_v32  ;;  %v5425_v55 = vrot.slane %v5420_v43, %v13141_v17  ;;  %v12291_v32 = vld [vmem:[#allocation2 + $0x934] ss:$72 sps:$4 sm:$0xff]  }
 0x881   :  { %6135 = vmatprep.subr.bf16.mxu1 %v12224_v34  ;;  %v12294_v34 = vld [vmem:[#allocation2 + $0x9c4] ss:$72 sps:$4 sm:$0xff]   ;;  %v13296_v39 = vld [vmem:[%s13392_s0] ss:$28 sps:$4 sm:$0xff]  }
 0x882   :  { %v12303_v43 = vld [vmem:[#allocation2 + $0xb74] ss:$72 sps:$4 sm:$0xff]  }
 0x884   :  { %6136 = vmatpush1.bf16.msra.mxu1 %v12222_v35  ;;  %v12292_v35 = vld [vmem:[#allocation2 + $0x9c0] ss:$72 sps:$4 sm:$0xff]  }
 0x887   :  { %6154 = vmatmul.mubr.bf16.vlgmr.msra.gmra.mrb[24].mxu1 %v13266_v58 }
 0x95a   :  { %v6155_v45 = vpop.f32.mrb[24].mxu1 }
 0x95b   :  { %v10994_v46 = vadd.f32 %v6155_v45, %v5425_v55  ;;  %v6157_v47 = vpop.f32.mrb[25].mxu1  ;;  %v12304_v45 = vld [vmem:[#allocation2 + $0xc00] ss:$72 sps:$4 sm:$0xff]  }
 0x95c   :  { %v10995_v49 = vadd.f32 %v6157_v47, %v5429_v44  ;;  %v6159_v58 = vpop.f32.mrb[26].mxu1  ;;  %v12307_v47 = vld [vmem:[#allocation2 + $0xc90] ss:$72 sps:$4 sm:$0xff]  }
 0x95d   :  { %v10996_v51 = vadd.f32 %v6159_v58, %v5425_v55  ;;  %v6161_v53 = vpop.f32.mrb[27].mxu1  ;;  %v6164_v57 = vmax.f32 %v10994_v46, 0.0  ;;  %v12301_v55 = vld [vmem:[#allocation2 + $0xb70] ss:$72 sps:$4 sm:$0xff]   ;;  %v12309_v46 = vld [vmem:[#allocation2 + $0xc94] ss:$72 sps:$4 sm:$0xff]  }
 0x95e   :  { %v10997_v56 = vadd.f32 %v6161_v53, %v5429_v44  ;;  %v6165_v59 = vmax.f32 %v10995_v49, 0.0  ;;  %v12306_v44 = vld [vmem:[#allocation2 + $0xc04] ss:$72 sps:$4 sm:$0xff]   ;;  %v12310_v58 = vld [vmem:[#allocation2 + $0xd20] ss:$72 sps:$4 sm:$0xff]  }
 0x95f   :  { %v6166_v2 = vmax.f32 %v10996_v51, 0.0  ;;  %v12312_v49 = vld [vmem:[#allocation2 + $0xd24] ss:$72 sps:$4 sm:$0xff]   ;;  %v12315_v51 = vld [vmem:[#allocation2 + $0xdb4] ss:$72 sps:$4 sm:$0xff]  }
 0x960   :  { %v6167_v60 = vmax.f32 %v10997_v56, 0.0  ;;  %v12313_v53 = vld [vmem:[#allocation2 + $0xdb0] ss:$72 sps:$4 sm:$0xff]   ;;  %v12318_v56 = vld [vmem:[#allocation2 + $0xe44] ss:$72 sps:$4 sm:$0xff]  }
 0x961   :  { %v6168_v6 = vpack.c.bf16 %v6166_v2, %v6164_v57  ;;  %v12409_v57 = vld [vmem:[#allocation6 + $0x340] sm:$0xff]  }
 0x962   :  { %v6169_v61 = vpack.c.bf16 %v6167_v60, %v6165_v59  ;;  %v12410_v2 = vld [vmem:[#allocation6 + $0x300] sm:$0xff]   ;;  %v12411_v59 = vld [vmem:[#allocation6 + $0x348] sm:$0xff]   ;;  %10875 = vmatprep.subr.bf16.mxu1 %v12409_v57 }
 0x963   :  { %v12316_v60 = vld [vmem:[#allocation2 + $0xe40] ss:$72 sps:$4 sm:$0xff]   ;;  %10876 = vmatpush3.bf16.msra.mxu1 %v12410_v2  ;;  %v12379_v57 = vld [vmem:[#allocation2 + $0x1a10] ss:$72 sps:$4 sm:$0xff]   ;;  %v12384_v2 = vld [vmem:[#allocation2 + $0x1aa4] ss:$72 sps:$4 sm:$0xff]  }
 0x964   :  { %6330 = vmatprep.mubr.bf16.mxu0 %v6169_v61  ;;  %v12412_v61 = vld [vmem:[#allocation6 + $0x308] sm:$0xff]   ;;  %10877 = vmatprep.subr.bf16.mxu1 %v12411_v59 }
 0x965   :  { %6331 = vmatmul.mubr.bf16.vlgmr.msra.gmra.mrb[20].mxu0 %v6168_v6  ;;  %v12321_v6 = vld [vmem:[#allocation2 + $0xed4] ss:$72 sps:$4 sm:$0xff]   ;;  %v12382_v59 = vld [vmem:[#allocation2 + $0x1aa0] ss:$72 sps:$4 sm:$0xff]  }
 0x966   :  { %7026 = vmatpush1.bf16.msra.mxu0 %v12241_v9  ;;  %7057 = vmatprep.mubr.bf16.mxu0 %v13290_v0  ;;  %v12413_v9 = vld [vmem:[#allocation6 + $0x350] sm:$0xff]  }
 0x967   :  { %7027 = vmatprep.subr.bf16.mxu0 %v12246_v62  ;;  %v12319_v62 = vld [vmem:[#allocation2 + $0xed0] ss:$72 sps:$4 sm:$0xff]   ;;  %10878 = vmatpush3.bf16.msra.mxu1 %v12412_v61  ;;  %v12390_v61 = vld [vmem:[#allocation2 + $0x1bc4] ss:$72 sps:$4 sm:$0xff]  }
 0x968   :  { %10879 = vmatprep.subr.bf16.mxu1 %v12413_v9  ;;  %v13320_v9 = vld [vmem:[%s13392_s0 + $0x10] ss:$28 sps:$4 sm:$0xff]  }
 0x96a   :  { %7028 = vmatpush1.bf16.msra.mxu0 %v12244_v63  ;;  %v12324_v63 = vld [vmem:[#allocation2 + $0xf64] ss:$72 sps:$4 sm:$0xff]  }
 0x96b   :  { %7029 = vmatprep.subr.bf16.mxu0 %v12249_v3  ;;  %v12414_v3 = vld [vmem:[#allocation6 + $0x310] sm:$0xff]  }
 0x96c   :  { %10880 = vmatpush3.bf16.msra.mxu1 %v12414_v3  ;;  %v12391_v3 = vld [vmem:[#allocation2 + $0x1c50] ss:$72 sps:$4 sm:$0xff]  }
 0x96e   :  { %7030 = vmatpush1.bf16.msra.mxu0 %v12247_v1  ;;  %v12415_v1 = vld [vmem:[#allocation6 + $0x358] sm:$0xff]  }
 0x96f   :  { %7031 = vmatprep.subr.bf16.mxu0 %v12252_v5  ;;  %v12322_v5 = vld [vmem:[#allocation2 + $0xf60] ss:$72 sps:$4 sm:$0xff]   ;;  %10881 = vmatprep.subr.bf16.mxu1 %v12415_v1  ;;  %v12396_v1 = vld [vmem:[#allocation2 + $0x1ce4] ss:$72 sps:$4 sm:$0xff]  }
 0x972   :  { %7032 = vmatpush1.bf16.msra.mxu0 %v12250_v8  ;;  %v12327_v8 = vld [vmem:[#allocation2 + $0xff4] ss:$72 sps:$4 sm:$0xff]  }
 0x973   :  { %7033 = vmatprep.subr.bf16.mxu0 %v12255_v7  ;;  %v12416_v7 = vld [vmem:[#allocation6 + $0x318] sm:$0xff]  }
 0x974   :  { %10882 = vmatpush3.bf16.msra.mxu1 %v12416_v7  ;;  %v12397_v7 = vld [vmem:[#allocation2 + $0x1d70] ss:$72 sps:$4 sm:$0xff]  }
 0x976   :  { %7034 = vmatpush1.bf16.msra.mxu0 %v12253_v10  ;;  %v12417_v10 = vld [vmem:[#allocation6 + $0x360] sm:$0xff]  }
 0x977   :  { %7035 = vmatprep.subr.bf16.mxu0 %v12258_v33  ;;  %v12325_v33 = vld [vmem:[#allocation2 + $0xff0] ss:$72 sps:$4 sm:$0xff]   ;;  %10883 = vmatprep.subr.bf16.mxu1 %v12417_v10  ;;  %v12402_v10 = vld [vmem:[#allocation2 + $0x1e04] ss:$72 sps:$4 sm:$0xff]  }
 0x97a   :  { %7036 = vmatpush1.bf16.msra.mxu0 %v12256_v12  ;;  %v12330_v12 = vld [vmem:[#allocation2 + $0x1084] ss:$72 sps:$4 sm:$0xff]  }
 0x97b   :  { %7037 = vmatprep.subr.bf16.mxu0 %v12261_v13  ;;  %v12418_v13 = vld [vmem:[#allocation6 + $0x320] sm:$0xff]  }
 0x97c   :  { %10884 = vmatpush3.bf16.msra.mxu1 %v12418_v13 }
 0x97e   :  { %7038 = vmatpush1.bf16.msra.mxu0 %v12259_v23  ;;  %v12419_v23 = vld [vmem:[#allocation6 + $0x368] sm:$0xff]  }
 0x97f   :  { %7039 = vmatprep.subr.bf16.mxu0 %v12264_v14  ;;  %v12328_v14 = vld [vmem:[#allocation2 + $0x1080] ss:$72 sps:$4 sm:$0xff]   ;;  %10885 = vmatprep.subr.bf16.mxu1 %v12419_v23 }
 0x982   :  { %7040 = vmatpush1.bf16.msra.mxu0 %v12262_v25  ;;  %v12333_v25 = vld [vmem:[#allocation2 + $0x1114] ss:$72 sps:$4 sm:$0xff]  }
 0x983   :  { %7041 = vmatprep.subr.bf16.mxu0 %v12267_v15  ;;  %v12420_v15 = vld [vmem:[#allocation6 + $0x328] sm:$0xff]  }
 0x984   :  { %10886 = vmatpush3.bf16.msra.mxu1 %v12420_v15  ;;  %v12403_v15 = vld [vmem:[#allocation2 + $0x1e90] ss:$72 sps:$4 sm:$0xff]  }
 0x986   :  { %7042 = vmatpush1.bf16.msra.mxu0 %v12265_v16  ;;  %v12331_v16 = vld [vmem:[#allocation2 + $0x1110] ss:$72 sps:$4 sm:$0xff]  }
 0x987   :  { %7043 = vmatprep.subr.bf16.mxu0 %v12270_v20  ;;  %v12336_v20 = vld [vmem:[#allocation2 + $0x11a4] ss:$72 sps:$4 sm:$0xff]  }
 0x98a   :  { %7044 = vmatpush1.bf16.msra.mxu0 %v12268_v21  ;;  %v12334_v21 = vld [vmem:[#allocation2 + $0x11a0] ss:$72 sps:$4 sm:$0xff]  }
 0x98b   :  { %7045 = vmatprep.subr.bf16.mxu0 %v12273_v22  ;;  %v12339_v22 = vld [vmem:[#allocation2 + $0x1234] ss:$72 sps:$4 sm:$0xff]  }
 0x98e   :  { %7046 = vmatpush1.bf16.msra.mxu0 %v12271_v50  ;;  %v12337_v50 = vld [vmem:[#allocation2 + $0x1230] ss:$72 sps:$4 sm:$0xff]  }
 0x98f   :  { %7047 = vmatprep.subr.bf16.mxu0 %v12276_v4  ;;  %v12342_v4 = vld [vmem:[#allocation2 + $0x12c4] ss:$72 sps:$4 sm:$0xff]  }
 0x992   :  { %7048 = vmatpush1.bf16.msra.mxu0 %v12274_v24  ;;  %v13308_v24 = vld [vmem:[%s13392_s0 + $0x8] ss:$28 sps:$4 sm:$0xff]  }
 0x993   :  { %7049 = vmatprep.subr.bf16.mxu0 %v12279_v26  ;;  %v12340_v26 = vld [vmem:[#allocation2 + $0x12c0] ss:$72 sps:$4 sm:$0xff]  }
 0x996   :  { %7050 = vmatpush1.bf16.msra.mxu0 %v12277_v27  ;;  %v13314_v27 = vld [vmem:[%s13392_s0 + $0x14] ss:$28 sps:$4 sm:$0xff]  }
 0x997   :  { %7051 = vmatprep.subr.bf16.mxu0 %v12282_v54  ;;  %v12345_v54 = vld [vmem:[#allocation2 + $0x1354] ss:$72 sps:$4 sm:$0xff]  }
 0x99a   :  { %7052 = vmatpush1.bf16.msra.mxu0 %v12280_v29  ;;  %v12343_v29 = vld [vmem:[#allocation2 + $0x1350] ss:$72 sps:$4 sm:$0xff]  }
 0x99b   :  { %7053 = vmatprep.subr.bf16.mxu0 %v12285_v28  ;;  %v12348_v28 = vld [vmem:[#allocation2 + $0x13e4] ss:$72 sps:$4 sm:$0xff]  }
 0x99e   :  { %7054 = vmatpush1.bf16.msra.mxu0 %v12283_v30  ;;  %v12346_v30 = vld [vmem:[#allocation2 + $0x13e0] ss:$72 sps:$4 sm:$0xff]  }
 0x99f   :  { %7055 = vmatprep.subr.bf16.mxu0 %v12288_v48  ;;  %v12351_v48 = vld [vmem:[#allocation2 + $0x1474] ss:$72 sps:$4 sm:$0xff]  }
 0x9a2   :  { %7056 = vmatpush1.bf16.msra.mxu0 %v12286_v31  ;;  %v12349_v31 = vld [vmem:[#allocation2 + $0x1470] ss:$72 sps:$4 sm:$0xff]  }
 0x9a3   :  { %7068 = vmatprep.subr.bf16.mxu0 %v12291_v32  ;;  %v12354_v32 = vld [vmem:[#allocation2 + $0x1504] ss:$72 sps:$4 sm:$0xff]  }
 0x9a5   :  { %7058 = vmatmul.mubr.bf16.vlgmr.msra.gmra.mrb[24].mxu0 %v13296_v39 }
 0x9a6   :  { %7069 = vmatpush1.bf16.msra.mxu0 %v12289_v36  ;;  %7100 = vmatprep.mubr.bf16.mxu0 %v13302_v41  ;;  %v12352_v36 = vld [vmem:[#allocation2 + $0x1500] ss:$72 sps:$4 sm:$0xff]  }
 0x9a7   :  { %7070 = vmatprep.subr.bf16.mxu0 %v12294_v34  ;;  %v12357_v34 = vld [vmem:[#allocation2 + $0x1594] ss:$72 sps:$4 sm:$0xff]  }
 0x9aa   :  { %7071 = vmatpush1.bf16.msra.mxu0 %v12292_v35  ;;  %v12355_v35 = vld [vmem:[#allocation2 + $0x1590] ss:$72 sps:$4 sm:$0xff]  }
 0x9ab   :  { %7072 = vmatprep.subr.bf16.mxu0 %v12297_v37  ;;  %v12360_v37 = vld [vmem:[#allocation2 + $0x1624] ss:$72 sps:$4 sm:$0xff]  }
 0x9ae   :  { %7073 = vmatpush1.bf16.msra.mxu0 %v12295_v42  ;;  %v12358_v42 = vld [vmem:[#allocation2 + $0x1620] ss:$72 sps:$4 sm:$0xff]  }
 0x9af   :  { %7074 = vmatprep.subr.bf16.mxu0 %v12300_v11  ;;  %v12363_v11 = vld [vmem:[#allocation2 + $0x16b4] ss:$72 sps:$4 sm:$0xff]  }
 0x9b2   :  { %7075 = vmatpush1.bf16.msra.mxu0 %v12298_v52  ;;  %v12361_v52 = vld [vmem:[#allocation2 + $0x16b0] ss:$72 sps:$4 sm:$0xff]  }
 0x9b3   :  { %7076 = vmatprep.subr.bf16.mxu0 %v12303_v43  ;;  %v12366_v43 = vld [vmem:[#allocation2 + $0x1744] ss:$72 sps:$4 sm:$0xff]  }
 0x9b6   :  { %7077 = vmatpush1.bf16.msra.mxu0 %v12301_v55  ;;  %v12364_v55 = vld [vmem:[#allocation2 + $0x1740] ss:$72 sps:$4 sm:$0xff]  }
 0x9b7   :  { %7078 = vmatprep.subr.bf16.mxu0 %v12306_v44  ;;  %v12369_v44 = vld [vmem:[#allocation2 + $0x17d4] ss:$72 sps:$4 sm:$0xff]  }
 0x9ba   :  { %7079 = vmatpush1.bf16.msra.mxu0 %v12304_v45  ;;  %v12367_v45 = vld [vmem:[#allocation2 + $0x17d0] ss:$72 sps:$4 sm:$0xff]  }
 0x9bb   :  { %7080 = vmatprep.subr.bf16.mxu0 %v12309_v46  ;;  %v12372_v46 = vld [vmem:[#allocation2 + $0x1864] ss:$72 sps:$4 sm:$0xff]  }
 0x9be   :  { %7081 = vmatpush1.bf16.msra.mxu0 %v12307_v47  ;;  %v12370_v47 = vld [vmem:[#allocation2 + $0x1860] ss:$72 sps:$4 sm:$0xff]  }
 0x9bf   :  { %7082 = vmatprep.subr.bf16.mxu0 %v12312_v49  ;;  %v12375_v49 = vld [vmem:[#allocation2 + $0x18f4] ss:$72 sps:$4 sm:$0xff]  }
 0x9c2   :  { %7083 = vmatpush1.bf16.msra.mxu0 %v12310_v58  ;;  %v12373_v58 = vld [vmem:[#allocation2 + $0x18f0] ss:$72 sps:$4 sm:$0xff]  }
 0x9c3   :  { %7084 = vmatprep.subr.bf16.mxu0 %v12315_v51  ;;  %v12378_v51 = vld [vmem:[#allocation2 + $0x1984] ss:$72 sps:$4 sm:$0xff]  }
 0x9c6   :  { %7085 = vmatpush1.bf16.msra.mxu0 %v12313_v53  ;;  %v12376_v53 = vld [vmem:[#allocation2 + $0x1980] ss:$72 sps:$4 sm:$0xff]  }
 0x9c7   :  { %7086 = vmatprep.subr.bf16.mxu0 %v12318_v56  ;;  %v12381_v56 = vld [vmem:[#allocation2 + $0x1a14] ss:$72 sps:$4 sm:$0xff]  }
 0x9ca   :  { %7087 = vmatpush1.bf16.msra.mxu0 %v12316_v60  ;;  %v12387_v60 = vld [vmem:[#allocation2 + $0x1b34] ss:$72 sps:$4 sm:$0xff]  }
 0x9cb   :  { %7088 = vmatprep.subr.bf16.mxu0 %v12321_v6  ;;  %v12385_v6 = vld [vmem:[#allocation2 + $0x1b30] ss:$72 sps:$4 sm:$0xff]  }
 0x9ce   :  { %7089 = vmatpush1.bf16.msra.mxu0 %v12319_v62  ;;  %v12388_v62 = vld [vmem:[#allocation2 + $0x1bc0] ss:$72 sps:$4 sm:$0xff]  }
 0x9cf   :  { %7090 = vmatprep.subr.bf16.mxu0 %v12324_v63  ;;  %v12393_v63 = vld [vmem:[#allocation2 + $0x1c54] ss:$72 sps:$4 sm:$0xff]  }
 0x9d2   :  { %7091 = vmatpush1.bf16.msra.mxu0 %v12322_v5  ;;  %v12394_v5 = vld [vmem:[#allocation2 + $0x1ce0] ss:$72 sps:$4 sm:$0xff]  }
 0x9d3   :  { %7092 = vmatprep.subr.bf16.mxu0 %v12327_v8  ;;  %v12399_v8 = vld [vmem:[#allocation2 + $0x1d74] ss:$72 sps:$4 sm:$0xff]  }
 0x9d6   :  { %7093 = vmatpush1.bf16.msra.mxu0 %v12325_v33  ;;  %v12400_v33 = vld [vmem:[#allocation2 + $0x1e00] ss:$72 sps:$4 sm:$0xff]  }
 0x9d7   :  { %7094 = vmatprep.subr.bf16.mxu0 %v12330_v12  ;;  %v12405_v12 = vld [vmem:[#allocation2 + $0x1e94] ss:$72 sps:$4 sm:$0xff]  }
 0x9da   :  { %7095 = vmatpush1.bf16.msra.mxu0 %v12328_v14 }
 0x9db   :  { %7096 = vmatprep.subr.bf16.mxu0 %v12333_v25 }
 0x9de   :  { %7097 = vmatpush1.bf16.msra.mxu0 %v12331_v16 }
 0x9df   :  { %7098 = vmatprep.subr.bf16.mxu0 %v12336_v20  ;;  %v12408_v20 = vld [vmem:[#allocation2 + $0x1f24] ss:$72 sps:$4 sm:$0xff]  }
 0x9e2   :  { %7099 = vmatpush1.bf16.msra.mxu0 %v12334_v21 }
 0x9e3   :  { %7111 = vmatprep.subr.bf16.mxu0 %v12339_v22 }
 0x9e5   :  { %7101 = vmatmul.mubr.bf16.vlgmr.msra.gmra.mrb[24].mxu0 %v13308_v24 }
 0x9e6   :  { %7112 = vmatpush1.bf16.msra.mxu0 %v12337_v50  ;;  %7143 = vmatprep.mubr.bf16.mxu0 %v13314_v27 }
 0x9e7   :  { %7113 = vmatprep.subr.bf16.mxu0 %v12342_v4  ;;  %v12406_v4 = vld [vmem:[#allocation2 + $0x1f20] ss:$72 sps:$4 sm:$0xff]  }
 0x9ea   :  { %7114 = vmatpush1.bf16.msra.mxu0 %v12340_v26  ;;  %v13333_v26 = vld [vmem:[%s13392_s0 + $0x18] ss:$28 sps:$4 sm:$0xff]  }
 0x9eb   :  { %7115 = vmatprep.subr.bf16.mxu0 %v12345_v54  ;;  %v12421_v54 = vld [vmem:[#allocation6 + $0x370] sm:$0xff]  }
 0x9ec   :  { %10887 = vmatprep.subr.bf16.mxu1 %v12421_v54  ;;  %v12475_v54 = vld [vmem:[#allocation2 + $0x93c] ss:$72 sps:$4 sm:$0xff]  }
 0x9ee   :  { %7116 = vmatpush1.bf16.msra.mxu0 %v12343_v29  ;;  %v12422_v29 = vld [vmem:[#allocation6 + $0x330] sm:$0xff]  }
 0x9ef   :  { %7117 = vmatprep.subr.bf16.mxu0 %v12348_v28  ;;  %10888 = vmatpush3.bf16.msra.mxu1 %v12422_v29  ;;  %v12424_v28 = vld [vmem:[#allocation6 + $0x338] sm:$0xff]   ;;  %v12473_v29 = vld [vmem:[#allocation2 + $0x938] ss:$72 sps:$4 sm:$0xff]  }
 0x9f2   :  { %7118 = vmatpush1.bf16.msra.mxu0 %v12346_v30  ;;  %v6453_v30 = vld [vmem:[#allocation4 + $0xc] sm:$0x3] }
 0x9f3   :  { %7119 = vmatprep.subr.bf16.mxu0 %v12351_v48  ;;  %v6458_v48 = vrot.slane %v6453_v30, %v13141_v17 }
 0x9f6   :  { %7120 = vmatpush1.bf16.msra.mxu0 %v12349_v31  ;;  %v6462_v31 = vrot.slane %v6453_v30, %v13143_v18  ;;  %v12479_v30 = vld [vmem:[#allocation2 + $0xa58] ss:$72 sps:$4 sm:$0xff]  }
 0x9f7   :  { %7121 = vmatprep.subr.bf16.mxu0 %v12354_v32 }
 0x9fa   :  { %7122 = vmatpush1.bf16.msra.mxu0 %v12352_v36 }
 0x9fb   :  { %7123 = vmatprep.subr.bf16.mxu0 %v12357_v34 }
 0x9fe   :  { %7124 = vmatpush1.bf16.msra.mxu0 %v12355_v35 }
 0x9ff   :  { %7125 = vmatprep.subr.bf16.mxu0 %v12360_v37 }
 0xa02   :  { %7126 = vmatpush1.bf16.msra.mxu0 %v12358_v42 }
 0xa03   :  { %7127 = vmatprep.subr.bf16.mxu0 %v12363_v11 }
 0xa06   :  { %7128 = vmatpush1.bf16.msra.mxu0 %v12361_v52 }
 0xa07   :  { %7129 = vmatprep.subr.bf16.mxu0 %v12366_v43 }
 0xa0a   :  { %7130 = vmatpush1.bf16.msra.mxu0 %v12364_v55 }
 0xa0b   :  { %7131 = vmatprep.subr.bf16.mxu0 %v12369_v44 }
 0xa0e   :  { %7132 = vmatpush1.bf16.msra.mxu0 %v12367_v45 }
 0xa0f   :  { %7133 = vmatprep.subr.bf16.mxu0 %v12372_v46 }
 0xa12   :  { %7134 = vmatpush1.bf16.msra.mxu0 %v12370_v47 }
 0xa13   :  { %7135 = vmatprep.subr.bf16.mxu0 %v12375_v49  ;;  %v12425_v49 = vld [vmem:[#allocation2 + $0x38] ss:$72 sps:$4 sm:$0xff]  }
 0xa16   :  { %7136 = vmatpush1.bf16.msra.mxu0 %v12373_v58  ;;  %v12430_v58 = vld [vmem:[#allocation2 + $0xcc] ss:$72 sps:$4 sm:$0xff]  }
 0xa17   :  { %7137 = vmatprep.subr.bf16.mxu0 %v12378_v51  ;;  %v12428_v51 = vld [vmem:[#allocation2 + $0xc8] ss:$72 sps:$4 sm:$0xff]  }
 0xa1a   :  { %7138 = vmatpush1.bf16.msra.mxu0 %v12376_v53  ;;  %v12433_v53 = vld [vmem:[#allocation2 + $0x15c] ss:$72 sps:$4 sm:$0xff]  }
 0xa1b   :  { %7139 = vmatprep.subr.bf16.mxu0 %v12381_v56  ;;  %v12431_v56 = vld [vmem:[#allocation2 + $0x158] ss:$72 sps:$4 sm:$0xff]  }
 0xa1e   :  { %7140 = vmatpush1.bf16.msra.mxu0 %v12379_v57  ;;  %v12436_v57 = vld [vmem:[#allocation2 + $0x1ec] ss:$72 sps:$4 sm:$0xff]  }
 0xa1f   :  { %7141 = vmatprep.subr.bf16.mxu0 %v12384_v2  ;;  %v12434_v2 = vld [vmem:[#allocation2 + $0x1e8] ss:$72 sps:$4 sm:$0xff]  }
 0xa22   :  { %7142 = vmatpush1.bf16.msra.mxu0 %v12382_v59  ;;  %v12439_v59 = vld [vmem:[#allocation2 + $0x27c] ss:$72 sps:$4 sm:$0xff]  }
 0xa23   :  { %7154 = vmatprep.subr.bf16.mxu0 %v12387_v60  ;;  %v12437_v60 = vld [vmem:[#allocation2 + $0x278] ss:$72 sps:$4 sm:$0xff]  }
 0xa25   :  { %7144 = vmatmul.mubr.bf16.vlgmr.msra.gmra.mrb[24].mxu0 %v13320_v9 }
 0xa26   :  { %7155 = vmatpush1.bf16.msra.mxu0 %v12385_v6  ;;  %7186 = vmatprep.mubr.bf16.mxu0 %v12980_v19  ;;  %v12442_v6 = vld [vmem:[#allocation2 + $0x30c] ss:$72 sps:$4 sm:$0xff]  }
 0xa27   :  { %7156 = vmatprep.subr.bf16.mxu0 %v12390_v61  ;;  %v12440_v61 = vld [vmem:[#allocation2 + $0x308] ss:$72 sps:$4 sm:$0xff]  }
 0xa2a   :  { %7157 = vmatpush1.bf16.msra.mxu0 %v12388_v62  ;;  %v12445_v62 = vld [vmem:[#allocation2 + $0x39c] ss:$72 sps:$4 sm:$0xff]  }
 0xa2b   :  { %7158 = vmatprep.subr.bf16.mxu0 %v12393_v63  ;;  %v12448_v63 = vld [vmem:[#allocation2 + $0x42c] ss:$72 sps:$4 sm:$0xff]  }
 0xa2e   :  { %7159 = vmatpush1.bf16.msra.mxu0 %v12391_v3  ;;  %v12446_v3 = vld [vmem:[#allocation2 + $0x428] ss:$72 sps:$4 sm:$0xff]  }
 0xa2f   :  { %7160 = vmatprep.subr.bf16.mxu0 %v12396_v1  ;;  %v12451_v1 = vld [vmem:[#allocation2 + $0x4bc] ss:$72 sps:$4 sm:$0xff]  }
 0xa32   :  { %7161 = vmatpush1.bf16.msra.mxu0 %v12394_v5  ;;  %v12449_v5 = vld [vmem:[#allocation2 + $0x4b8] ss:$72 sps:$4 sm:$0xff]  }
 0xa33   :  { %7162 = vmatprep.subr.bf16.mxu0 %v12399_v8  ;;  %v12454_v8 = vld [vmem:[#allocation2 + $0x54c] ss:$72 sps:$4 sm:$0xff]  }
 0xa36   :  { %7163 = vmatpush1.bf16.msra.mxu0 %v12397_v7  ;;  %v12452_v7 = vld [vmem:[#allocation2 + $0x548] ss:$72 sps:$4 sm:$0xff]  }
 0xa37   :  { %7164 = vmatprep.subr.bf16.mxu0 %v12402_v10  ;;  %v12457_v10 = vld [vmem:[#allocation2 + $0x5dc] ss:$72 sps:$4 sm:$0xff]  }
 0xa38   :  { %v10869_v13 = vpop.f32.mrb[20].mxu0 }
 0xa39   :  { %v10870_v23 = vpop.f32.mrb[21].mxu0 }
 0xa3a   :  { %v10871_v14 = vadd.f32 %v10870_v23, %v10869_v13  ;;  %7165 = vmatpush1.bf16.msra.mxu0 %v12400_v33  ;;  %v10872_v25 = vpop.f32.mrb[22].mxu0  ;;  %v12455_v33 = vld [vmem:[#allocation2 + $0x5d8] ss:$72 sps:$4 sm:$0xff]   ;;  %v12458_v13 = vld [vmem:[#allocation2 + $0x668] ss:$72 sps:$4 sm:$0xff]  }
 0xa3b   :  { %v10873_v16 = vpop.f32.mrb[23].mxu0  ;;  %7166 = vmatprep.subr.bf16.mxu0 %v12405_v12  ;;  %v12460_v12 = vld [vmem:[#allocation2 + $0x66c] ss:$72 sps:$4 sm:$0xff]   ;;  %v12463_v23 = vld [vmem:[#allocation2 + $0x6fc] ss:$72 sps:$4 sm:$0xff]  }
 0xa3c   :  { %v13325_v21 = vadd.f32 %v10871_v14, %v13279_v38  ;;  %v10874_v22 = vadd.f32 %v10873_v16, %v10872_v25  ;;  %v12423_v38 = vld [vmem:[#allocation6 + $0x378] sm:$0xff]   ;;  %v12461_v14 = vld [vmem:[#allocation2 + $0x6f8] ss:$72 sps:$4 sm:$0xff]   ;;  %v12469_v16 = vld [vmem:[#allocation2 + $0x81c] ss:$72 sps:$4 sm:$0xff]  }
 0xa3d   :  { %10889 = vmatprep.subr.bf16.mxu1 %v12423_v38  ;;  %v12466_v25 = vld [vmem:[#allocation2 + $0x78c] ss:$72 sps:$4 sm:$0xff]  }
 0xa3e   :  { %v13328_v50 = vadd.f32 %v10874_v22, %v13282_v40  ;;  %7167 = vmatpush1.bf16.msra.mxu0 %v12403_v15  ;;  %10890 = vmatpush3.bf16.msra.mxu1 %v12424_v28  ;;  %v12427_v40 = vld [vmem:[#allocation2 + $0x3c] ss:$72 sps:$4 sm:$0xff]   ;;  %v12464_v15 = vld [vmem:[#allocation2 + $0x788] ss:$72 sps:$4 sm:$0xff]   ;;  %v12472_v22 = vld [vmem:[#allocation2 + $0x8ac] ss:$72 sps:$4 sm:$0xff]  }
 0xa3f   :  { %7168 = vmatprep.subr.bf16.mxu0 %v12408_v20  ;;  %8058 = vmatprep.subr.bf16.mxu1 %v12427_v40  ;;  %v12467_v20 = vld [vmem:[#allocation2 + $0x818] ss:$72 sps:$4 sm:$0xff]   ;;  %v12478_v38 = vld [vmem:[#allocation2 + $0x9cc] ss:$72 sps:$4 sm:$0xff]   ;;  %v12476_v28 = vld [vmem:[#allocation2 + $0x9c8] ss:$72 sps:$4 sm:$0xff]  }
 0xa40   :  { %v12481_v40 = vld [vmem:[#allocation2 + $0xa5c] ss:$72 sps:$4 sm:$0xff]  }
 0xa42   :  { %7169 = vmatpush1.bf16.msra.mxu0 %v12406_v4  ;;  %v12470_v4 = vld [vmem:[#allocation2 + $0x8a8] ss:$72 sps:$4 sm:$0xff]  }
 0xa45   :  { %7187 = vmatmul.mubr.bf16.vlgmr.msra.gmra.mrb[24].mxu0 %v13333_v26 }
 0xb18   :  { %v7188_v32 = vpop.f32.mrb[24].mxu0 }
 0xb19   :  { %v10998_v36 = vadd.f32 %v7188_v32, %v6458_v48  ;;  %v7190_v34 = vpop.f32.mrb[25].mxu0  ;;  %v12487_v32 = vld [vmem:[#allocation2 + $0xb7c] ss:$72 sps:$4 sm:$0xff]  }
 0xb1a   :  { %v10999_v35 = vadd.f32 %v7190_v34, %v6462_v31  ;;  %v7192_v37 = vpop.f32.mrb[26].mxu0  ;;  %v12490_v34 = vld [vmem:[#allocation2 + $0xc0c] ss:$72 sps:$4 sm:$0xff]  }
 0xb1b   :  { %v11000_v42 = vadd.f32 %v7192_v37, %v6458_v48  ;;  %v7194_v11 = vpop.f32.mrb[27].mxu0  ;;  %v7197_v43 = vmax.f32 %v10998_v36, 0.0  ;;  %v12484_v48 = vld [vmem:[#allocation2 + $0xaec] ss:$72 sps:$4 sm:$0xff]   ;;  %v12485_v36 = vld [vmem:[#allocation2 + $0xb78] ss:$72 sps:$4 sm:$0xff]  }
 0xb1c   :  { %v11001_v52 = vadd.f32 %v7194_v11, %v6462_v31  ;;  %v7198_v44 = vmax.f32 %v10999_v35, 0.0  ;;  %v12482_v31 = vld [vmem:[#allocation2 + $0xae8] ss:$72 sps:$4 sm:$0xff]   ;;  %v12493_v35 = vld [vmem:[#allocation2 + $0xc9c] ss:$72 sps:$4 sm:$0xff]  }
 0xb1d   :  { %v7199_v55 = vmax.f32 %v11000_v42, 0.0  ;;  %v12496_v37 = vld [vmem:[#allocation2 + $0xd2c] ss:$72 sps:$4 sm:$0xff]   ;;  %v12494_v42 = vld [vmem:[#allocation2 + $0xd28] ss:$72 sps:$4 sm:$0xff]  }
 0xb1e   :  { %v7200_v45 = vmax.f32 %v11001_v52, 0.0  ;;  %v12499_v11 = vld [vmem:[#allocation2 + $0xdbc] ss:$72 sps:$4 sm:$0xff]   ;;  %v12497_v52 = vld [vmem:[#allocation2 + $0xdb8] ss:$72 sps:$4 sm:$0xff]  }
 0xb1f   :  { %v7201_v46 = vpack.c.bf16 %v7199_v55, %v7197_v43  ;;  %v12502_v43 = vld [vmem:[#allocation2 + $0xe4c] ss:$72 sps:$4 sm:$0xff]  }
 0xb20   :  { %v7202_v47 = vpack.c.bf16 %v7200_v45, %v7198_v44  ;;  %v12593_v55 = vld [vmem:[#allocation6 + $0x3c0] sm:$0xff]   ;;  %v12595_v45 = vld [vmem:[#allocation6 + $0x3c8] sm:$0xff]  }
 0xb21   :  { %v12594_v44 = vld [vmem:[#allocation6 + $0x380] sm:$0xff]   ;;  %10897 = vmatprep.subr.bf16.mxu0 %v12593_v55  ;;  %v12571_v55 = vld [vmem:[#allocation2 + $0x1b3c] ss:$72 sps:$4 sm:$0xff]  }
 0xb22   :  { %7363 = vmatprep.mubr.bf16.mxu1 %v7202_v47  ;;  %v12505_v47 = vld [vmem:[#allocation2 + $0xedc] ss:$72 sps:$4 sm:$0xff]   ;;  %10898 = vmatpush3.bf16.msra.mxu0 %v12594_v44  ;;  %v12569_v44 = vld [vmem:[#allocation2 + $0x1b38] ss:$72 sps:$4 sm:$0xff]  }
 0xb23   :  { %7364 = vmatmul.mubr.bf16.vlgmr.msra.gmra.mrb[28].mxu1 %v7201_v46  ;;  %v12500_v46 = vld [vmem:[#allocation2 + $0xe48] ss:$72 sps:$4 sm:$0xff]   ;;  %10899 = vmatprep.subr.bf16.mxu0 %v12595_v45  ;;  %v12574_v45 = vld [vmem:[#allocation2 + $0x1bcc] ss:$72 sps:$4 sm:$0xff]  }
 0xb24   :  { %8059 = vmatpush1.bf16.msra.mxu1 %v12425_v49  ;;  %8090 = vmatprep.mubr.bf16.mxu1 %v13290_v0  ;;  %v12443_v0 = vld [vmem:[#allocation2 + $0x398] ss:$72 sps:$4 sm:$0xff]  }
 0xb25   :  { %8060 = vmatprep.subr.bf16.mxu1 %v12430_v58  ;;  %v12596_v49 = vld [vmem:[#allocation6 + $0x388] sm:$0xff]   ;;  %v12597_v58 = vld [vmem:[#allocation6 + $0x3d0] sm:$0xff]  }
 0xb26   :  { %10900 = vmatpush3.bf16.msra.mxu0 %v12596_v49  ;;  %v12575_v49 = vld [vmem:[#allocation2 + $0x1c58] ss:$72 sps:$4 sm:$0xff]  }
 0xb27   :  { %10901 = vmatprep.subr.bf16.mxu0 %v12597_v58  ;;  %v12580_v58 = vld [vmem:[#allocation2 + $0x1cec] ss:$72 sps:$4 sm:$0xff]  }
 0xb28   :  { %8061 = vmatpush1.bf16.msra.mxu1 %v12428_v51  ;;  %v12503_v51 = vld [vmem:[#allocation2 + $0xed8] ss:$72 sps:$4 sm:$0xff]  }
 0xb29   :  { %8062 = vmatprep.subr.bf16.mxu1 %v12433_v53  ;;  %v12508_v53 = vld [vmem:[#allocation2 + $0xf6c] ss:$72 sps:$4 sm:$0xff]  }
 0xb2c   :  { %8063 = vmatpush1.bf16.msra.mxu1 %v12431_v56  ;;  %v12598_v56 = vld [vmem:[#allocation6 + $0x390] sm:$0xff]  }
 0xb2d   :  { %8064 = vmatprep.subr.bf16.mxu1 %v12436_v57  ;;  %v12599_v57 = vld [vmem:[#allocation6 + $0x3d8] sm:$0xff]   ;;  %10902 = vmatpush3.bf16.msra.mxu0 %v12598_v56  ;;  %v12581_v56 = vld [vmem:[#allocation2 + $0x1d78] ss:$72 sps:$4 sm:$0xff]  }
 0xb2e   :  { %10903 = vmatprep.subr.bf16.mxu0 %v12599_v57  ;;  %v12586_v57 = vld [vmem:[#allocation2 + $0x1e0c] ss:$72 sps:$4 sm:$0xff]  }
 0xb30   :  { %8065 = vmatpush1.bf16.msra.mxu1 %v12434_v2  ;;  %v12506_v2 = vld [vmem:[#allocation2 + $0xf68] ss:$72 sps:$4 sm:$0xff]  }
 0xb31   :  { %8066 = vmatprep.subr.bf16.mxu1 %v12439_v59  ;;  %v12511_v59 = vld [vmem:[#allocation2 + $0xffc] ss:$72 sps:$4 sm:$0xff]  }
 0xb34   :  { %8067 = vmatpush1.bf16.msra.mxu1 %v12437_v60  ;;  %v12600_v60 = vld [vmem:[#allocation6 + $0x398] sm:$0xff]  }
 0xb35   :  { %8068 = vmatprep.subr.bf16.mxu1 %v12442_v6  ;;  %v12601_v6 = vld [vmem:[#allocation6 + $0x3e0] sm:$0xff]   ;;  %10904 = vmatpush3.bf16.msra.mxu0 %v12600_v60 }
 0xb36   :  { %10905 = vmatprep.subr.bf16.mxu0 %v12601_v6 }
 0xb38   :  { %8069 = vmatpush1.bf16.msra.mxu1 %v12440_v61  ;;  %v12509_v61 = vld [vmem:[#allocation2 + $0xff8] ss:$72 sps:$4 sm:$0xff]  }
 0xb39   :  { %8070 = vmatprep.subr.bf16.mxu1 %v12445_v62  ;;  %v12514_v62 = vld [vmem:[#allocation2 + $0x108c] ss:$72 sps:$4 sm:$0xff]  }
 0xb3c   :  { %8071 = vmatpush1.bf16.msra.mxu1 %v12443_v0  ;;  %v12602_v0 = vld [vmem:[#allocation6 + $0x3a0] sm:$0xff]  }
 0xb3d   :  { %8072 = vmatprep.subr.bf16.mxu1 %v12448_v63  ;;  %v12603_v63 = vld [vmem:[#allocation6 + $0x3e8] sm:$0xff]   ;;  %10906 = vmatpush3.bf16.msra.mxu0 %v12602_v0 }
 0xb3e   :  { %10907 = vmatprep.subr.bf16.mxu0 %v12603_v63  ;;  %v12592_v63 = vld [vmem:[#allocation2 + $0x1f2c] ss:$72 sps:$4 sm:$0xff]  }
 0xb40   :  { %8073 = vmatpush1.bf16.msra.mxu1 %v12446_v3  ;;  %v12512_v3 = vld [vmem:[#allocation2 + $0x1088] ss:$72 sps:$4 sm:$0xff]  }
 0xb41   :  { %8074 = vmatprep.subr.bf16.mxu1 %v12451_v1  ;;  %v12517_v1 = vld [vmem:[#allocation2 + $0x111c] ss:$72 sps:$4 sm:$0xff]  }
 0xb44   :  { %8075 = vmatpush1.bf16.msra.mxu1 %v12449_v5  ;;  %v12604_v5 = vld [vmem:[#allocation6 + $0x3a8] sm:$0xff]  }
 0xb45   :  { %8076 = vmatprep.subr.bf16.mxu1 %v12454_v8  ;;  %v12515_v8 = vld [vmem:[#allocation2 + $0x1118] ss:$72 sps:$4 sm:$0xff]   ;;  %10908 = vmatpush3.bf16.msra.mxu0 %v12604_v5 }
 0xb48   :  { %8077 = vmatpush1.bf16.msra.mxu1 %v12452_v7  ;;  %v12520_v7 = vld [vmem:[#allocation2 + $0x11ac] ss:$72 sps:$4 sm:$0xff]  }
 0xb49   :  { %8078 = vmatprep.subr.bf16.mxu1 %v12457_v10  ;;  %v12518_v10 = vld [vmem:[#allocation2 + $0x11a8] ss:$72 sps:$4 sm:$0xff]  }
 0xb4c   :  { %8079 = vmatpush1.bf16.msra.mxu1 %v12455_v33  ;;  %v12523_v33 = vld [vmem:[#allocation2 + $0x123c] ss:$72 sps:$4 sm:$0xff]  }
 0xb4d   :  { %8080 = vmatprep.subr.bf16.mxu1 %v12460_v12  ;;  %v12521_v12 = vld [vmem:[#allocation2 + $0x1238] ss:$72 sps:$4 sm:$0xff]  }
 0xb50   :  { %8081 = vmatpush1.bf16.msra.mxu1 %v12458_v13  ;;  %v12526_v13 = vld [vmem:[#allocation2 + $0x12cc] ss:$72 sps:$4 sm:$0xff]  }
 0xb51   :  { %8082 = vmatprep.subr.bf16.mxu1 %v12463_v23  ;;  %v12524_v23 = vld [vmem:[#allocation2 + $0x12c8] ss:$72 sps:$4 sm:$0xff]  }
 0xb54   :  { %8083 = vmatpush1.bf16.msra.mxu1 %v12461_v14  ;;  %v12529_v14 = vld [vmem:[#allocation2 + $0x135c] ss:$72 sps:$4 sm:$0xff]  }
 0xb55   :  { %8084 = vmatprep.subr.bf16.mxu1 %v12466_v25  ;;  %v12527_v25 = vld [vmem:[#allocation2 + $0x1358] ss:$72 sps:$4 sm:$0xff]  }
 0xb58   :  { %8085 = vmatpush1.bf16.msra.mxu1 %v12464_v15  ;;  %v12532_v15 = vld [vmem:[#allocation2 + $0x13ec] ss:$72 sps:$4 sm:$0xff]  }
 0xb59   :  { %8086 = vmatprep.subr.bf16.mxu1 %v12469_v16  ;;  %v12530_v16 = vld [vmem:[#allocation2 + $0x13e8] ss:$72 sps:$4 sm:$0xff]  }
 0xb5c   :  { %8087 = vmatpush1.bf16.msra.mxu1 %v12467_v20  ;;  %v12535_v20 = vld [vmem:[#allocation2 + $0x147c] ss:$72 sps:$4 sm:$0xff]  }
 0xb5d   :  { %8088 = vmatprep.subr.bf16.mxu1 %v12472_v22  ;;  %v12533_v22 = vld [vmem:[#allocation2 + $0x1478] ss:$72 sps:$4 sm:$0xff]  }
 0xb60   :  { %8089 = vmatpush1.bf16.msra.mxu1 %v12470_v4  ;;  %v12538_v4 = vld [vmem:[#allocation2 + $0x150c] ss:$72 sps:$4 sm:$0xff]  }
 0xb61   :  { %8101 = vmatprep.subr.bf16.mxu1 %v12475_v54  ;;  %v12541_v54 = vld [vmem:[#allocation2 + $0x159c] ss:$72 sps:$4 sm:$0xff]  }
 0xb63   :  { %8091 = vmatmul.mubr.bf16.vlgmr.msra.gmra.mrb[32].mxu1 %v13296_v39  ;;  %v12488_v39 = vld [vmem:[#allocation2 + $0xc08] ss:$72 sps:$4 sm:$0xff]  }
 0xb64   :  { %8102 = vmatpush1.bf16.msra.mxu1 %v12473_v29  ;;  %8133 = vmatprep.mubr.bf16.mxu1 %v13302_v41  ;;  %v12491_v41 = vld [vmem:[#allocation2 + $0xc98] ss:$72 sps:$4 sm:$0xff]   ;;  %v12544_v29 = vld [vmem:[#allocation2 + $0x162c] ss:$72 sps:$4 sm:$0xff]  }
 0xb65   :  { %8103 = vmatprep.subr.bf16.mxu1 %v12478_v38  ;;  %v12542_v38 = vld [vmem:[#allocation2 + $0x1628] ss:$72 sps:$4 sm:$0xff]  }
 0xb68   :  { %8104 = vmatpush1.bf16.msra.mxu1 %v12476_v28  ;;  %v12547_v28 = vld [vmem:[#allocation2 + $0x16bc] ss:$72 sps:$4 sm:$0xff]  }
 0xb69   :  { %8105 = vmatprep.subr.bf16.mxu1 %v12481_v40  ;;  %v12545_v40 = vld [vmem:[#allocation2 + $0x16b8] ss:$72 sps:$4 sm:$0xff]  }
 0xb6c   :  { %8106 = vmatpush1.bf16.msra.mxu1 %v12479_v30  ;;  %v12550_v30 = vld [vmem:[#allocation2 + $0x174c] ss:$72 sps:$4 sm:$0xff]  }
 0xb6d   :  { %8107 = vmatprep.subr.bf16.mxu1 %v12484_v48  ;;  %v12548_v48 = vld [vmem:[#allocation2 + $0x1748] ss:$72 sps:$4 sm:$0xff]  }
 0xb70   :  { %8108 = vmatpush1.bf16.msra.mxu1 %v12482_v31  ;;  %v12553_v31 = vld [vmem:[#allocation2 + $0x17dc] ss:$72 sps:$4 sm:$0xff]  }
 0xb71   :  { %8109 = vmatprep.subr.bf16.mxu1 %v12487_v32  ;;  %v12551_v32 = vld [vmem:[#allocation2 + $0x17d8] ss:$72 sps:$4 sm:$0xff]  }
 0xb74   :  { %8110 = vmatpush1.bf16.msra.mxu1 %v12485_v36  ;;  %v12556_v36 = vld [vmem:[#allocation2 + $0x186c] ss:$72 sps:$4 sm:$0xff]  }
 0xb75   :  { %8111 = vmatprep.subr.bf16.mxu1 %v12490_v34  ;;  %v12554_v34 = vld [vmem:[#allocation2 + $0x1868] ss:$72 sps:$4 sm:$0xff]  }
 0xb78   :  { %8112 = vmatpush1.bf16.msra.mxu1 %v12488_v39  ;;  %v12559_v39 = vld [vmem:[#allocation2 + $0x18fc] ss:$72 sps:$4 sm:$0xff]  }
 0xb79   :  { %8113 = vmatprep.subr.bf16.mxu1 %v12493_v35  ;;  %v12557_v35 = vld [vmem:[#allocation2 + $0x18f8] ss:$72 sps:$4 sm:$0xff]  }
 0xb7c   :  { %8114 = vmatpush1.bf16.msra.mxu1 %v12491_v41  ;;  %v12562_v41 = vld [vmem:[#allocation2 + $0x198c] ss:$72 sps:$4 sm:$0xff]  }
 0xb7d   :  { %8115 = vmatprep.subr.bf16.mxu1 %v12496_v37  ;;  %v12560_v37 = vld [vmem:[#allocation2 + $0x1988] ss:$72 sps:$4 sm:$0xff]  }
 0xb80   :  { %8116 = vmatpush1.bf16.msra.mxu1 %v12494_v42  ;;  %v12565_v42 = vld [vmem:[#allocation2 + $0x1a1c] ss:$72 sps:$4 sm:$0xff]  }
 0xb81   :  { %8117 = vmatprep.subr.bf16.mxu1 %v12499_v11  ;;  %v12563_v11 = vld [vmem:[#allocation2 + $0x1a18] ss:$72 sps:$4 sm:$0xff]  }
 0xb84   :  { %8118 = vmatpush1.bf16.msra.mxu1 %v12497_v52  ;;  %v12568_v52 = vld [vmem:[#allocation2 + $0x1aac] ss:$72 sps:$4 sm:$0xff]  }
 0xb85   :  { %8119 = vmatprep.subr.bf16.mxu1 %v12502_v43  ;;  %v12566_v43 = vld [vmem:[#allocation2 + $0x1aa8] ss:$72 sps:$4 sm:$0xff]  }
 0xb88   :  { %8120 = vmatpush1.bf16.msra.mxu1 %v12500_v46  ;;  %v12572_v46 = vld [vmem:[#allocation2 + $0x1bc8] ss:$72 sps:$4 sm:$0xff]  }
 0xb89   :  { %8121 = vmatprep.subr.bf16.mxu1 %v12505_v47  ;;  %v12577_v47 = vld [vmem:[#allocation2 + $0x1c5c] ss:$72 sps:$4 sm:$0xff]  }
 0xb8c   :  { %8122 = vmatpush1.bf16.msra.mxu1 %v12503_v51  ;;  %v12578_v51 = vld [vmem:[#allocation2 + $0x1ce8] ss:$72 sps:$4 sm:$0xff]  }
 0xb8d   :  { %8123 = vmatprep.subr.bf16.mxu1 %v12508_v53  ;;  %v12583_v53 = vld [vmem:[#allocation2 + $0x1d7c] ss:$72 sps:$4 sm:$0xff]  }
 0xb90   :  { %8124 = vmatpush1.bf16.msra.mxu1 %v12506_v2  ;;  %v12589_v2 = vld [vmem:[#allocation2 + $0x1e9c] ss:$72 sps:$4 sm:$0xff]  }
 0xb91   :  { %8125 = vmatprep.subr.bf16.mxu1 %v12511_v59 }
 0xb94   :  { %8126 = vmatpush1.bf16.msra.mxu1 %v12509_v61 }
 0xb95   :  { %8127 = vmatprep.subr.bf16.mxu1 %v12514_v62  ;;  %v12587_v62 = vld [vmem:[#allocation2 + $0x1e98] ss:$72 sps:$4 sm:$0xff]  }
 0xb98   :  { %8128 = vmatpush1.bf16.msra.mxu1 %v12512_v3 }
 0xb99   :  { %8129 = vmatprep.subr.bf16.mxu1 %v12517_v1 }
 0xb9c   :  { %8130 = vmatpush1.bf16.msra.mxu1 %v12515_v8  ;;  %v12590_v8 = vld [vmem:[#allocation2 + $0x1f28] ss:$72 sps:$4 sm:$0xff]  }
 0xb9d   :  { %8131 = vmatprep.subr.bf16.mxu1 %v12520_v7  ;;  %v12605_v7 = vld [vmem:[#allocation6 + $0x3f0] sm:$0xff]  }
 0xb9e   :  { %10909 = vmatprep.subr.bf16.mxu0 %v12605_v7  ;;  %v12825_v7 = vld [vmem:[%s13392_s0 + $0xc] ss:$28 sps:$4 sm:$0xff]  }
 0xba0   :  { %8132 = vmatpush1.bf16.msra.mxu1 %v12518_v10  ;;  %v12606_v10 = vld [vmem:[#allocation6 + $0x3b0] sm:$0xff]  }
 0xba1   :  { %8144 = vmatprep.subr.bf16.mxu1 %v12523_v33  ;;  %10910 = vmatpush3.bf16.msra.mxu0 %v12606_v10  ;;  %v12607_v33 = vld [vmem:[#allocation6 + $0x3f8] sm:$0xff]  }
 0xba2   :  { %10911 = vmatprep.subr.bf16.mxu0 %v12607_v33  ;;  %v12665_v10 = vld [vmem:[#allocation2 + $0xa64] ss:$72 sps:$4 sm:$0xff]   ;;  %v12663_v33 = vld [vmem:[#allocation2 + $0xa60] ss:$72 sps:$4 sm:$0xff]  }
 0xba3   :  { %8134 = vmatmul.mubr.bf16.vlgmr.msra.gmra.mrb[32].mxu1 %v13308_v24  ;;  %v12536_v24 = vld [vmem:[#allocation2 + $0x1508] ss:$72 sps:$4 sm:$0xff]  }
 0xba4   :  { %8145 = vmatpush1.bf16.msra.mxu1 %v12521_v12  ;;  %8176 = vmatprep.mubr.bf16.mxu1 %v13314_v27  ;;  %v12539_v27 = vld [vmem:[#allocation2 + $0x1598] ss:$72 sps:$4 sm:$0xff]   ;;  %v12608_v12 = vld [vmem:[#allocation6 + $0x3b8] sm:$0xff]  }
 0xba5   :  { %8146 = vmatprep.subr.bf16.mxu1 %v12526_v13  ;;  %10912 = vmatpush3.bf16.msra.mxu0 %v12608_v12  ;;  %v7486_v13 = vld [vmem:[#allocation4 + $0xe] sm:$0x3]  ;;  %v12668_v12 = vld [vmem:[#allocation2 + $0xaf4] ss:$72 sps:$4 sm:$0xff]  }
 0xba8   :  { %8147 = vmatpush1.bf16.msra.mxu1 %v12524_v23  ;;  %v7495_v23 = vrot.slane %v7486_v13, %v13143_v18 }
 0xba9   :  { %8148 = vmatprep.subr.bf16.mxu1 %v12529_v14 }
 0xbac   :  { %8149 = vmatpush1.bf16.msra.mxu1 %v12527_v25 }
 0xbad   :  { %8150 = vmatprep.subr.bf16.mxu1 %v12532_v15 }
 0xbb0   :  { %8151 = vmatpush1.bf16.msra.mxu1 %v12530_v16 }
 0xbb1   :  { %8152 = vmatprep.subr.bf16.mxu1 %v12535_v20 }
 0xbb4   :  { %8153 = vmatpush1.bf16.msra.mxu1 %v12533_v22 }
 0xbb5   :  { %8154 = vmatprep.subr.bf16.mxu1 %v12538_v4 }
 0xbb8   :  { %8155 = vmatpush1.bf16.msra.mxu1 %v12536_v24 }
 0xbb9   :  { %8156 = vmatprep.subr.bf16.mxu1 %v12541_v54 }
 0xbbc   :  { %8157 = vmatpush1.bf16.msra.mxu1 %v12539_v27 }
 0xbbd   :  { %8158 = vmatprep.subr.bf16.mxu1 %v12544_v29 }
 0xbc0   :  { %8159 = vmatpush1.bf16.msra.mxu1 %v12542_v38 }
 0xbc1   :  { %8160 = vmatprep.subr.bf16.mxu1 %v12547_v28 }
 0xbc4   :  { %8161 = vmatpush1.bf16.msra.mxu1 %v12545_v40  ;;  %v12609_v40 = vld [vmem:[#allocation2 + $0x40] ss:$72 sps:$4 sm:$0xff]  }
 0xbc5   :  { %8162 = vmatprep.subr.bf16.mxu1 %v12550_v30  ;;  %v12614_v30 = vld [vmem:[#allocation2 + $0xd4] ss:$72 sps:$4 sm:$0xff]  }
 0xbc8   :  { %8163 = vmatpush1.bf16.msra.mxu1 %v12548_v48  ;;  %v12612_v48 = vld [vmem:[#allocation2 + $0xd0] ss:$72 sps:$4 sm:$0xff]  }
 0xbc9   :  { %8164 = vmatprep.subr.bf16.mxu1 %v12553_v31  ;;  %v12823_v31 = vld [vmem:[%s13392_s0 + $0x4] ss:$28 sps:$4 sm:$0xff]  }
 0xbcc   :  { %8165 = vmatpush1.bf16.msra.mxu1 %v12551_v32  ;;  %v12617_v32 = vld [vmem:[#allocation2 + $0x164] ss:$72 sps:$4 sm:$0xff]  }
 0xbcd   :  { %8166 = vmatprep.subr.bf16.mxu1 %v12556_v36  ;;  %v12615_v36 = vld [vmem:[#allocation2 + $0x160] ss:$72 sps:$4 sm:$0xff]  }
 0xbd0   :  { %8167 = vmatpush1.bf16.msra.mxu1 %v12554_v34  ;;  %v12620_v34 = vld [vmem:[#allocation2 + $0x1f4] ss:$72 sps:$4 sm:$0xff]  }
 0xbd1   :  { %8168 = vmatprep.subr.bf16.mxu1 %v12559_v39  ;;  %v12618_v39 = vld [vmem:[#allocation2 + $0x1f0] ss:$72 sps:$4 sm:$0xff]  }
 0xbd4   :  { %8169 = vmatpush1.bf16.msra.mxu1 %v12557_v35  ;;  %v12623_v35 = vld [vmem:[#allocation2 + $0x284] ss:$72 sps:$4 sm:$0xff]  }
 0xbd5   :  { %8170 = vmatprep.subr.bf16.mxu1 %v12562_v41  ;;  %v12621_v41 = vld [vmem:[#allocation2 + $0x280] ss:$72 sps:$4 sm:$0xff]  }
 0xbd8   :  { %8171 = vmatpush1.bf16.msra.mxu1 %v12560_v37  ;;  %v12626_v37 = vld [vmem:[#allocation2 + $0x314] ss:$72 sps:$4 sm:$0xff]  }
 0xbd9   :  { %8172 = vmatprep.subr.bf16.mxu1 %v12565_v42  ;;  %v12624_v42 = vld [vmem:[#allocation2 + $0x310] ss:$72 sps:$4 sm:$0xff]  }
 0xbdc   :  { %8173 = vmatpush1.bf16.msra.mxu1 %v12563_v11  ;;  %v12629_v11 = vld [vmem:[#allocation2 + $0x3a4] ss:$72 sps:$4 sm:$0xff]  }
 0xbdd   :  { %8174 = vmatprep.subr.bf16.mxu1 %v12568_v52  ;;  %v12627_v52 = vld [vmem:[#allocation2 + $0x3a0] ss:$72 sps:$4 sm:$0xff]  }
 0xbe0   :  { %8175 = vmatpush1.bf16.msra.mxu1 %v12566_v43  ;;  %v12632_v43 = vld [vmem:[#allocation2 + $0x434] ss:$72 sps:$4 sm:$0xff]  }
 0xbe1   :  { %8187 = vmatprep.subr.bf16.mxu1 %v12571_v55  ;;  %v12630_v55 = vld [vmem:[#allocation2 + $0x430] ss:$72 sps:$4 sm:$0xff]  }
 0xbe3   :  { %8177 = vmatmul.mubr.bf16.vlgmr.msra.gmra.mrb[32].mxu1 %v13320_v9  ;;  %v12584_v9 = vld [vmem:[#allocation2 + $0x1e08] ss:$72 sps:$4 sm:$0xff]  }
 0xbe4   :  { %8188 = vmatpush1.bf16.msra.mxu1 %v12569_v44  ;;  %8219 = vmatprep.mubr.bf16.mxu1 %v12980_v19  ;;  %v12635_v44 = vld [vmem:[#allocation2 + $0x4c4] ss:$72 sps:$4 sm:$0xff]  }
 0xbe5   :  { %8189 = vmatprep.subr.bf16.mxu1 %v12574_v45  ;;  %v12633_v45 = vld [vmem:[#allocation2 + $0x4c0] ss:$72 sps:$4 sm:$0xff]  }
 0xbe8   :  { %8190 = vmatpush1.bf16.msra.mxu1 %v12572_v46  ;;  %v12638_v46 = vld [vmem:[#allocation2 + $0x554] ss:$72 sps:$4 sm:$0xff]  }
 0xbe9   :  { %8191 = vmatprep.subr.bf16.mxu1 %v12577_v47  ;;  %v12636_v47 = vld [vmem:[#allocation2 + $0x550] ss:$72 sps:$4 sm:$0xff]  }
 0xbec   :  { %8192 = vmatpush1.bf16.msra.mxu1 %v12575_v49  ;;  %v12641_v49 = vld [vmem:[#allocation2 + $0x5e4] ss:$72 sps:$4 sm:$0xff]  }
 0xbed   :  { %8193 = vmatprep.subr.bf16.mxu1 %v12580_v58  ;;  %v12639_v58 = vld [vmem:[#allocation2 + $0x5e0] ss:$72 sps:$4 sm:$0xff]  }
 0xbf0   :  { %8194 = vmatpush1.bf16.msra.mxu1 %v12578_v51  ;;  %v12644_v51 = vld [vmem:[#allocation2 + $0x674] ss:$72 sps:$4 sm:$0xff]  }
 0xbf1   :  { %8195 = vmatprep.subr.bf16.mxu1 %v12583_v53  ;;  %v12642_v53 = vld [vmem:[#allocation2 + $0x670] ss:$72 sps:$4 sm:$0xff]  }
 0xbf4   :  { %8196 = vmatpush1.bf16.msra.mxu1 %v12581_v56  ;;  %v12647_v56 = vld [vmem:[#allocation2 + $0x704] ss:$72 sps:$4 sm:$0xff]  }
 0xbf5   :  { %8197 = vmatprep.subr.bf16.mxu1 %v12586_v57  ;;  %v12645_v57 = vld [vmem:[#allocation2 + $0x700] ss:$72 sps:$4 sm:$0xff]  }
 0xbf6   :  { %v10891_v59 = vpop.f32.mrb[28].mxu1 }
 0xbf7   :  { %v10892_v60 = vpop.f32.mrb[29].mxu1 }
 0xbf8   :  { %v10893_v6 = vadd.f32 %v10892_v60, %v10891_v59  ;;  %8198 = vmatpush1.bf16.msra.mxu1 %v12584_v9  ;;  %v10894_v61 = vpop.f32.mrb[30].mxu1  ;;  %v12650_v9 = vld [vmem:[#allocation2 + $0x794] ss:$72 sps:$4 sm:$0xff]   ;;  %v12653_v59 = vld [vmem:[#allocation2 + $0x824] ss:$72 sps:$4 sm:$0xff]  }
 0xbf9   :  { %v10895_v0 = vpop.f32.mrb[31].mxu1  ;;  %8199 = vmatprep.subr.bf16.mxu1 %v12589_v2  ;;  %v12648_v2 = vld [vmem:[#allocation2 + $0x790] ss:$72 sps:$4 sm:$0xff]   ;;  %v12651_v60 = vld [vmem:[#allocation2 + $0x820] ss:$72 sps:$4 sm:$0xff]  }
 0xbfa   :  { %v13346_v3 = vadd.f32 %v10893_v6, %v13325_v21  ;;  %v10896_v1 = vadd.f32 %v10895_v0, %v10894_v61  ;;  %v12611_v21 = vld [vmem:[#allocation2 + $0x44] ss:$72 sps:$4 sm:$0xff]   ;;  %v12656_v6 = vld [vmem:[#allocation2 + $0x8b4] ss:$72 sps:$4 sm:$0xff]   ;;  %v12654_v61 = vld [vmem:[#allocation2 + $0x8b0] ss:$72 sps:$4 sm:$0xff]  }
 0xbfb   :  { %9091 = vmatprep.subr.bf16.mxu0 %v12611_v21  ;;  %v12657_v0 = vld [vmem:[#allocation2 + $0x940] ss:$72 sps:$4 sm:$0xff]   ;;  %v12666_v21 = vld [vmem:[#allocation2 + $0xaf0] ss:$72 sps:$4 sm:$0xff]  }
 0xbfc   :  { %v13349_v5 = vadd.f32 %v10896_v1, %v13328_v50  ;;  %8200 = vmatpush1.bf16.msra.mxu1 %v12587_v62  ;;  %v7491_v50 = vrot.slane %v7486_v13, %v13141_v17  ;;  %v12659_v62 = vld [vmem:[#allocation2 + $0x944] ss:$72 sps:$4 sm:$0xff]   ;;  %v12824_v1 = vld [vmem:[%s13392_s0] ss:$28 sps:$4 sm:$0xff]  }
 0xbfd   :  { %8201 = vmatprep.subr.bf16.mxu1 %v12592_v63  ;;  %v12662_v63 = vld [vmem:[#allocation2 + $0x9d4] ss:$72 sps:$4 sm:$0xff]   ;;  %v12671_v13 = vld [vmem:[#allocation2 + $0xb84] ss:$72 sps:$4 sm:$0xff]  }
 0xc00   :  { %8202 = vmatpush1.bf16.msra.mxu1 %v12590_v8  ;;  %v12660_v8 = vld [vmem:[#allocation2 + $0x9d0] ss:$72 sps:$4 sm:$0xff]  }
 0xc03   :  { %8220 = vmatmul.mubr.bf16.vlgmr.msra.gmra.mrb[32].mxu1 %v13333_v26 }
 0xcd6   :  { %v8221_v14 = vpop.f32.mrb[32].mxu1 }
 0xcd7   :  { %v11002_v25 = vadd.f32 %v8221_v14, %v7491_v50  ;;  %v8223_v15 = vpop.f32.mrb[33].mxu1  ;;  %v12672_v14 = vld [vmem:[#allocation2 + $0xc10] ss:$72 sps:$4 sm:$0xff]  }
 0xcd8   :  { %v11003_v16 = vadd.f32 %v8223_v15, %v7495_v23  ;;  %v8225_v26 = vpop.f32.mrb[34].mxu1  ;;  %v12675_v15 = vld [vmem:[#allocation2 + $0xca0] ss:$72 sps:$4 sm:$0xff]  }
 0xcd9   :  { %v11004_v20 = vadd.f32 %v8225_v26, %v7491_v50  ;;  %v8227_v22 = vpop.f32.mrb[35].mxu1  ;;  %v8230_v24 = vmax.f32 %v11002_v25, 0.0  ;;  %v12669_v50 = vld [vmem:[#allocation2 + $0xb80] ss:$72 sps:$4 sm:$0xff]   ;;  %v12677_v25 = vld [vmem:[#allocation2 + $0xca4] ss:$72 sps:$4 sm:$0xff]  }
 0xcda   :  { %v11005_v4 = vadd.f32 %v8227_v22, %v7495_v23  ;;  %v8231_v27 = vmax.f32 %v11003_v16, 0.0  ;;  %v12674_v23 = vld [vmem:[#allocation2 + $0xc14] ss:$72 sps:$4 sm:$0xff]   ;;  %v12678_v26 = vld [vmem:[#allocation2 + $0xd30] ss:$72 sps:$4 sm:$0xff]  }
 0xcdb   :  { %v8232_v54 = vmax.f32 %v11004_v20, 0.0  ;;  %v12680_v16 = vld [vmem:[#allocation2 + $0xd34] ss:$72 sps:$4 sm:$0xff]   ;;  %v12683_v20 = vld [vmem:[#allocation2 + $0xdc4] ss:$72 sps:$4 sm:$0xff]  }
 0xcdc   :  { %v8233_v29 = vmax.f32 %v11005_v4, 0.0  ;;  %v12681_v22 = vld [vmem:[#allocation2 + $0xdc0] ss:$72 sps:$4 sm:$0xff]   ;;  %v12686_v4 = vld [vmem:[#allocation2 + $0xe54] ss:$72 sps:$4 sm:$0xff]  }
 0xcdd   :  { %v8234_v38 = vpack.c.bf16 %v8232_v54, %v8230_v24  ;;  %v12777_v24 = vld [vmem:[#allocation6 + $0x440] sm:$0xff]  }
 0xcde   :  { %v8235_v28 = vpack.c.bf16 %v8233_v29, %v8231_v27  ;;  %v12778_v54 = vld [vmem:[#allocation6 + $0x400] sm:$0xff]   ;;  %v12779_v27 = vld [vmem:[#allocation6 + $0x448] sm:$0xff]   ;;  %10919 = vmatprep.subr.bf16.mxu1 %v12777_v24 }
 0xcdf   :  { %v12684_v29 = vld [vmem:[#allocation2 + $0xe50] ss:$72 sps:$4 sm:$0xff]   ;;  %10920 = vmatpush3.bf16.msra.mxu1 %v12778_v54  ;;  %v12753_v24 = vld [vmem:[#allocation2 + $0x1b40] ss:$72 sps:$4 sm:$0xff]   ;;  %v12758_v54 = vld [vmem:[#allocation2 + $0x1bd4] ss:$72 sps:$4 sm:$0xff]  }
 0xce0   :  { %8396 = vmatprep.mubr.bf16.mxu0 %v8235_v28  ;;  %v12780_v28 = vld [vmem:[#allocation6 + $0x408] sm:$0xff]   ;;  %10921 = vmatprep.subr.bf16.mxu1 %v12779_v27  ;;  %v12828_v27 = vld [vmem:[%s13392_s0 + $0x10] ss:$28 sps:$4 sm:$0xff]  }
 0xce1   :  { %8397 = vmatmul.mubr.bf16.vlgmr.msra.gmra.mrb[28].mxu0 %v8234_v38  ;;  %v12689_v38 = vld [vmem:[#allocation2 + $0xee4] ss:$72 sps:$4 sm:$0xff]  }
 0xce2   :  { %9092 = vmatpush1.bf16.msra.mxu0 %v12609_v40  ;;  %9123 = vmatprep.mubr.bf16.mxu0 %v12823_v31  ;;  %v12781_v40 = vld [vmem:[#allocation6 + $0x450] sm:$0xff]  }
 0xce3   :  { %9093 = vmatprep.subr.bf16.mxu0 %v12614_v30  ;;  %v12687_v30 = vld [vmem:[#allocation2 + $0xee0] ss:$72 sps:$4 sm:$0xff]   ;;  %10922 = vmatpush3.bf16.msra.mxu1 %v12780_v28 }
 0xce4   :  { %v12782_v31 = vld [vmem:[#allocation6 + $0x410] sm:$0xff]   ;;  %10923 = vmatprep.subr.bf16.mxu1 %v12781_v40  ;;  %v12764_v40 = vld [vmem:[#allocation2 + $0x1cf4] ss:$72 sps:$4 sm:$0xff]  }
 0xce5   :  { %v12759_v28 = vld [vmem:[#allocation2 + $0x1c60] ss:$72 sps:$4 sm:$0xff]  }
 0xce6   :  { %9094 = vmatpush1.bf16.msra.mxu0 %v12612_v48  ;;  %v12692_v48 = vld [vmem:[#allocation2 + $0xf74] ss:$72 sps:$4 sm:$0xff]  }
 0xce7   :  { %9095 = vmatprep.subr.bf16.mxu0 %v12617_v32  ;;  %v12783_v32 = vld [vmem:[#allocation6 + $0x458] sm:$0xff]   ;;  %10924 = vmatpush3.bf16.msra.mxu1 %v12782_v31 }
 0xce8   :  { %10925 = vmatprep.subr.bf16.mxu1 %v12783_v32  ;;  %v12765_v31 = vld [vmem:[#allocation2 + $0x1d80] ss:$72 sps:$4 sm:$0xff]   ;;  %v12770_v32 = vld [vmem:[#allocation2 + $0x1e14] ss:$72 sps:$4 sm:$0xff]  }
 0xcea   :  { %9096 = vmatpush1.bf16.msra.mxu0 %v12615_v36  ;;  %v12690_v36 = vld [vmem:[#allocation2 + $0xf70] ss:$72 sps:$4 sm:$0xff]  }
 0xceb   :  { %9097 = vmatprep.subr.bf16.mxu0 %v12620_v34  ;;  %v12695_v34 = vld [vmem:[#allocation2 + $0x1004] ss:$72 sps:$4 sm:$0xff]  }
 0xcee   :  { %9098 = vmatpush1.bf16.msra.mxu0 %v12618_v39  ;;  %v12784_v39 = vld [vmem:[#allocation6 + $0x418] sm:$0xff]  }
 0xcef   :  { %9099 = vmatprep.subr.bf16.mxu0 %v12623_v35  ;;  %v12785_v35 = vld [vmem:[#allocation6 + $0x460] sm:$0xff]   ;;  %10926 = vmatpush3.bf16.msra.mxu1 %v12784_v39 }
 0xcf0   :  { %10927 = vmatprep.subr.bf16.mxu1 %v12785_v35 }
 0xcf2   :  { %9100 = vmatpush1.bf16.msra.mxu0 %v12621_v41  ;;  %v12693_v41 = vld [vmem:[#allocation2 + $0x1000] ss:$72 sps:$4 sm:$0xff]  }
 0xcf3   :  { %9101 = vmatprep.subr.bf16.mxu0 %v12626_v37  ;;  %v12698_v37 = vld [vmem:[#allocation2 + $0x1094] ss:$72 sps:$4 sm:$0xff]  }
 0xcf6   :  { %9102 = vmatpush1.bf16.msra.mxu0 %v12624_v42  ;;  %v12786_v42 = vld [vmem:[#allocation6 + $0x420] sm:$0xff]  }
 0xcf7   :  { %9103 = vmatprep.subr.bf16.mxu0 %v12629_v11  ;;  %v12787_v11 = vld [vmem:[#allocation6 + $0x468] sm:$0xff]   ;;  %10928 = vmatpush3.bf16.msra.mxu1 %v12786_v42 }
 0xcf8   :  { %10929 = vmatprep.subr.bf16.mxu1 %v12787_v11  ;;  %v12776_v11 = vld [vmem:[#allocation2 + $0x1f34] ss:$72 sps:$4 sm:$0xff]  }
 0xcfa   :  { %9104 = vmatpush1.bf16.msra.mxu0 %v12627_v52  ;;  %v12696_v52 = vld [vmem:[#allocation2 + $0x1090] ss:$72 sps:$4 sm:$0xff]  }
 0xcfb   :  { %9105 = vmatprep.subr.bf16.mxu0 %v12632_v43  ;;  %v12701_v43 = vld [vmem:[#allocation2 + $0x1124] ss:$72 sps:$4 sm:$0xff]  }
 0xcfe   :  { %9106 = vmatpush1.bf16.msra.mxu0 %v12630_v55  ;;  %v12699_v55 = vld [vmem:[#allocation2 + $0x1120] ss:$72 sps:$4 sm:$0xff]  }
 0xcff   :  { %9107 = vmatprep.subr.bf16.mxu0 %v12635_v44  ;;  %v12704_v44 = vld [vmem:[#allocation2 + $0x11b4] ss:$72 sps:$4 sm:$0xff]  }
 0xd02   :  { %9108 = vmatpush1.bf16.msra.mxu0 %v12633_v45  ;;  %v12702_v45 = vld [vmem:[#allocation2 + $0x11b0] ss:$72 sps:$4 sm:$0xff]  }
 0xd03   :  { %9109 = vmatprep.subr.bf16.mxu0 %v12638_v46  ;;  %v12707_v46 = vld [vmem:[#allocation2 + $0x1244] ss:$72 sps:$4 sm:$0xff]  }
 0xd06   :  { %9110 = vmatpush1.bf16.msra.mxu0 %v12636_v47  ;;  %v12705_v47 = vld [vmem:[#allocation2 + $0x1240] ss:$72 sps:$4 sm:$0xff]  }
 0xd07   :  { %9111 = vmatprep.subr.bf16.mxu0 %v12641_v49  ;;  %v12710_v49 = vld [vmem:[#allocation2 + $0x12d4] ss:$72 sps:$4 sm:$0xff]  }
 0xd0a   :  { %9112 = vmatpush1.bf16.msra.mxu0 %v12639_v58  ;;  %v12826_v58 = vld [vmem:[%s13392_s0 + $0x8] ss:$28 sps:$4 sm:$0xff]  }
 0xd0b   :  { %9113 = vmatprep.subr.bf16.mxu0 %v12644_v51  ;;  %v12708_v51 = vld [vmem:[#allocation2 + $0x12d0] ss:$72 sps:$4 sm:$0xff]  }
 0xd0e   :  { %9114 = vmatpush1.bf16.msra.mxu0 %v12642_v53  ;;  %v12827_v53 = vld [vmem:[%s13392_s0 + $0x14] ss:$28 sps:$4 sm:$0xff]  }
 0xd0f   :  { %9115 = vmatprep.subr.bf16.mxu0 %v12647_v56  ;;  %v12713_v56 = vld [vmem:[#allocation2 + $0x1364] ss:$72 sps:$4 sm:$0xff]  }
 0xd12   :  { %9116 = vmatpush1.bf16.msra.mxu0 %v12645_v57  ;;  %v12711_v57 = vld [vmem:[#allocation2 + $0x1360] ss:$72 sps:$4 sm:$0xff]  }
 0xd13   :  { %9117 = vmatprep.subr.bf16.mxu0 %v12650_v9  ;;  %v12716_v9 = vld [vmem:[#allocation2 + $0x13f4] ss:$72 sps:$4 sm:$0xff]  }
 0xd16   :  { %9118 = vmatpush1.bf16.msra.mxu0 %v12648_v2  ;;  %v12714_v2 = vld [vmem:[#allocation2 + $0x13f0] ss:$72 sps:$4 sm:$0xff]  }
 0xd17   :  { %9119 = vmatprep.subr.bf16.mxu0 %v12653_v59  ;;  %v12719_v59 = vld [vmem:[#allocation2 + $0x1484] ss:$72 sps:$4 sm:$0xff]  }
 0xd1a   :  { %9120 = vmatpush1.bf16.msra.mxu0 %v12651_v60  ;;  %v12717_v60 = vld [vmem:[#allocation2 + $0x1480] ss:$72 sps:$4 sm:$0xff]  }
 0xd1b   :  { %9121 = vmatprep.subr.bf16.mxu0 %v12656_v6  ;;  %v12722_v6 = vld [vmem:[#allocation2 + $0x1514] ss:$72 sps:$4 sm:$0xff]  }
 0xd1e   :  { %9122 = vmatpush1.bf16.msra.mxu0 %v12654_v61  ;;  %v12720_v61 = vld [vmem:[#allocation2 + $0x1510] ss:$72 sps:$4 sm:$0xff]  }
 0xd1f   :  { %9134 = vmatprep.subr.bf16.mxu0 %v12659_v62  ;;  %v12725_v62 = vld [vmem:[#allocation2 + $0x15a4] ss:$72 sps:$4 sm:$0xff]  }
 0xd21   :  { %9124 = vmatmul.mubr.bf16.vlgmr.msra.gmra.mrb[32].mxu0 %v12824_v1  ;;  %v12726_v1 = vld [vmem:[#allocation2 + $0x1630] ss:$72 sps:$4 sm:$0xff]  }
 0xd22   :  { %9135 = vmatpush1.bf16.msra.mxu0 %v12657_v0  ;;  %9166 = vmatprep.mubr.bf16.mxu0 %v12825_v7  ;;  %v12723_v0 = vld [vmem:[#allocation2 + $0x15a0] ss:$72 sps:$4 sm:$0xff]  }
 0xd23   :  { %9136 = vmatprep.subr.bf16.mxu0 %v12662_v63  ;;  %v12728_v63 = vld [vmem:[#allocation2 + $0x1634] ss:$72 sps:$4 sm:$0xff]   ;;  %v12729_v7 = vld [vmem:[#allocation2 + $0x16c0] ss:$72 sps:$4 sm:$0xff]  }
 0xd26   :  { %9137 = vmatpush1.bf16.msra.mxu0 %v12660_v8  ;;  %v12731_v8 = vld [vmem:[#allocation2 + $0x16c4] ss:$72 sps:$4 sm:$0xff]  }
 0xd27   :  { %9138 = vmatprep.subr.bf16.mxu0 %v12665_v10  ;;  %v12734_v10 = vld [vmem:[#allocation2 + $0x1754] ss:$72 sps:$4 sm:$0xff]  }
 0xd2a   :  { %9139 = vmatpush1.bf16.msra.mxu0 %v12663_v33  ;;  %v12732_v33 = vld [vmem:[#allocation2 + $0x1750] ss:$72 sps:$4 sm:$0xff]  }
 0xd2b   :  { %9140 = vmatprep.subr.bf16.mxu0 %v12668_v12  ;;  %v12737_v12 = vld [vmem:[#allocation2 + $0x17e4] ss:$72 sps:$4 sm:$0xff]  }
 0xd2e   :  { %9141 = vmatpush1.bf16.msra.mxu0 %v12666_v21  ;;  %v12735_v21 = vld [vmem:[#allocation2 + $0x17e0] ss:$72 sps:$4 sm:$0xff]  }
 0xd2f   :  { %9142 = vmatprep.subr.bf16.mxu0 %v12671_v13  ;;  %v12740_v13 = vld [vmem:[#allocation2 + $0x1874] ss:$72 sps:$4 sm:$0xff]  }
 0xd32   :  { %9143 = vmatpush1.bf16.msra.mxu0 %v12669_v50  ;;  %v12738_v50 = vld [vmem:[#allocation2 + $0x1870] ss:$72 sps:$4 sm:$0xff]  }
 0xd33   :  { %9144 = vmatprep.subr.bf16.mxu0 %v12674_v23  ;;  %v12743_v23 = vld [vmem:[#allocation2 + $0x1904] ss:$72 sps:$4 sm:$0xff]  }
 0xd36   :  { %9145 = vmatpush1.bf16.msra.mxu0 %v12672_v14  ;;  %v12741_v14 = vld [vmem:[#allocation2 + $0x1900] ss:$72 sps:$4 sm:$0xff]  }
 0xd37   :  { %9146 = vmatprep.subr.bf16.mxu0 %v12677_v25  ;;  %v12746_v25 = vld [vmem:[#allocation2 + $0x1994] ss:$72 sps:$4 sm:$0xff]  }
 0xd3a   :  { %9147 = vmatpush1.bf16.msra.mxu0 %v12675_v15  ;;  %v12744_v15 = vld [vmem:[#allocation2 + $0x1990] ss:$72 sps:$4 sm:$0xff]  }
 0xd3b   :  { %9148 = vmatprep.subr.bf16.mxu0 %v12680_v16  ;;  %v12749_v16 = vld [vmem:[#allocation2 + $0x1a24] ss:$72 sps:$4 sm:$0xff]  }
 0xd3e   :  { %9149 = vmatpush1.bf16.msra.mxu0 %v12678_v26  ;;  %v12747_v26 = vld [vmem:[#allocation2 + $0x1a20] ss:$72 sps:$4 sm:$0xff]  }
 0xd3f   :  { %9150 = vmatprep.subr.bf16.mxu0 %v12683_v20  ;;  %v12752_v20 = vld [vmem:[#allocation2 + $0x1ab4] ss:$72 sps:$4 sm:$0xff]  }
 0xd42   :  { %9151 = vmatpush1.bf16.msra.mxu0 %v12681_v22  ;;  %v12750_v22 = vld [vmem:[#allocation2 + $0x1ab0] ss:$72 sps:$4 sm:$0xff]  }
 0xd43   :  { %9152 = vmatprep.subr.bf16.mxu0 %v12686_v4  ;;  %v12755_v4 = vld [vmem:[#allocation2 + $0x1b44] ss:$72 sps:$4 sm:$0xff]  }
 0xd46   :  { %9153 = vmatpush1.bf16.msra.mxu0 %v12684_v29  ;;  %v12756_v29 = vld [vmem:[#allocation2 + $0x1bd0] ss:$72 sps:$4 sm:$0xff]  }
 0xd47   :  { %9154 = vmatprep.subr.bf16.mxu0 %v12689_v38  ;;  %v12761_v38 = vld [vmem:[#allocation2 + $0x1c64] ss:$72 sps:$4 sm:$0xff]  }
 0xd4a   :  { %9155 = vmatpush1.bf16.msra.mxu0 %v12687_v30  ;;  %v12762_v30 = vld [vmem:[#allocation2 + $0x1cf0] ss:$72 sps:$4 sm:$0xff]  }
 0xd4b   :  { %9156 = vmatprep.subr.bf16.mxu0 %v12692_v48  ;;  %v12767_v48 = vld [vmem:[#allocation2 + $0x1d84] ss:$72 sps:$4 sm:$0xff]  }
 0xd4e   :  { %9157 = vmatpush1.bf16.msra.mxu0 %v12690_v36  ;;  %v12768_v36 = vld [vmem:[#allocation2 + $0x1e10] ss:$72 sps:$4 sm:$0xff]  }
 0xd4f   :  { %9158 = vmatprep.subr.bf16.mxu0 %v12695_v34  ;;  %v12773_v34 = vld [vmem:[#allocation2 + $0x1ea4] ss:$72 sps:$4 sm:$0xff]  }
 0xd52   :  { %9159 = vmatpush1.bf16.msra.mxu0 %v12693_v41 }
 0xd53   :  { %9160 = vmatprep.subr.bf16.mxu0 %v12698_v37  ;;  %v12771_v37 = vld [vmem:[#allocation2 + $0x1ea0] ss:$72 sps:$4 sm:$0xff]  }
 0xd56   :  { %9161 = vmatpush1.bf16.msra.mxu0 %v12696_v52 }
 0xd57   :  { %9162 = vmatprep.subr.bf16.mxu0 %v12701_v43 }
 0xd5a   :  { %9163 = vmatpush1.bf16.msra.mxu0 %v12699_v55 }
 0xd5b   :  { %9164 = vmatprep.subr.bf16.mxu0 %v12704_v44  ;;  %v12774_v44 = vld [vmem:[#allocation2 + $0x1f30] ss:$72 sps:$4 sm:$0xff]  }
 0xd5e   :  { %9165 = vmatpush1.bf16.msra.mxu0 %v12702_v45  ;;  %v12829_v45 = vld [vmem:[%s13392_s0 + $0x18] ss:$28 sps:$4 sm:$0xff]  }
 0xd5f   :  { %9177 = vmatprep.subr.bf16.mxu0 %v12707_v46  ;;  %v12788_v46 = vld [vmem:[#allocation6 + $0x428] sm:$0xff]  }
 0xd60   :  { %10930 = vmatpush3.bf16.msra.mxu1 %v12788_v46 }
 0xd61   :  { %9167 = vmatmul.mubr.bf16.vlgmr.msra.gmra.mrb[32].mxu0 %v12826_v58  ;;  %v12792_v58 = vld [vmem:[#allocation6 + $0x438] sm:$0xff]  }
 0xd62   :  { %9178 = vmatpush1.bf16.msra.mxu0 %v12705_v47  ;;  %9209 = vmatprep.mubr.bf16.mxu0 %v12827_v53  ;;  %v12789_v47 = vld [vmem:[#allocation6 + $0x470] sm:$0xff]  }
 0xd63   :  { %9179 = vmatprep.subr.bf16.mxu0 %v12710_v49  ;;  %v12790_v49 = vld [vmem:[#allocation6 + $0x430] sm:$0xff]   ;;  %10931 = vmatprep.subr.bf16.mxu1 %v12789_v47 }
 0xd64   :  { %10932 = vmatpush3.bf16.msra.mxu1 %v12790_v49 }
 0xd66   :  { %9180 = vmatpush1.bf16.msra.mxu0 %v12708_v51  ;;  %v8519_v51 = vld [vmem:[#allocation4 + $0x10] sm:$0x3] }
 0xd67   :  { %9181 = vmatprep.subr.bf16.mxu0 %v12713_v56  ;;  %v8524_v53 = vrot.slane %v8519_v51, %v13141_v17  ;;  %v8528_v56 = vrot.slane %v8519_v51, %v13143_v18  ;;  %v12794_v17 = vld [vmem:[#allocation9 + $0x8] sm:$0xff]   ;;  %v12795_v18 = vld [vmem:[#allocation9 + $0x10] sm:$0xff]  }
 0xd6a   :  { %9182 = vmatpush1.bf16.msra.mxu0 %v12711_v57 }
 0xd6b   :  { %9183 = vmatprep.subr.bf16.mxu0 %v12716_v9 }
 0xd6e   :  { %9184 = vmatpush1.bf16.msra.mxu0 %v12714_v2 }
 0xd6f   :  { %9185 = vmatprep.subr.bf16.mxu0 %v12719_v59 }
 0xd72   :  { %9186 = vmatpush1.bf16.msra.mxu0 %v12717_v60 }
 0xd73   :  { %9187 = vmatprep.subr.bf16.mxu0 %v12722_v6 }
 0xd76   :  { %9188 = vmatpush1.bf16.msra.mxu0 %v12720_v61 }
 0xd77   :  { %9189 = vmatprep.subr.bf16.mxu0 %v12725_v62 }
 0xd7a   :  { %9190 = vmatpush1.bf16.msra.mxu0 %v12723_v0 }
 0xd7b   :  { %9191 = vmatprep.subr.bf16.mxu0 %v12728_v63 }
 0xd7e   :  { %9192 = vmatpush1.bf16.msra.mxu0 %v12726_v1 }
 0xd7f   :  { %9193 = vmatprep.subr.bf16.mxu0 %v12731_v8 }
 0xd82   :  { %9194 = vmatpush1.bf16.msra.mxu0 %v12729_v7 }
 0xd83   :  { %9195 = vmatprep.subr.bf16.mxu0 %v12734_v10 }
 0xd86   :  { %9196 = vmatpush1.bf16.msra.mxu0 %v12732_v33  ;;  %v12793_v33 = vld [vmem:[#allocation9] sm:$0xff]  }
 0xd87   :  { %9197 = vmatprep.subr.bf16.mxu0 %v12737_v12  ;;  %v12796_v12 = vld [vmem:[#allocation9 + $0x18] sm:$0xff]  }
 0xd8a   :  { %9198 = vmatpush1.bf16.msra.mxu0 %v12735_v21  ;;  %v12797_v21 = vld [vmem:[#allocation9 + $0x20] sm:$0xff]  }
 0xd8b   :  { %9199 = vmatprep.subr.bf16.mxu0 %v12740_v13  ;;  %v12798_v13 = vld [vmem:[#allocation9 + $0x28] sm:$0xff]  }
 0xd8e   :  { %9200 = vmatpush1.bf16.msra.mxu0 %v12738_v50  ;;  %v12799_v50 = vld [vmem:[#allocation9 + $0x30] sm:$0xff]  }
 0xd8f   :  { %9201 = vmatprep.subr.bf16.mxu0 %v12743_v23  ;;  %v12800_v23 = vld [vmem:[#allocation9 + $0x38] sm:$0xff]  }
 0xd92   :  { %9202 = vmatpush1.bf16.msra.mxu0 %v12741_v14 }
 0xd93   :  { %9203 = vmatprep.subr.bf16.mxu0 %v12746_v25 }
 0xd96   :  { %9204 = vmatpush1.bf16.msra.mxu0 %v12744_v15 }
 0xd97   :  { %9205 = vmatprep.subr.bf16.mxu0 %v12749_v16 }
 0xd9a   :  { %9206 = vmatpush1.bf16.msra.mxu0 %v12747_v26  ;;  %v10733_v26 = vld [vmem:[#allocation7] ss:$0 sm:$0xff] }
 0xd9b   :  { %9207 = vmatprep.subr.bf16.mxu0 %v12752_v20 }
 0xd9e   :  { %9208 = vmatpush1.bf16.msra.mxu0 %v12750_v22 }
 0xd9f   :  { %9220 = vmatprep.subr.bf16.mxu0 %v12755_v4 }
 0xda1   :  { %9210 = vmatmul.mubr.bf16.vlgmr.msra.gmra.mrb[32].mxu0 %v12828_v27 }
 0xda2   :  { %9221 = vmatpush1.bf16.msra.mxu0 %v12753_v24  ;;  %9252 = vmatprep.mubr.bf16.mxu0 %v12980_v19 }
 0xda3   :  { %9222 = vmatprep.subr.bf16.mxu0 %v12758_v54 }
 0xda6   :  { %9223 = vmatpush1.bf16.msra.mxu0 %v12756_v29 }
 0xda7   :  { %9224 = vmatprep.subr.bf16.mxu0 %v12761_v38 }
 0xdaa   :  { %9225 = vmatpush1.bf16.msra.mxu0 %v12759_v28 }
 0xdab   :  { %9226 = vmatprep.subr.bf16.mxu0 %v12764_v40  ;;  %v10734_v40 = vld [vmem:[#allocation10] ss:$0 sm:$0xff] }
 0xdae   :  { %9227 = vmatpush1.bf16.msra.mxu0 %v12762_v30 }
 0xdaf   :  { %9228 = vmatprep.subr.bf16.mxu0 %v12767_v48 }
 0xdb2   :  { %9229 = vmatpush1.bf16.msra.mxu0 %v12765_v31 }
 0xdb3   :  { %9230 = vmatprep.subr.bf16.mxu0 %v12770_v32 }
 0xdb4   :  { %v10913_v39 = vpop.f32.mrb[28].mxu0 }
 0xdb5   :  { %v10914_v19 = vpop.f32.mrb[29].mxu0 }
 0xdb6   :  { %v10915_v35 = vadd.f32 %v10914_v19, %v10913_v39  ;;  %9231 = vmatpush1.bf16.msra.mxu0 %v12768_v36  ;;  %v10916_v41 = vpop.f32.mrb[30].mxu0 }
 0xdb7   :  { %v10917_v42 = vpop.f32.mrb[31].mxu0  ;;  %9232 = vmatprep.subr.bf16.mxu0 %v12773_v34 }
 0xdb8   :  { %v13374_v52 = vadd.f32 %v10915_v35, %v13346_v3  ;;  %v10918_v43 = vadd.f32 %v10917_v42, %v10916_v41  ;;  %v12791_v3 = vld [vmem:[#allocation6 + $0x478] sm:$0xff]  }
 0xdb9   :  { %10933 = vmatprep.subr.bf16.mxu1 %v12791_v3 }
 0xdba   :  { %v13377_v55 = vadd.f32 %v10918_v43, %v13349_v5  ;;  %9233 = vmatpush1.bf16.msra.mxu0 %v12771_v37  ;;  %10934 = vmatpush3.bf16.msra.mxu1 %v12792_v58  ;;  %v12981_v5 = vmov 0.0  }
 0xdbb   :  { %9234 = vmatprep.subr.bf16.mxu0 %v12776_v11  ;;  %10950 = vmatprep.subr.bf16.mxu1 %v12981_v5 }
 0xdbe   :  { %9235 = vmatpush1.bf16.msra.mxu0 %v12774_v44 }
 0xdc1   :  { %9253 = vmatmul.mubr.bf16.vlgmr.msra.gmra.mrb[32].mxu0 %v12829_v45 }
 0xe94   :  { %v9254_v57 = vpop.f32.mrb[32].mxu0 }
 0xe95   :  { %v11006_v9 = vadd.f32 %v9254_v57, %v8524_v53  ;;  %v9256_v2 = vpop.f32.mrb[33].mxu0 }
 0xe96   :  { %v11007_v59 = vadd.f32 %v9256_v2, %v8528_v56  ;;  %v9258_v60 = vpop.f32.mrb[34].mxu0 }
 0xe97   :  { %v11008_v6 = vadd.f32 %v9258_v60, %v8524_v53  ;;  %v9260_v61 = vpop.f32.mrb[35].mxu0  ;;  %v9263_v0 = vmax.f32 %v11006_v9, 0.0 }
 0xe98   :  { %v11009_v62 = vadd.f32 %v9260_v61, %v8528_v56  ;;  %v9264_v1 = vmax.f32 %v11007_v59, 0.0 }
 0xe99   :  { %v9265_v63 = vmax.f32 %v11008_v6, 0.0 }
 0xe9a   :  { %v9266_v8 = vmax.f32 %v11009_v62, 0.0 }
 0xe9b   :  { %v9267_v7 = vpack.c.bf16 %v9265_v63, %v9263_v0 }
 0xe9c   :  { %v9268_v10 = vpack.c.bf16 %v9266_v8, %v9264_v1 }
 0xe9e   :  { %9429 = vmatprep.mubr.bf16.mxu1 %v9268_v10 }
 0xe9f   :  { %9430 = vmatmul.mubr.bf16.vlgmr.msra.gmra.mrb[36].mxu1 %v9267_v7 }
 0xea0   :  { %10951 = vmatpush3.bf16.msra.mxu1 %v12793_v33  ;;  %10966 = vmatprep.mubr.msk.bf16.mxu1 %vm12982_vm0, %v12981_v5 }
 0xea1   :  { %10952 = vmatprep.subr.bf16.mxu1 %v12981_v5 }
 0xea4   :  { %10953 = vmatpush3.bf16.msra.mxu1 %v12794_v17 }
 0xea5   :  { %10954 = vmatprep.subr.bf16.mxu1 %v12981_v5 }
 0xea8   :  { %10955 = vmatpush3.bf16.msra.mxu1 %v12795_v18 }
 0xea9   :  { %10956 = vmatprep.subr.bf16.mxu1 %v12981_v5 }
 0xeac   :  { %10957 = vmatpush3.bf16.msra.mxu1 %v12796_v12 }
 0xead   :  { %10958 = vmatprep.subr.bf16.mxu1 %v12981_v5 }
 0xeb0   :  { %10959 = vmatpush3.bf16.msra.mxu1 %v12797_v21 }
 0xeb1   :  { %10960 = vmatprep.subr.bf16.mxu1 %v12981_v5 }
 0xeb4   :  { %10961 = vmatpush3.bf16.msra.mxu1 %v12798_v13 }
 0xeb5   :  { %10962 = vmatprep.subr.bf16.mxu1 %v12981_v5 }
 0xeb8   :  { %10963 = vmatpush3.bf16.msra.mxu1 %v12799_v50 }
 0xeb9   :  { %10964 = vmatprep.subr.bf16.mxu1 %v12981_v5 }
 0xebc   :  { %10965 = vmatpush3.bf16.msra.mxu1 %v12800_v23 }
 0xf72   :  { %v10935_v14 = vpop.f32.mrb[36].mxu1 }
 0xf73   :  { %v10936_v25 = vpop.f32.mrb[37].mxu1 }
 0xf74   :  { %v10937_v15 = vadd.f32 %v10936_v25, %v10935_v14  ;;  %v10938_v16 = vpop.f32.mrb[38].mxu1 }
 0xf75   :  { %v10939_v20 = vpop.f32.mrb[39].mxu1 }
 0xf76   :  { %v9438_v22 = vadd.f32 %v10937_v15, %v13374_v52  ;;  %v10940_v4 = vadd.f32 %v10939_v20, %v10938_v16 }
 0xf78   :  { %v9447_v24 = vadd.f32 %v10733_v26, %v9438_v22  ;;  %v9439_v54 = vadd.f32 %v10940_v4, %v13377_v55 }
 0xf7a   :  { %v9448_v27 = vadd.f32 %v10733_v26, %v9439_v54  ;;  %v9449_v29 = vmax.f32 %v9447_v24, 0.0 }
 0xf7c   :  { %v9450_v38 = vmax.f32 %v9448_v27, 0.0 }
 0xf7e   :  { %v9451_v28 = vpack.c.bf16 %v9450_v38, %v9449_v29 }
 0xf80   :  { %10967 = vmatmul.mubr.bf16.vlgmr.msra.gmra.mrb[40].mxu1 %v9451_v28 }
0x1053   :  { %v9557_v30 = vpop.f32.mrb[40].mxu1 }
0x1054   :  { %v9558_v48 = vadd.f32 %v10734_v40, %v9557_v30  ;;  %v10968_v31 = vpop.f32.mrb[41].mxu1 }
0x1055   :  { %v9560_v32 = vpop.f32.mrb[42].mxu1 }
0x1056   :  { %9564 = vst [vmem:[%s13399_s7] sm:$0xff] %v9558_v48  ;;  %v9561_v36 = vadd.f32 %v10734_v40, %v9560_v32  ;;  %v10969_v34 = vpop.f32.mrb[43].mxu1 }
0x1058   :  { %9565 = vst [vmem:[%s13399_s7 + $0x8] sm:$0xff] %v9561_v36 }
0x1059   :  { %9570 = vsyncpa [#allocation3], 1 }
0x105a   :  { %9571 = vsyncpa [#allocation5], 1 }
0x105b   :  { %9572 = vsyncpa [#allocation8], 1 }
0x105c   :  { %9573 = vsyncpa [#allocation11], 1 }

</bundles_post_ra>
